<compile_context>
chip_gen: v5e
topology: v5e:2x2
jax: 0.10.0
libtpu: 0.0.40
codegen_flags: <defaults>
</compile_context>

<pallas_src>
import jax
import jax.numpy as jnp
from jax import lax
from jax.experimental import pallas as pl
from jax.experimental.pallas import tpu as pltpu


def basic_block_kernel(x_ref, w1_ref, b1_ref, w2_ref, b2_ref,
                       out_ref, xpad_ref, mid_ref):
    _, Hp, Wp, C = xpad_ref.shape
    H, W = Hp - 2, Wp - 2

    # ---- zero ONLY the 1-pixel halo ring of both padded scratches ----------
    # (scratch persists across grid steps; the interior is fully rewritten
    #  below, so no full-tensor memset is needed.  Re-zeroed every step so the
    #  result is correct no matter which core runs which grid index.)
    zrow = jnp.zeros((1, 1, Wp, C), jnp.float32)
    zcol = jnp.zeros((1, Hp, 1, C), jnp.float32)
    for ref in (xpad_ref, mid_ref):
        ref[:, 0:1, :, :] = zrow
        ref[:, Hp - 1:Hp, :, :] = zrow
        ref[:, :, 0:1, :] = zcol
        ref[:, :, Wp - 1:Wp, :] = zcol

    # ---- stage the input tile into the padded scratch (pad = 1) ------------
    xpad_ref[:, 1:1 + H, 1:1 + W, :] = x_ref[...]

    # ---- conv1: 9 shifted-window matmuls, bf16 operands, f32 MXU accum -----
    # (BN1 scale is already folded into w1; only the bias is added here.)
    acc = jnp.zeros((H * W, C), jnp.float32)
    for ky in range(3):
        for kx in range(3):
            patch = xpad_ref[:, ky:ky + H, kx:kx + W, :].reshape(H * W, C)
            acc = acc + jnp.dot(patch.astype(jnp.bfloat16), w1_ref[ky, kx],
                                preferred_element_type=jnp.float32)
    h1 = jnp.maximum(acc + b1_ref[...], 0.0)          # bias1 + ReLU

    # ---- re-pad intermediate for conv2 (interior only; halo already zero) --
    mid_ref[:, 1:1 + H, 1:1 + W, :] = h1.reshape(1, H, W, C)

    # ---- conv2 --------------------------------------------------------------
    acc = jnp.zeros((H * W, C), jnp.float32)
    for ky in range(3):
        for kx in range(3):
            patch = mid_ref[:, ky:ky + H, kx:kx + W, :].reshape(H * W, C)
            acc = acc + jnp.dot(patch.astype(jnp.bfloat16), w2_ref[ky, kx],
                                preferred_element_type=jnp.float32)

    # bias2 + identity shortcut (reuses the same VMEM input block) + ReLU
    h2 = (acc + b2_ref[...]).reshape(1, H, W, C)
    out_ref[...] = jnp.maximum(h2 + x_ref[...], 0.0).astype(out_ref.dtype)


def basic_block_forward(x_nchw, params, eps=1e-5):
    """BasicBlock forward (stride=1, in_planes == planes -> identity shortcut).

    x_nchw: [N, C, H, W] float32 (PyTorch layout).  Returns [N, C, H, W].
    """
    x = jnp.transpose(x_nchw, (0, 2, 3, 1))  # NCHW -> NHWC
    N, H, W, C = x.shape

    def fold_bn_into_conv(w, gamma, beta, mean, var):
        scale = gamma / jnp.sqrt(var + eps)                 # [Cout]
        bias = beta - mean * scale                          # [Cout]
        w_folded = (w * scale.reshape(1, 1, 1, C)).astype(jnp.bfloat16)
        return w_folded, bias.reshape(1, C).astype(jnp.float32)

    w1f, b1 = fold_bn_into_conv(params['w1'], params['bn1_gamma'],
                                params['bn1_beta'], params['bn1_mean'],
                                params['bn1_var'])
    w2f, b2 = fold_bn_into_conv(params['w2'], params['bn2_gamma'],
                                params['bn2_beta'], params['bn2_mean'],
                                params['bn2_var'])

    out = pl.pallas_call(
        basic_block_kernel,
        out_shape=jax.ShapeDtypeStruct((N, H, W, C), jnp.float32),
        grid_spec=pltpu.PrefetchScalarGridSpec(
            num_scalar_prefetch=0,
            grid=(N,),  # one image per grid step; pipelined, parallel axis
            in_specs=[
                pl.BlockSpec((1, H, W, C), lambda n: (n, 0, 0, 0)),   # x
                pl.BlockSpec((3, 3, C, C), lambda n: (0, 0, 0, 0)),   # w1 (bf16)
                pl.BlockSpec((1, C), lambda n: (0, 0)),               # b1
                pl.BlockSpec((3, 3, C, C), lambda n: (0, 0, 0, 0)),   # w2 (bf16)
                pl.BlockSpec((1, C), lambda n: (0, 0)),               # b2
            ],
            out_specs=pl.BlockSpec((1, H, W, C), lambda n: (n, 0, 0, 0)),
            scratch_shapes=[
                pltpu.VMEM((1, H + 2, W + 2, C), jnp.float32),  # padded x tile
                pltpu.VMEM((1, H + 2, W + 2, C), jnp.float32),  # padded conv1 out
            ],
        ),
        compiler_params=pltpu.CompilerParams(
            dimension_semantics=("parallel",),
            # Tiny per-tile footprint; explicit limit leaves ample headroom for
            # double-buffering on v5e (16 MiB default scope) and v7x (64 MiB).
            vmem_limit_bytes=32 * 1024 * 1024,
        ),
    )(x, w1f, b1, w2f, b2)

    return jnp.transpose(out, (0, 3, 1, 2))  # NHWC -> NCHW


def reference_forward(x_nchw, params, eps=1e-5):
    """Pure-JAX reference (lax.conv) matching the PyTorch forward (eval-mode BN)."""
    x = jnp.transpose(x_nchw, (0, 2, 3, 1))
    dn = ('NHWC', 'HWIO', 'NHWC')

    def bn(y, g, b, m, v):
        return (y - m) / jnp.sqrt(v + eps) * g + b

    h = lax.conv_general_dilated(x, params['w1'], (1, 1), 'SAME',
                                 dimension_numbers=dn,
                                 precision=lax.Precision.HIGHEST)
    h = jax.nn.relu(bn(h, params['bn1_gamma'], params['bn1_beta'],
                       params['bn1_mean'], params['bn1_var']))
    h = lax.conv_general_dilated(h, params['w2'], (1, 1), 'SAME',
                                 dimension_numbers=dn,
                                 precision=lax.Precision.HIGHEST)
    h = bn(h, params['bn2_gamma'], params['bn2_beta'],
           params['bn2_mean'], params['bn2_var'])
    return jnp.transpose(jax.nn.relu(h + x), (0, 3, 1, 2))


def init_params(key, planes):
    """Deterministic synthetic parameters matching BasicBlock(in_planes=planes, planes)."""
    ks = jax.random.split(key, 10)
    return {
        'w1': 0.1 * jax.random.normal(ks[0], (3, 3, planes, planes), jnp.float32),
        'w2': 0.1 * jax.random.normal(ks[1], (3, 3, planes, planes), jnp.float32),
        'bn1_gamma': 1.0 + 0.1 * jax.random.normal(ks[2], (planes,), jnp.float32),
        'bn1_beta': 0.1 * jax.random.normal(ks[3], (planes,), jnp.float32),
        'bn1_mean': 0.1 * jax.random.normal(ks[4], (planes,), jnp.float32),
        'bn1_var': jax.random.uniform(ks[5], (planes,), jnp.float32, 0.5, 1.5),
        'bn2_gamma': 1.0 + 0.1 * jax.random.normal(ks[6], (planes,), jnp.float32),
        'bn2_beta': 0.1 * jax.random.normal(ks[7], (planes,), jnp.float32),
        'bn2_mean': 0.1 * jax.random.normal(ks[8], (planes,), jnp.float32),
        'bn2_var': jax.random.uniform(ks[9], (planes,), jnp.float32, 0.5, 1.5),
    }


if __name__ == "__main__":
    N, C, H, W = 2, 8, 16, 16  # small shapes; in_planes == planes == 8, stride=1
    key = jax.random.PRNGKey(0)
    k_x, k_p = jax.random.split(key)
    x = jax.random.normal(k_x, (N, C, H, W), jnp.float32)
    params = init_params(k_p, C)

    out = jax.jit(basic_block_forward)(x, params)
    out = jax.block_until_ready(out)

    ref = jax.block_until_ready(reference_forward(x, params))
    assert out.shape == (N, C, H, W), out.shape
    # bf16 MXU operands (f32 accumulation) through two chained convs ->
    # tolerance loosened vs. a pure-f32 kernel; real bugs produce O(1) errors.
    assert jnp.allclose(out, ref, atol=1e-1, rtol=2e-2), \
        f"max abs err = {jnp.max(jnp.abs(out - ref))}"

    print("KERNEL_OK")
</pallas_src>

<mosaic_0001>
module attributes {stable_mosaic.version = 11 : i64} {
  func.func @basic_block_kernel(%arg0: i32, %arg1: memref<1x16x16x8xf32, #tpu.memory_space<vmem>>, %arg2: memref<3x3x8x8xbf16, #tpu.memory_space<vmem>>, %arg3: memref<1x8xf32, #tpu.memory_space<vmem>>, %arg4: memref<3x3x8x8xbf16, #tpu.memory_space<vmem>>, %arg5: memref<1x8xf32, #tpu.memory_space<vmem>>, %arg6: memref<1x16x16x8xf32, #tpu.memory_space<vmem>>, %arg7: memref<1x18x18x8xf32, #tpu.memory_space<vmem>>, %arg8: memref<1x18x18x8xf32, #tpu.memory_space<vmem>>) attributes {dimension_semantics = [#tpu.dimension_semantics<parallel>], iteration_bounds = array<i64: 2>, scalar_prefetch = 0 : i64, scratch_operands = 2 : i64, tpu.core_type = #tpu.core_type<tc>, window_params = [{transform_indices = @transform_0, window_bounds = array<i64: 1, 16, 16, 8>}, {pipeline_mode = #tpu.pipeline_mode<synchronous>, transform_indices = @transform_1, window_bounds = array<i64: 3, 3, 8, 8>}, {pipeline_mode = #tpu.pipeline_mode<synchronous>, transform_indices = @transform_2, window_bounds = array<i64: 1, 8>}, {pipeline_mode = #tpu.pipeline_mode<synchronous>, transform_indices = @transform_3, window_bounds = array<i64: 3, 3, 8, 8>}, {pipeline_mode = #tpu.pipeline_mode<synchronous>, transform_indices = @transform_4, window_bounds = array<i64: 1, 8>}, {transform_indices = @transform_5, window_bounds = array<i64: 1, 16, 16, 8>}]} {
    %cst = arith.constant 0.000000e+00 : f32
    %0 = vector.broadcast %cst : f32 to vector<1x1x18x8xf32>
    %cst_0 = arith.constant 0.000000e+00 : f32
    %1 = vector.broadcast %cst_0 : f32 to vector<1x18x1x8xf32>
    %c0 = arith.constant 0 : index
    %c0_1 = arith.constant 0 : index
    %c0_2 = arith.constant 0 : index
    %c0_3 = arith.constant 0 : index
    %2 = vector.load %arg7[%c0, %c0_1, %c0_2, %c0_3] : memref<1x18x18x8xf32, #tpu.memory_space<vmem>>, vector<1x1x18x8xf32>
    tpu.vector_store %arg7[%c0, %c0_1, %c0_2, %c0_3], %0 {strides = array<i32>} : memref<1x18x18x8xf32, #tpu.memory_space<vmem>>, vector<1x1x18x8xf32>,
    %c0_4 = arith.constant 0 : index
    %c17 = arith.constant 17 : index
    %c0_5 = arith.constant 0 : index
    %c0_6 = arith.constant 0 : index
    %3 = vector.load %arg7[%c0_4, %c17, %c0_5, %c0_6] : memref<1x18x18x8xf32, #tpu.memory_space<vmem>>, vector<1x1x18x8xf32>
    tpu.vector_store %arg7[%c0_4, %c17, %c0_5, %c0_6], %0 {strides = array<i32>} : memref<1x18x18x8xf32, #tpu.memory_space<vmem>>, vector<1x1x18x8xf32>,
    %c0_7 = arith.constant 0 : index
    %c0_8 = arith.constant 0 : index
    %c0_9 = arith.constant 0 : index
    %c0_10 = arith.constant 0 : index
    %4 = vector.load %arg7[%c0_7, %c0_8, %c0_9, %c0_10] : memref<1x18x18x8xf32, #tpu.memory_space<vmem>>, vector<1x18x1x8xf32>
    tpu.vector_store %arg7[%c0_7, %c0_8, %c0_9, %c0_10], %1 {strides = array<i32>} : memref<1x18x18x8xf32, #tpu.memory_space<vmem>>, vector<1x18x1x8xf32>,
    %c0_11 = arith.constant 0 : index
    %c0_12 = arith.constant 0 : index
    %c17_13 = arith.constant 17 : index
    %c0_14 = arith.constant 0 : index
    %5 = vector.load %arg7[%c0_11, %c0_12, %c17_13, %c0_14] : memref<1x18x18x8xf32, #tpu.memory_space<vmem>>, vector<1x18x1x8xf32>
    tpu.vector_store %arg7[%c0_11, %c0_12, %c17_13, %c0_14], %1 {strides = array<i32>} : memref<1x18x18x8xf32, #tpu.memory_space<vmem>>, vector<1x18x1x8xf32>,
    %c0_15 = arith.constant 0 : index
    %c0_16 = arith.constant 0 : index
    %c0_17 = arith.constant 0 : index
    %c0_18 = arith.constant 0 : index
    %6 = vector.load %arg8[%c0_15, %c0_16, %c0_17, %c0_18] : memref<1x18x18x8xf32, #tpu.memory_space<vmem>>, vector<1x1x18x8xf32>
    tpu.vector_store %arg8[%c0_15, %c0_16, %c0_17, %c0_18], %0 {strides = array<i32>} : memref<1x18x18x8xf32, #tpu.memory_space<vmem>>, vector<1x1x18x8xf32>,
    %c0_19 = arith.constant 0 : index
    %c17_20 = arith.constant 17 : index
    %c0_21 = arith.constant 0 : index
    %c0_22 = arith.constant 0 : index
    %7 = vector.load %arg8[%c0_19, %c17_20, %c0_21, %c0_22] : memref<1x18x18x8xf32, #tpu.memory_space<vmem>>, vector<1x1x18x8xf32>
    tpu.vector_store %arg8[%c0_19, %c17_20, %c0_21, %c0_22], %0 {strides = array<i32>} : memref<1x18x18x8xf32, #tpu.memory_space<vmem>>, vector<1x1x18x8xf32>,
    %c0_23 = arith.constant 0 : index
    %c0_24 = arith.constant 0 : index
    %c0_25 = arith.constant 0 : index
    %c0_26 = arith.constant 0 : index
    %8 = vector.load %arg8[%c0_23, %c0_24, %c0_25, %c0_26] : memref<1x18x18x8xf32, #tpu.memory_space<vmem>>, vector<1x18x1x8xf32>
    tpu.vector_store %arg8[%c0_23, %c0_24, %c0_25, %c0_26], %1 {strides = array<i32>} : memref<1x18x18x8xf32, #tpu.memory_space<vmem>>, vector<1x18x1x8xf32>,
    %c0_27 = arith.constant 0 : index
    %c0_28 = arith.constant 0 : index
    %c17_29 = arith.constant 17 : index
    %c0_30 = arith.constant 0 : index
    %9 = vector.load %arg8[%c0_27, %c0_28, %c17_29, %c0_30] : memref<1x18x18x8xf32, #tpu.memory_space<vmem>>, vector<1x18x1x8xf32>
    tpu.vector_store %arg8[%c0_27, %c0_28, %c17_29, %c0_30], %1 {strides = array<i32>} : memref<1x18x18x8xf32, #tpu.memory_space<vmem>>, vector<1x18x1x8xf32>,
    %c0_31 = arith.constant 0 : index
    %c0_32 = arith.constant 0 : index
    %c0_33 = arith.constant 0 : index
    %c0_34 = arith.constant 0 : index
    %10 = vector.load %arg1[%c0_31, %c0_32, %c0_33, %c0_34] : memref<1x16x16x8xf32, #tpu.memory_space<vmem>>, vector<1x16x16x8xf32>
    %c0_35 = arith.constant 0 : index
    %c1 = arith.constant 1 : index
    %c1_36 = arith.constant 1 : index
    %c0_37 = arith.constant 0 : index
    %11 = vector.load %arg7[%c0_35, %c1, %c1_36, %c0_37] : memref<1x18x18x8xf32, #tpu.memory_space<vmem>>, vector<1x16x16x8xf32>
    tpu.vector_store %arg7[%c0_35, %c1, %c1_36, %c0_37], %10 {strides = array<i32>} : memref<1x18x18x8xf32, #tpu.memory_space<vmem>>, vector<1x16x16x8xf32>,
    %cst_38 = arith.constant 0.000000e+00 : f32
    %12 = vector.broadcast %cst_38 : f32 to vector<256x8xf32>
    %c0_39 = arith.constant 0 : index
    %c0_40 = arith.constant 0 : index
    %c0_41 = arith.constant 0 : index
    %c0_42 = arith.constant 0 : index
    %13 = vector.load %arg7[%c0_39, %c0_40, %c0_41, %c0_42] : memref<1x18x18x8xf32, #tpu.memory_space<vmem>>, vector<1x16x16x8xf32>
    %14 = vector.shape_cast %13 : vector<1x16x16x8xf32> to vector<256x8xf32>
    %15 = arith.truncf %14 : vector<256x8xf32> to vector<256x8xbf16>
    %c0_43 = arith.constant 0 : index
    %c0_44 = arith.constant 0 : index
    %c0_45 = arith.constant 0 : index
    %c0_46 = arith.constant 0 : index
    %16 = vector.load %arg2[%c0_43, %c0_44, %c0_45, %c0_46] : memref<3x3x8x8xbf16, #tpu.memory_space<vmem>>, vector<1x1x8x8xbf16>
    %17 = vector.shape_cast %16 : vector<1x1x8x8xbf16> to vector<8x8xbf16>
    %cst_47 = arith.constant dense<0.000000e+00> : vector<256x8xf32>
    %18 = tpu.matmul %15, %17, %cst_47 {dimension_numbers = #tpu.dot_dimension_numbers<[1], [0], [0], [1], [0, 0, 1, 1], [], []>} : vector<256x8xbf16>, vector<8x8xbf16>, vector<256x8xf32> -> vector<256x8xf32>
    %19 = arith.addf %12, %18 : vector<256x8xf32>
    %c0_48 = arith.constant 0 : index
    %c0_49 = arith.constant 0 : index
    %c1_50 = arith.constant 1 : index
    %c0_51 = arith.constant 0 : index
    %20 = vector.load %arg7[%c0_48, %c0_49, %c1_50, %c0_51] : memref<1x18x18x8xf32, #tpu.memory_space<vmem>>, vector<1x16x16x8xf32>
    %21 = vector.shape_cast %20 : vector<1x16x16x8xf32> to vector<256x8xf32>
    %22 = arith.truncf %21 : vector<256x8xf32> to vector<256x8xbf16>
    %c0_52 = arith.constant 0 : index
    %c1_53 = arith.constant 1 : index
    %c0_54 = arith.constant 0 : index
    %c0_55 = arith.constant 0 : index
    %23 = vector.load %arg2[%c0_52, %c1_53, %c0_54, %c0_55] : memref<3x3x8x8xbf16, #tpu.memory_space<vmem>>, vector<1x1x8x8xbf16>
    %24 = vector.shape_cast %23 : vector<1x1x8x8xbf16> to vector<8x8xbf16>
    %cst_56 = arith.constant dense<0.000000e+00> : vector<256x8xf32>
    %25 = tpu.matmul %22, %24, %cst_56 {dimension_numbers = #tpu.dot_dimension_numbers<[1], [0], [0], [1], [0, 0, 1, 1], [], []>} : vector<256x8xbf16>, vector<8x8xbf16>, vector<256x8xf32> -> vector<256x8xf32>
    %26 = arith.addf %19, %25 : vector<256x8xf32>
    %c0_57 = arith.constant 0 : index
    %c0_58 = arith.constant 0 : index
    %c2 = arith.constant 2 : index
    %c0_59 = arith.constant 0 : index
    %27 = vector.load %arg7[%c0_57, %c0_58, %c2, %c0_59] : memref<1x18x18x8xf32, #tpu.memory_space<vmem>>, vector<1x16x16x8xf32>
    %28 = vector.shape_cast %27 : vector<1x16x16x8xf32> to vector<256x8xf32>
    %29 = arith.truncf %28 : vector<256x8xf32> to vector<256x8xbf16>
    %c0_60 = arith.constant 0 : index
    %c2_61 = arith.constant 2 : index
    %c0_62 = arith.constant 0 : index
    %c0_63 = arith.constant 0 : index
    %30 = vector.load %arg2[%c0_60, %c2_61, %c0_62, %c0_63] : memref<3x3x8x8xbf16, #tpu.memory_space<vmem>>, vector<1x1x8x8xbf16>
    %31 = vector.shape_cast %30 : vector<1x1x8x8xbf16> to vector<8x8xbf16>
    %cst_64 = arith.constant dense<0.000000e+00> : vector<256x8xf32>
    %32 = tpu.matmul %29, %31, %cst_64 {dimension_numbers = #tpu.dot_dimension_numbers<[1], [0], [0], [1], [0, 0, 1, 1], [], []>} : vector<256x8xbf16>, vector<8x8xbf16>, vector<256x8xf32> -> vector<256x8xf32>
    %33 = arith.addf %26, %32 : vector<256x8xf32>
    %c0_65 = arith.constant 0 : index
    %c1_66 = arith.constant 1 : index
    %c0_67 = arith.constant 0 : index
    %c0_68 = arith.constant 0 : index
    %34 = vector.load %arg7[%c0_65, %c1_66, %c0_67, %c0_68] : memref<1x18x18x8xf32, #tpu.memory_space<vmem>>, vector<1x16x16x8xf32>
    %35 = vector.shape_cast %34 : vector<1x16x16x8xf32> to vector<256x8xf32>
    %36 = arith.truncf %35 : vector<256x8xf32> to vector<256x8xbf16>
    %c1_69 = arith.constant 1 : index
    %c0_70 = arith.constant 0 : index
    %c0_71 = arith.constant 0 : index
    %c0_72 = arith.constant 0 : index
    %37 = vector.load %arg2[%c1_69, %c0_70, %c0_71, %c0_72] : memref<3x3x8x8xbf16, #tpu.memory_space<vmem>>, vector<1x1x8x8xbf16>
    %38 = vector.shape_cast %37 : vector<1x1x8x8xbf16> to vector<8x8xbf16>
    %cst_73 = arith.constant dense<0.000000e+00> : vector<256x8xf32>
    %39 = tpu.matmul %36, %38, %cst_73 {dimension_numbers = #tpu.dot_dimension_numbers<[1], [0], [0], [1], [0, 0, 1, 1], [], []>} : vector<256x8xbf16>, vector<8x8xbf16>, vector<256x8xf32> -> vector<256x8xf32>
    %40 = arith.addf %33, %39 : vector<256x8xf32>
    %c0_74 = arith.constant 0 : index
    %c1_75 = arith.constant 1 : index
    %c1_76 = arith.constant 1 : index
    %c0_77 = arith.constant 0 : index
    %41 = vector.load %arg7[%c0_74, %c1_75, %c1_76, %c0_77] : memref<1x18x18x8xf32, #tpu.memory_space<vmem>>, vector<1x16x16x8xf32>
    %42 = vector.shape_cast %41 : vector<1x16x16x8xf32> to vector<256x8xf32>
    %43 = arith.truncf %42 : vector<256x8xf32> to vector<256x8xbf16>
    %c1_78 = arith.constant 1 : index
    %c1_79 = arith.constant 1 : index
    %c0_80 = arith.constant 0 : index
    %c0_81 = arith.constant 0 : index
    %44 = vector.load %arg2[%c1_78, %c1_79, %c0_80, %c0_81] : memref<3x3x8x8xbf16, #tpu.memory_space<vmem>>, vector<1x1x8x8xbf16>
    %45 = vector.shape_cast %44 : vector<1x1x8x8xbf16> to vector<8x8xbf16>
    %cst_82 = arith.constant dense<0.000000e+00> : vector<256x8xf32>
    %46 = tpu.matmul %43, %45, %cst_82 {dimension_numbers = #tpu.dot_dimension_numbers<[1], [0], [0], [1], [0, 0, 1, 1], [], []>} : vector<256x8xbf16>, vector<8x8xbf16>, vector<256x8xf32> -> vector<256x8xf32>
    %47 = arith.addf %40, %46 : vector<256x8xf32>
    %c0_83 = arith.constant 0 : index
    %c1_84 = arith.constant 1 : index
    %c2_85 = arith.constant 2 : index
    %c0_86 = arith.constant 0 : index
    %48 = vector.load %arg7[%c0_83, %c1_84, %c2_85, %c0_86] : memref<1x18x18x8xf32, #tpu.memory_space<vmem>>, vector<1x16x16x8xf32>
    %49 = vector.shape_cast %48 : vector<1x16x16x8xf32> to vector<256x8xf32>
    %50 = arith.truncf %49 : vector<256x8xf32> to vector<256x8xbf16>
    %c1_87 = arith.constant 1 : index
    %c2_88 = arith.constant 2 : index
    %c0_89 = arith.constant 0 : index
    %c0_90 = arith.constant 0 : index
    %51 = vector.load %arg2[%c1_87, %c2_88, %c0_89, %c0_90] : memref<3x3x8x8xbf16, #tpu.memory_space<vmem>>, vector<1x1x8x8xbf16>
    %52 = vector.shape_cast %51 : vector<1x1x8x8xbf16> to vector<8x8xbf16>
    %cst_91 = arith.constant dense<0.000000e+00> : vector<256x8xf32>
    %53 = tpu.matmul %50, %52, %cst_91 {dimension_numbers = #tpu.dot_dimension_numbers<[1], [0], [0], [1], [0, 0, 1, 1], [], []>} : vector<256x8xbf16>, vector<8x8xbf16>, vector<256x8xf32> -> vector<256x8xf32>
    %54 = arith.addf %47, %53 : vector<256x8xf32>
    %c0_92 = arith.constant 0 : index
    %c2_93 = arith.constant 2 : index
    %c0_94 = arith.constant 0 : index
    %c0_95 = arith.constant 0 : index
    %55 = vector.load %arg7[%c0_92, %c2_93, %c0_94, %c0_95] : memref<1x18x18x8xf32, #tpu.memory_space<vmem>>, vector<1x16x16x8xf32>
    %56 = vector.shape_cast %55 : vector<1x16x16x8xf32> to vector<256x8xf32>
    %57 = arith.truncf %56 : vector<256x8xf32> to vector<256x8xbf16>
    %c2_96 = arith.constant 2 : index
    %c0_97 = arith.constant 0 : index
    %c0_98 = arith.constant 0 : index
    %c0_99 = arith.constant 0 : index
    %58 = vector.load %arg2[%c2_96, %c0_97, %c0_98, %c0_99] : memref<3x3x8x8xbf16, #tpu.memory_space<vmem>>, vector<1x1x8x8xbf16>
    %59 = vector.shape_cast %58 : vector<1x1x8x8xbf16> to vector<8x8xbf16>
    %cst_100 = arith.constant dense<0.000000e+00> : vector<256x8xf32>
    %60 = tpu.matmul %57, %59, %cst_100 {dimension_numbers = #tpu.dot_dimension_numbers<[1], [0], [0], [1], [0, 0, 1, 1], [], []>} : vector<256x8xbf16>, vector<8x8xbf16>, vector<256x8xf32> -> vector<256x8xf32>
    %61 = arith.addf %54, %60 : vector<256x8xf32>
    %c0_101 = arith.constant 0 : index
    %c2_102 = arith.constant 2 : index
    %c1_103 = arith.constant 1 : index
    %c0_104 = arith.constant 0 : index
    %62 = vector.load %arg7[%c0_101, %c2_102, %c1_103, %c0_104] : memref<1x18x18x8xf32, #tpu.memory_space<vmem>>, vector<1x16x16x8xf32>
    %63 = vector.shape_cast %62 : vector<1x16x16x8xf32> to vector<256x8xf32>
    %64 = arith.truncf %63 : vector<256x8xf32> to vector<256x8xbf16>
    %c2_105 = arith.constant 2 : index
    %c1_106 = arith.constant 1 : index
    %c0_107 = arith.constant 0 : index
    %c0_108 = arith.constant 0 : index
    %65 = vector.load %arg2[%c2_105, %c1_106, %c0_107, %c0_108] : memref<3x3x8x8xbf16, #tpu.memory_space<vmem>>, vector<1x1x8x8xbf16>
    %66 = vector.shape_cast %65 : vector<1x1x8x8xbf16> to vector<8x8xbf16>
    %cst_109 = arith.constant dense<0.000000e+00> : vector<256x8xf32>
    %67 = tpu.matmul %64, %66, %cst_109 {dimension_numbers = #tpu.dot_dimension_numbers<[1], [0], [0], [1], [0, 0, 1, 1], [], []>} : vector<256x8xbf16>, vector<8x8xbf16>, vector<256x8xf32> -> vector<256x8xf32>
    %68 = arith.addf %61, %67 : vector<256x8xf32>
    %c0_110 = arith.constant 0 : index
    %c2_111 = arith.constant 2 : index
    %c2_112 = arith.constant 2 : index
    %c0_113 = arith.constant 0 : index
    %69 = vector.load %arg7[%c0_110, %c2_111, %c2_112, %c0_113] : memref<1x18x18x8xf32, #tpu.memory_space<vmem>>, vector<1x16x16x8xf32>
    %70 = vector.shape_cast %69 : vector<1x16x16x8xf32> to vector<256x8xf32>
    %71 = arith.truncf %70 : vector<256x8xf32> to vector<256x8xbf16>
    %c2_114 = arith.constant 2 : index
    %c2_115 = arith.constant 2 : index
    %c0_116 = arith.constant 0 : index
    %c0_117 = arith.constant 0 : index
    %72 = vector.load %arg2[%c2_114, %c2_115, %c0_116, %c0_117] : memref<3x3x8x8xbf16, #tpu.memory_space<vmem>>, vector<1x1x8x8xbf16>
    %73 = vector.shape_cast %72 : vector<1x1x8x8xbf16> to vector<8x8xbf16>
    %cst_118 = arith.constant dense<0.000000e+00> : vector<256x8xf32>
    %74 = tpu.matmul %71, %73, %cst_118 {dimension_numbers = #tpu.dot_dimension_numbers<[1], [0], [0], [1], [0, 0, 1, 1], [], []>} : vector<256x8xbf16>, vector<8x8xbf16>, vector<256x8xf32> -> vector<256x8xf32>
    %75 = arith.addf %68, %74 : vector<256x8xf32>
    %c0_119 = arith.constant 0 : index
    %c0_120 = arith.constant 0 : index
    %76 = vector.load %arg3[%c0_119, %c0_120] : memref<1x8xf32, #tpu.memory_space<vmem>>, vector<1x8xf32>
    %77 = vector.broadcast %76 : vector<1x8xf32> to vector<256x8xf32>
    %78 = arith.addf %75, %77 : vector<256x8xf32>
    %cst_121 = arith.constant 0.000000e+00 : f32
    %79 = vector.broadcast %cst_121 : f32 to vector<256x8xf32>
    %80 = arith.maximumf %78, %79 : vector<256x8xf32>
    %81 = vector.shape_cast %80 : vector<256x8xf32> to vector<1x16x16x8xf32>
    %c0_122 = arith.constant 0 : index
    %c1_123 = arith.constant 1 : index
    %c1_124 = arith.constant 1 : index
    %c0_125 = arith.constant 0 : index
    %82 = vector.load %arg8[%c0_122, %c1_123, %c1_124, %c0_125] : memref<1x18x18x8xf32, #tpu.memory_space<vmem>>, vector<1x16x16x8xf32>
    tpu.vector_store %arg8[%c0_122, %c1_123, %c1_124, %c0_125], %81 {strides = array<i32>} : memref<1x18x18x8xf32, #tpu.memory_space<vmem>>, vector<1x16x16x8xf32>,
    %cst_126 = arith.constant 0.000000e+00 : f32
    %83 = vector.broadcast %cst_126 : f32 to vector<256x8xf32>
    %c0_127 = arith.constant 0 : index
    %c0_128 = arith.constant 0 : index
    %c0_129 = arith.constant 0 : index
    %c0_130 = arith.constant 0 : index
    %84 = vector.load %arg8[%c0_127, %c0_128, %c0_129, %c0_130] : memref<1x18x18x8xf32, #tpu.memory_space<vmem>>, vector<1x16x16x8xf32>
    %85 = vector.shape_cast %84 : vector<1x16x16x8xf32> to vector<256x8xf32>
    %86 = arith.truncf %85 : vector<256x8xf32> to vector<256x8xbf16>
    %c0_131 = arith.constant 0 : index
    %c0_132 = arith.constant 0 : index
    %c0_133 = arith.constant 0 : index
    %c0_134 = arith.constant 0 : index
    %87 = vector.load %arg4[%c0_131, %c0_132, %c0_133, %c0_134] : memref<3x3x8x8xbf16, #tpu.memory_space<vmem>>, vector<1x1x8x8xbf16>
    %88 = vector.shape_cast %87 : vector<1x1x8x8xbf16> to vector<8x8xbf16>
    %cst_135 = arith.constant dense<0.000000e+00> : vector<256x8xf32>
    %89 = tpu.matmul %86, %88, %cst_135 {dimension_numbers = #tpu.dot_dimension_numbers<[1], [0], [0], [1], [0, 0, 1, 1], [], []>} : vector<256x8xbf16>, vector<8x8xbf16>, vector<256x8xf32> -> vector<256x8xf32>
    %90 = arith.addf %83, %89 : vector<256x8xf32>
    %c0_136 = arith.constant 0 : index
    %c0_137 = arith.constant 0 : index
    %c1_138 = arith.constant 1 : index
    %c0_139 = arith.constant 0 : index
    %91 = vector.load %arg8[%c0_136, %c0_137, %c1_138, %c0_139] : memref<1x18x18x8xf32, #tpu.memory_space<vmem>>, vector<1x16x16x8xf32>
    %92 = vector.shape_cast %91 : vector<1x16x16x8xf32> to vector<256x8xf32>
    %93 = arith.truncf %92 : vector<256x8xf32> to vector<256x8xbf16>
    %c0_140 = arith.constant 0 : index
    %c1_141 = arith.constant 1 : index
    %c0_142 = arith.constant 0 : index
    %c0_143 = arith.constant 0 : index
    %94 = vector.load %arg4[%c0_140, %c1_141, %c0_142, %c0_143] : memref<3x3x8x8xbf16, #tpu.memory_space<vmem>>, vector<1x1x8x8xbf16>
    %95 = vector.shape_cast %94 : vector<1x1x8x8xbf16> to vector<8x8xbf16>
    %cst_144 = arith.constant dense<0.000000e+00> : vector<256x8xf32>
    %96 = tpu.matmul %93, %95, %cst_144 {dimension_numbers = #tpu.dot_dimension_numbers<[1], [0], [0], [1], [0, 0, 1, 1], [], []>} : vector<256x8xbf16>, vector<8x8xbf16>, vector<256x8xf32> -> vector<256x8xf32>
    %97 = arith.addf %90, %96 : vector<256x8xf32>
    %c0_145 = arith.constant 0 : index
    %c0_146 = arith.constant 0 : index
    %c2_147 = arith.constant 2 : index
    %c0_148 = arith.constant 0 : index
    %98 = vector.load %arg8[%c0_145, %c0_146, %c2_147, %c0_148] : memref<1x18x18x8xf32, #tpu.memory_space<vmem>>, vector<1x16x16x8xf32>
    %99 = vector.shape_cast %98 : vector<1x16x16x8xf32> to vector<256x8xf32>
    %100 = arith.truncf %99 : vector<256x8xf32> to vector<256x8xbf16>
    %c0_149 = arith.constant 0 : index
    %c2_150 = arith.constant 2 : index
    %c0_151 = arith.constant 0 : index
    %c0_152 = arith.constant 0 : index
    %101 = vector.load %arg4[%c0_149, %c2_150, %c0_151, %c0_152] : memref<3x3x8x8xbf16, #tpu.memory_space<vmem>>, vector<1x1x8x8xbf16>
    %102 = vector.shape_cast %101 : vector<1x1x8x8xbf16> to vector<8x8xbf16>
    %cst_153 = arith.constant dense<0.000000e+00> : vector<256x8xf32>
    %103 = tpu.matmul %100, %102, %cst_153 {dimension_numbers = #tpu.dot_dimension_numbers<[1], [0], [0], [1], [0, 0, 1, 1], [], []>} : vector<256x8xbf16>, vector<8x8xbf16>, vector<256x8xf32> -> vector<256x8xf32>
    %104 = arith.addf %97, %103 : vector<256x8xf32>
    %c0_154 = arith.constant 0 : index
    %c1_155 = arith.constant 1 : index
    %c0_156 = arith.constant 0 : index
    %c0_157 = arith.constant 0 : index
    %105 = vector.load %arg8[%c0_154, %c1_155, %c0_156, %c0_157] : memref<1x18x18x8xf32, #tpu.memory_space<vmem>>, vector<1x16x16x8xf32>
    %106 = vector.shape_cast %105 : vector<1x16x16x8xf32> to vector<256x8xf32>
    %107 = arith.truncf %106 : vector<256x8xf32> to vector<256x8xbf16>
    %c1_158 = arith.constant 1 : index
    %c0_159 = arith.constant 0 : index
    %c0_160 = arith.constant 0 : index
    %c0_161 = arith.constant 0 : index
    %108 = vector.load %arg4[%c1_158, %c0_159, %c0_160, %c0_161] : memref<3x3x8x8xbf16, #tpu.memory_space<vmem>>, vector<1x1x8x8xbf16>
    %109 = vector.shape_cast %108 : vector<1x1x8x8xbf16> to vector<8x8xbf16>
    %cst_162 = arith.constant dense<0.000000e+00> : vector<256x8xf32>
    %110 = tpu.matmul %107, %109, %cst_162 {dimension_numbers = #tpu.dot_dimension_numbers<[1], [0], [0], [1], [0, 0, 1, 1], [], []>} : vector<256x8xbf16>, vector<8x8xbf16>, vector<256x8xf32> -> vector<256x8xf32>
    %111 = arith.addf %104, %110 : vector<256x8xf32>
    %c0_163 = arith.constant 0 : index
    %c1_164 = arith.constant 1 : index
    %c1_165 = arith.constant 1 : index
    %c0_166 = arith.constant 0 : index
    %112 = vector.load %arg8[%c0_163, %c1_164, %c1_165, %c0_166] : memref<1x18x18x8xf32, #tpu.memory_space<vmem>>, vector<1x16x16x8xf32>
    %113 = vector.shape_cast %112 : vector<1x16x16x8xf32> to vector<256x8xf32>
    %114 = arith.truncf %113 : vector<256x8xf32> to vector<256x8xbf16>
    %c1_167 = arith.constant 1 : index
    %c1_168 = arith.constant 1 : index
    %c0_169 = arith.constant 0 : index
    %c0_170 = arith.constant 0 : index
    %115 = vector.load %arg4[%c1_167, %c1_168, %c0_169, %c0_170] : memref<3x3x8x8xbf16, #tpu.memory_space<vmem>>, vector<1x1x8x8xbf16>
    %116 = vector.shape_cast %115 : vector<1x1x8x8xbf16> to vector<8x8xbf16>
    %cst_171 = arith.constant dense<0.000000e+00> : vector<256x8xf32>
    %117 = tpu.matmul %114, %116, %cst_171 {dimension_numbers = #tpu.dot_dimension_numbers<[1], [0], [0], [1], [0, 0, 1, 1], [], []>} : vector<256x8xbf16>, vector<8x8xbf16>, vector<256x8xf32> -> vector<256x8xf32>
    %118 = arith.addf %111, %117 : vector<256x8xf32>
    %c0_172 = arith.constant 0 : index
    %c1_173 = arith.constant 1 : index
    %c2_174 = arith.constant 2 : index
    %c0_175 = arith.constant 0 : index
    %119 = vector.load %arg8[%c0_172, %c1_173, %c2_174, %c0_175] : memref<1x18x18x8xf32, #tpu.memory_space<vmem>>, vector<1x16x16x8xf32>
    %120 = vector.shape_cast %119 : vector<1x16x16x8xf32> to vector<256x8xf32>
    %121 = arith.truncf %120 : vector<256x8xf32> to vector<256x8xbf16>
    %c1_176 = arith.constant 1 : index
    %c2_177 = arith.constant 2 : index
    %c0_178 = arith.constant 0 : index
    %c0_179 = arith.constant 0 : index
    %122 = vector.load %arg4[%c1_176, %c2_177, %c0_178, %c0_179] : memref<3x3x8x8xbf16, #tpu.memory_space<vmem>>, vector<1x1x8x8xbf16>
    %123 = vector.shape_cast %122 : vector<1x1x8x8xbf16> to vector<8x8xbf16>
    %cst_180 = arith.constant dense<0.000000e+00> : vector<256x8xf32>
    %124 = tpu.matmul %121, %123, %cst_180 {dimension_numbers = #tpu.dot_dimension_numbers<[1], [0], [0], [1], [0, 0, 1, 1], [], []>} : vector<256x8xbf16>, vector<8x8xbf16>, vector<256x8xf32> -> vector<256x8xf32>
    %125 = arith.addf %118, %124 : vector<256x8xf32>
    %c0_181 = arith.constant 0 : index
    %c2_182 = arith.constant 2 : index
    %c0_183 = arith.constant 0 : index
    %c0_184 = arith.constant 0 : index
    %126 = vector.load %arg8[%c0_181, %c2_182, %c0_183, %c0_184] : memref<1x18x18x8xf32, #tpu.memory_space<vmem>>, vector<1x16x16x8xf32>
    %127 = vector.shape_cast %126 : vector<1x16x16x8xf32> to vector<256x8xf32>
    %128 = arith.truncf %127 : vector<256x8xf32> to vector<256x8xbf16>
    %c2_185 = arith.constant 2 : index
    %c0_186 = arith.constant 0 : index
    %c0_187 = arith.constant 0 : index
    %c0_188 = arith.constant 0 : index
    %129 = vector.load %arg4[%c2_185, %c0_186, %c0_187, %c0_188] : memref<3x3x8x8xbf16, #tpu.memory_space<vmem>>, vector<1x1x8x8xbf16>
    %130 = vector.shape_cast %129 : vector<1x1x8x8xbf16> to vector<8x8xbf16>
    %cst_189 = arith.constant dense<0.000000e+00> : vector<256x8xf32>
    %131 = tpu.matmul %128, %130, %cst_189 {dimension_numbers = #tpu.dot_dimension_numbers<[1], [0], [0], [1], [0, 0, 1, 1], [], []>} : vector<256x8xbf16>, vector<8x8xbf16>, vector<256x8xf32> -> vector<256x8xf32>
    %132 = arith.addf %125, %131 : vector<256x8xf32>
    %c0_190 = arith.constant 0 : index
    %c2_191 = arith.constant 2 : index
    %c1_192 = arith.constant 1 : index
    %c0_193 = arith.constant 0 : index
    %133 = vector.load %arg8[%c0_190, %c2_191, %c1_192, %c0_193] : memref<1x18x18x8xf32, #tpu.memory_space<vmem>>, vector<1x16x16x8xf32>
    %134 = vector.shape_cast %133 : vector<1x16x16x8xf32> to vector<256x8xf32>
    %135 = arith.truncf %134 : vector<256x8xf32> to vector<256x8xbf16>
    %c2_194 = arith.constant 2 : index
    %c1_195 = arith.constant 1 : index
    %c0_196 = arith.constant 0 : index
    %c0_197 = arith.constant 0 : index
    %136 = vector.load %arg4[%c2_194, %c1_195, %c0_196, %c0_197] : memref<3x3x8x8xbf16, #tpu.memory_space<vmem>>, vector<1x1x8x8xbf16>
    %137 = vector.shape_cast %136 : vector<1x1x8x8xbf16> to vector<8x8xbf16>
    %cst_198 = arith.constant dense<0.000000e+00> : vector<256x8xf32>
    %138 = tpu.matmul %135, %137, %cst_198 {dimension_numbers = #tpu.dot_dimension_numbers<[1], [0], [0], [1], [0, 0, 1, 1], [], []>} : vector<256x8xbf16>, vector<8x8xbf16>, vector<256x8xf32> -> vector<256x8xf32>
    %139 = arith.addf %132, %138 : vector<256x8xf32>
    %c0_199 = arith.constant 0 : index
    %c2_200 = arith.constant 2 : index
    %c2_201 = arith.constant 2 : index
    %c0_202 = arith.constant 0 : index
    %140 = vector.load %arg8[%c0_199, %c2_200, %c2_201, %c0_202] : memref<1x18x18x8xf32, #tpu.memory_space<vmem>>, vector<1x16x16x8xf32>
    %141 = vector.shape_cast %140 : vector<1x16x16x8xf32> to vector<256x8xf32>
    %142 = arith.truncf %141 : vector<256x8xf32> to vector<256x8xbf16>
    %c2_203 = arith.constant 2 : index
    %c2_204 = arith.constant 2 : index
    %c0_205 = arith.constant 0 : index
    %c0_206 = arith.constant 0 : index
    %143 = vector.load %arg4[%c2_203, %c2_204, %c0_205, %c0_206] : memref<3x3x8x8xbf16, #tpu.memory_space<vmem>>, vector<1x1x8x8xbf16>
    %144 = vector.shape_cast %143 : vector<1x1x8x8xbf16> to vector<8x8xbf16>
    %cst_207 = arith.constant dense<0.000000e+00> : vector<256x8xf32>
    %145 = tpu.matmul %142, %144, %cst_207 {dimension_numbers = #tpu.dot_dimension_numbers<[1], [0], [0], [1], [0, 0, 1, 1], [], []>} : vector<256x8xbf16>, vector<8x8xbf16>, vector<256x8xf32> -> vector<256x8xf32>
    %146 = arith.addf %139, %145 : vector<256x8xf32>
    %c0_208 = arith.constant 0 : index
    %c0_209 = arith.constant 0 : index
    %147 = vector.load %arg5[%c0_208, %c0_209] : memref<1x8xf32, #tpu.memory_space<vmem>>, vector<1x8xf32>
    %148 = vector.broadcast %147 : vector<1x8xf32> to vector<256x8xf32>
    %149 = arith.addf %146, %148 : vector<256x8xf32>
    %150 = vector.shape_cast %149 : vector<256x8xf32> to vector<1x16x16x8xf32>
    %c0_210 = arith.constant 0 : index
    %c0_211 = arith.constant 0 : index
    %c0_212 = arith.constant 0 : index
    %c0_213 = arith.constant 0 : index
    %151 = vector.load %arg1[%c0_210, %c0_211, %c0_212, %c0_213] : memref<1x16x16x8xf32, #tpu.memory_space<vmem>>, vector<1x16x16x8xf32>
    %152 = arith.addf %150, %151 : vector<1x16x16x8xf32>
    %cst_214 = arith.constant 0.000000e+00 : f32
    %153 = vector.broadcast %cst_214 : f32 to vector<1x16x16x8xf32>
    %154 = arith.maximumf %152, %153 : vector<1x16x16x8xf32>
    %c0_215 = arith.constant 0 : index
    %c0_216 = arith.constant 0 : index
    %c0_217 = arith.constant 0 : index
    %c0_218 = arith.constant 0 : index
    %155 = vector.load %arg6[%c0_215, %c0_216, %c0_217, %c0_218] : memref<1x16x16x8xf32, #tpu.memory_space<vmem>>, vector<1x16x16x8xf32>
    tpu.vector_store %arg6[%c0_215, %c0_216, %c0_217, %c0_218], %154 {strides = array<i32>} : memref<1x16x16x8xf32, #tpu.memory_space<vmem>>, vector<1x16x16x8xf32>,
    return
  }
  func.func @transform_0(%arg0: i32) -> (i32, i32, i32, i32) {
    %c0_i32 = arith.constant 0 : i32
    %c0_i32_0 = arith.constant 0 : i32
    %c0_i32_1 = arith.constant 0 : i32
    %c0_i32_2 = arith.constant 0 : i32
    return %arg0, %c0_i32, %c0_i32_0, %c0_i32_1 : i32, i32, i32, i32
  }
  func.func @transform_1(%arg0: i32) -> (i32, i32, i32, i32) {
    %c0_i32 = arith.constant 0 : i32
    %c0_i32_0 = arith.constant 0 : i32
    %c0_i32_1 = arith.constant 0 : i32
    %c0_i32_2 = arith.constant 0 : i32
    %c0_i32_3 = arith.constant 0 : i32
    return %c0_i32, %c0_i32_0, %c0_i32_1, %c0_i32_2 : i32, i32, i32, i32
  }
  func.func @transform_2(%arg0: i32) -> (i32, i32) {
    %c0_i32 = arith.constant 0 : i32
    %c0_i32_0 = arith.constant 0 : i32
    %c0_i32_1 = arith.constant 0 : i32
    return %c0_i32, %c0_i32_0 : i32, i32
  }
  func.func @transform_3(%arg0: i32) -> (i32, i32, i32, i32) {
    %c0_i32 = arith.constant 0 : i32
    %c0_i32_0 = arith.constant 0 : i32
    %c0_i32_1 = arith.constant 0 : i32
    %c0_i32_2 = arith.constant 0 : i32
    %c0_i32_3 = arith.constant 0 : i32
    return %c0_i32, %c0_i32_0, %c0_i32_1, %c0_i32_2 : i32, i32, i32, i32
  }
  func.func @transform_4(%arg0: i32) -> (i32, i32) {
    %c0_i32 = arith.constant 0 : i32
    %c0_i32_0 = arith.constant 0 : i32
    %c0_i32_1 = arith.constant 0 : i32
    return %c0_i32, %c0_i32_0 : i32, i32
  }
  func.func @transform_5(%arg0: i32) -> (i32, i32, i32, i32) {
    %c0_i32 = arith.constant 0 : i32
    %c0_i32_0 = arith.constant 0 : i32
    %c0_i32_1 = arith.constant 0 : i32
    %c0_i32_2 = arith.constant 0 : i32
    return %arg0, %c0_i32, %c0_i32_0, %c0_i32_1 : i32, i32, i32, i32
  }
}

</mosaic_0001>

<bundles_post_ra>
// kernel: basic_block_forward.1
= control target key start
LH: loop header
LB: loop body
LE: loop exit
PB: predicated region body
PF: predicated region fallthrough
CT: control target
= control target key end

     0   :  { %s4939_s18 = smov 0   ;;  %s6774_s0 = inlined_call_operand.vmem [shape: f32[2,16,16,8], index: 0, kind: input, shape index: {}]   ;;  %s6775_s1 = inlined_call_operand.vmem [shape: bf16[3,3,8,8], index: 1, kind: input, shape index: {}]   ;;  %s6776_s2 = inlined_call_operand.vmem [shape: f32[1,8], index: 2, kind: input, shape index: {}]   ;;  %s6777_s3 = inlined_call_operand.vmem [shape: bf16[3,3,8,8], index: 3, kind: input, shape index: {}]   ;;  %s6778_s4 = inlined_call_operand.vmem [shape: f32[1,8], index: 4, kind: input, shape index: {}]   ;;  %s6779_s5 = inlined_call_operand.vmem [shape: f32[2,16,16,8], index: 5, kind: output, shape index: {}]  }
   0x1 LB: > { %s4569_s19 = sadd.s32 4294967295, %s4906_s18   ;;  %p4573_p0 = scmp.ge.s32.totalorder %s4906_s18, 1  ;;  %s4906_s18 = sphi %s4939_s18, %s15_s18  }
   0x2   : > { %p187_p1 = scmp.lt.s32.totalorder %s4906_s18, 3 }
   0x4   : > { %p188_p2 = pnand %p4573_p0, %p187_p1 }
   0x6   : > { %191 = sbr.rel (%p188_p2) target bundleno = 1530 (0x5fa), region = 40 }
   0xb   : > { %v4578_v0 = vld [vmem:[%s6775_s1 + $0x4] sm:$0xf]  ;;  %vm527_vm0 = vcmask 1043456   ;;  %vm226_vm1 = vcmask 64512   ;;  %vm229_vm2 = vcmask 58368   ;;  %v4908_v2 = vmov 0.0  }
   0xc   : > { %v529_v1 = vsel %vm527_vm0, %v4578_v0, 0  ;;  %227 = vst.msk [vmem:[#allocation2] sm:$0xff] %vm226_vm1, %v4908_v2  ;;  %v428_v3 = vld [vmem:[%s6775_s1] sm:$0xf]  ;;  %vm235_vm3 = vcmask 57344   ;;  %p215_p3 = scmp.lt.s32.totalorder %s4569_s19, 1 }
   0xd   : > { %538 = vmatpush.bf16.msra.mxu0 %v529_v1  ;;  %228 = vst.msk [vmem:[#allocation2 + $0x8] sm:$0xff] %vm226_vm1, %v4908_v2  ;;  %4886 = vmatpush.bf16.msra.mxu2 %v529_v1  ;;  %v669_v4 = vsel %vm527_vm0, %v428_v3, 0  ;;  %v4611_v10 = vld [vmem:[%s6775_s1 + $0x8] sm:$0xf]  ;;  %v4628_v12 = vld [vmem:[%s6775_s1 + $0xc] sm:$0xf] }
   0xe   : > { %230 = vst.msk [vmem:[#allocation2 + $0x10] sm:$0x3] %vm229_vm2, %v4908_v2  ;;  %4887 = vmatpush.bf16.msra.mxu3 %v669_v4  ;;  %678 = vmatpush.bf16.msra.mxu1 %v669_v4  ;;  %v859_v13 = vsel %vm527_vm0, %v4611_v10, 0  ;;  %v1081_v14 = vsel %vm527_vm0, %v4628_v12, 0  ;;  %v4645_v15 = vld [vmem:[%s6775_s1 + $0x10] sm:$0xf] }
   0xf   : > { %254 = vst.msk [vmem:[#allocation2 + $0x11] sm:$0x1] %vm235_vm3, %v4908_v2  ;;  %v1303_v16 = vsel %vm527_vm0, %v4645_v15, 0  ;;  %s6895_s19 = smov (!%p215_p3, %s4569_s19), 1 }
  0x10   : > { %274 = vst.msk [vmem:[#allocation3 + $0x10] sm:$0x3] %vm229_vm2, %v4908_v2  ;;  %s4884_s30 = sshll.u32 %s6895_s19, 8 }
  0x11   : > { %297 = vst.msk [vmem:[#allocation3 + $0x11] sm:$0x1] %vm235_vm3, %v4908_v2  ;;  %868 = vmatpush.bf16.msrb.mxu2 %v859_v13  ;;  %1312 = vmatpush.bf16.msrb.mxu0 %v1303_v16  ;;  %s5139_s8 = scalar_lea.vmem %s6774_s0, %s4884_s30  ;;  %s6552_s24 = scalar_lea.vmem %s6779_s5, %s4884_s30 }
  0x12   : > { %232 = vst.msk [vmem:[#allocation2 + $0x198] sm:$0xff] %vm226_vm1, %v4908_v2  ;;  %1090 = vmatpush.bf16.msrb.mxu3 %v1081_v14  ;;  %v329_v17 = vld [vmem:[%s5139_s8 + $0x70] sm:$0xff]  ;;  %v330_v18 = vld [vmem:[%s5139_s8 + $0x78] sm:$0xff]  ;;  %v315_v19 = vld [vmem:[%s5139_s8] sm:$0xff] }
  0x13   : > { %233 = vst.msk [vmem:[#allocation2 + $0x1a0] sm:$0xff] %vm226_vm1, %v4908_v2  ;;  %v316_v20 = vld [vmem:[%s5139_s8 + $0x8] sm:$0xff]  ;;  %v331_v21 = vld [vmem:[%s5139_s8 + $0x80] sm:$0xff]  ;;  %v317_v23 = vld [vmem:[%s5139_s8 + $0x10] sm:$0xff] }
  0x14   : > { %v429_v5 = vld [vmem:[#allocation2 + $0x1] sm:$0xff]  ;;  %234 = vst.msk [vmem:[#allocation2 + $0x1a8] sm:$0x3] %vm229_vm2, %v4908_v2  ;;  %v318_v24 = vld [vmem:[%s5139_s8 + $0x18] sm:$0xff]  ;;  %v333_v25 = vld [vmem:[%s5139_s8 + $0x90] sm:$0xff] }
  0x15   : > { %v430_v6 = vld [vmem:[#allocation2 + $0x9] sm:$0xff]  ;;  %236 = vst.msk [vmem:[#allocation2] sm:$0x1] %vm235_vm3, %v4908_v2  ;;  %v334_v26 = vld [vmem:[%s5139_s8 + $0x98] sm:$0xff]  ;;  %v319_v37 = vld [vmem:[%s5139_s8 + $0x20] sm:$0xff] }
  0x16   : > { %v461_v7 = vpack.c.bf16 %v430_v6, %v429_v5  ;;  %237 = vst.msk [vmem:[#allocation2 + $0x18] sm:$0x1] %vm235_vm3, %v4908_v2  ;;  %v381_v9 = vld [vmem:[#allocation2 + $0x8] sm:$0xff]  ;;  %v335_v41 = vld [vmem:[%s5139_s8 + $0xa0] sm:$0xff]  ;;  %v321_v55 = vld [vmem:[%s5139_s8 + $0x30] sm:$0xff] }
  0x17   : > { %238 = vst.msk [vmem:[#allocation2 + $0x30] sm:$0x1] %vm235_vm3, %v4908_v2  ;;  %v332_v22 = vld [vmem:[%s5139_s8 + $0x88] sm:$0xff]  ;;  %v322_v56 = vld [vmem:[%s5139_s8 + $0x38] sm:$0xff]  ;;  %v337_v57 = vld [vmem:[%s5139_s8 + $0xb0] sm:$0xff] }
  0x18   : > { %4579 = vmatmul.msk.bf16.vlgmr.msra.gmra.mxu0 %vm226_vm1, %v461_v7  ;;  %239 = vst.msk [vmem:[#allocation2 + $0x48] sm:$0x1] %vm235_vm3, %v4908_v2  ;;  %v320_v40 = vld [vmem:[%s5139_s8 + $0x28] sm:$0xff]  ;;  %v338_v58 = vld [vmem:[%s5139_s8 + $0xb8] sm:$0xff]  ;;  %v323_v7 = vld [vmem:[%s5139_s8 + $0x40] sm:$0xff] }
  0x19   : > { %240 = vst.msk [vmem:[#allocation2 + $0x60] sm:$0x1] %vm235_vm3, %v4908_v2  ;;  %v336_v42 = vld [vmem:[%s5139_s8 + $0xa8] sm:$0xff] }
  0x1a   : > { %241 = vst.msk [vmem:[#allocation2 + $0x78] sm:$0x1] %vm235_vm3, %v4908_v2  ;;  %v340_v10 = vld [vmem:[%s5139_s8 + $0xc8] sm:$0xff] }
  0x1b   : > { %242 = vst.msk [vmem:[#allocation2 + $0x90] sm:$0x1] %vm235_vm3, %v4908_v2 }
  0x1c   : > { %243 = vst.msk [vmem:[#allocation2 + $0xa8] sm:$0x1] %vm235_vm3, %v4908_v2  ;;  %v380_v8 = vld [vmem:[#allocation2] sm:$0xff] }
  0x1d   : > { %244 = vst.msk [vmem:[#allocation2 + $0xc0] sm:$0x1] %vm235_vm3, %v4908_v2  ;;  %v412_v11 = vpack.c.bf16 %v381_v9, %v380_v8  ;;  %v324_v8 = vld [vmem:[%s5139_s8 + $0x48] sm:$0xff]  ;;  %v339_v9 = vld [vmem:[%s5139_s8 + $0xc0] sm:$0xff] }
  0x1e   : > { %245 = vst.msk [vmem:[#allocation2 + $0xd8] sm:$0x1] %vm235_vm3, %v4908_v2 }
  0x1f   : > { %246 = vst.msk [vmem:[#allocation2 + $0xf0] sm:$0x1] %vm235_vm3, %v4908_v2  ;;  %4595 = vmatmul.msk.bf16.vlgmr.msra.gmra.mxu1 %vm226_vm1, %v412_v11 }
  0x20   : > { %247 = vst.msk [vmem:[#allocation2 + $0x108] sm:$0x1] %vm235_vm3, %v4908_v2 }
  0x21   : > { %248 = vst.msk [vmem:[#allocation2 + $0x120] sm:$0x1] %vm235_vm3, %v4908_v2 }
  0x22   : > { %249 = vst.msk [vmem:[#allocation2 + $0x138] sm:$0x1] %vm235_vm3, %v4908_v2 }
  0x23   : > { %250 = vst.msk [vmem:[#allocation2 + $0x150] sm:$0x1] %vm235_vm3, %v4908_v2 }
  0x24   : > { %251 = vst.msk [vmem:[#allocation2 + $0x168] sm:$0x1] %vm235_vm3, %v4908_v2 }
  0x25   : > { %252 = vst.msk [vmem:[#allocation2 + $0x180] sm:$0x1] %vm235_vm3, %v4908_v2 }
  0x26   : > { %255 = vst.msk [vmem:[#allocation2 + $0x29] sm:$0x1] %vm235_vm3, %v4908_v2 }
  0x27   : > { %256 = vst.msk [vmem:[#allocation2 + $0x41] sm:$0x1] %vm235_vm3, %v4908_v2 }
  0x28   : > { %257 = vst.msk [vmem:[#allocation2 + $0x59] sm:$0x1] %vm235_vm3, %v4908_v2 }
  0x29   : > { %258 = vst.msk [vmem:[#allocation2 + $0x71] sm:$0x1] %vm235_vm3, %v4908_v2 }
  0x2a   : > { %259 = vst.msk [vmem:[#allocation2 + $0x89] sm:$0x1] %vm235_vm3, %v4908_v2 }
  0x2b   : > { %260 = vst.msk [vmem:[#allocation2 + $0xa1] sm:$0x1] %vm235_vm3, %v4908_v2 }
  0x2c   : > { %261 = vst.msk [vmem:[#allocation2 + $0xb9] sm:$0x1] %vm235_vm3, %v4908_v2 }
  0x2d   : > { %262 = vst.msk [vmem:[#allocation2 + $0xd1] sm:$0x1] %vm235_vm3, %v4908_v2 }
  0x2e   : > { %263 = vst.msk [vmem:[#allocation2 + $0xe9] sm:$0x1] %vm235_vm3, %v4908_v2 }
  0x2f   : > { %264 = vst.msk [vmem:[#allocation2 + $0x101] sm:$0x1] %vm235_vm3, %v4908_v2 }
  0x30   : > { %265 = vst.msk [vmem:[#allocation2 + $0x119] sm:$0x1] %vm235_vm3, %v4908_v2 }
  0x31   : > { %266 = vst.msk [vmem:[#allocation2 + $0x131] sm:$0x1] %vm235_vm3, %v4908_v2 }
  0x32   : > { %267 = vst.msk [vmem:[#allocation2 + $0x149] sm:$0x1] %vm235_vm3, %v4908_v2 }
  0x33   : > { %268 = vst.msk [vmem:[#allocation2 + $0x161] sm:$0x1] %vm235_vm3, %v4908_v2 }
  0x34   : > { %269 = vst.msk [vmem:[#allocation2 + $0x179] sm:$0x1] %vm235_vm3, %v4908_v2 }
  0x35   : > { %270 = vst.msk [vmem:[#allocation2 + $0x191] sm:$0x1] %vm235_vm3, %v4908_v2 }
  0x36   : > { %272 = vst.msk [vmem:[#allocation3] sm:$0xff] %vm226_vm1, %v4908_v2 }
  0x37   : > { %273 = vst.msk [vmem:[#allocation3 + $0x8] sm:$0xff] %vm226_vm1, %v4908_v2 }
  0x38   : > { %276 = vst.msk [vmem:[#allocation3 + $0x198] sm:$0xff] %vm226_vm1, %v4908_v2 }
  0x39   : > { %277 = vst.msk [vmem:[#allocation3 + $0x1a0] sm:$0xff] %vm226_vm1, %v4908_v2 }
  0x3a   : > { %278 = vst.msk [vmem:[#allocation3 + $0x1a8] sm:$0x3] %vm229_vm2, %v4908_v2 }
  0x3b   : > { %280 = vst.msk [vmem:[#allocation3 + $0x18] sm:$0x1] %vm235_vm3, %v4908_v2 }
  0x3c   : > { %281 = vst.msk [vmem:[#allocation3 + $0x30] sm:$0x1] %vm235_vm3, %v4908_v2 }
  0x3d   : > { %282 = vst.msk [vmem:[#allocation3 + $0x48] sm:$0x1] %vm235_vm3, %v4908_v2 }
  0x3e   : > { %283 = vst.msk [vmem:[#allocation3 + $0x60] sm:$0x1] %vm235_vm3, %v4908_v2 }
  0x3f   : > { %284 = vst.msk [vmem:[#allocation3 + $0x78] sm:$0x1] %vm235_vm3, %v4908_v2 }
  0x40   : > { %285 = vst.msk [vmem:[#allocation3 + $0x90] sm:$0x1] %vm235_vm3, %v4908_v2 }
  0x41   : > { %286 = vst.msk [vmem:[#allocation3 + $0xa8] sm:$0x1] %vm235_vm3, %v4908_v2 }
  0x42   : > { %287 = vst.msk [vmem:[#allocation3 + $0xc0] sm:$0x1] %vm235_vm3, %v4908_v2 }
  0x43   : > { %288 = vst.msk [vmem:[#allocation3 + $0xd8] sm:$0x1] %vm235_vm3, %v4908_v2 }
  0x44   : > { %289 = vst.msk [vmem:[#allocation3 + $0xf0] sm:$0x1] %vm235_vm3, %v4908_v2 }
  0x45   : > { %290 = vst.msk [vmem:[#allocation3 + $0x108] sm:$0x1] %vm235_vm3, %v4908_v2 }
  0x46   : > { %291 = vst.msk [vmem:[#allocation3 + $0x120] sm:$0x1] %vm235_vm3, %v4908_v2 }
  0x47   : > { %292 = vst.msk [vmem:[#allocation3 + $0x138] sm:$0x1] %vm235_vm3, %v4908_v2 }
  0x48   : > { %293 = vst.msk [vmem:[#allocation3 + $0x150] sm:$0x1] %vm235_vm3, %v4908_v2 }
  0x49   : > { %294 = vst.msk [vmem:[#allocation3 + $0x168] sm:$0x1] %vm235_vm3, %v4908_v2 }
  0x4a   : > { %295 = vst.msk [vmem:[#allocation3 + $0x180] sm:$0x1] %vm235_vm3, %v4908_v2 }
  0x4b   : > { %298 = vst.msk [vmem:[#allocation3 + $0x29] sm:$0x1] %vm235_vm3, %v4908_v2 }
  0x4c   : > { %299 = vst.msk [vmem:[#allocation3 + $0x41] sm:$0x1] %vm235_vm3, %v4908_v2 }
  0x4d   : > { %300 = vst.msk [vmem:[#allocation3 + $0x59] sm:$0x1] %vm235_vm3, %v4908_v2 }
  0x4e   : > { %301 = vst.msk [vmem:[#allocation3 + $0x71] sm:$0x1] %vm235_vm3, %v4908_v2 }
  0x4f   : > { %302 = vst.msk [vmem:[#allocation3 + $0x89] sm:$0x1] %vm235_vm3, %v4908_v2 }
  0x50   : > { %303 = vst.msk [vmem:[#allocation3 + $0xa1] sm:$0x1] %vm235_vm3, %v4908_v2 }
  0x51   : > { %304 = vst.msk [vmem:[#allocation3 + $0xb9] sm:$0x1] %vm235_vm3, %v4908_v2 }
  0x52   : > { %305 = vst.msk [vmem:[#allocation3 + $0xd1] sm:$0x1] %vm235_vm3, %v4908_v2 }
  0x53   : > { %306 = vst.msk [vmem:[#allocation3 + $0xe9] sm:$0x1] %vm235_vm3, %v4908_v2 }
  0x54   : > { %307 = vst.msk [vmem:[#allocation3 + $0x101] sm:$0x1] %vm235_vm3, %v4908_v2 }
  0x55   : > { %308 = vst.msk [vmem:[#allocation3 + $0x119] sm:$0x1] %vm235_vm3, %v4908_v2 }
  0x56   : > { %309 = vst.msk [vmem:[#allocation3 + $0x131] sm:$0x1] %vm235_vm3, %v4908_v2 }
  0x57   : > { %310 = vst.msk [vmem:[#allocation3 + $0x149] sm:$0x1] %vm235_vm3, %v4908_v2 }
  0x58   : > { %311 = vst.msk [vmem:[#allocation3 + $0x161] sm:$0x1] %vm235_vm3, %v4908_v2 }
  0x59   : > { %312 = vst.msk [vmem:[#allocation3 + $0x179] sm:$0x1] %vm235_vm3, %v4908_v2 }
  0x5a   : > { %313 = vst.msk [vmem:[#allocation3 + $0x191] sm:$0x1] %vm235_vm3, %v4908_v2 }
  0x5b   : > { %253 = vst.msk [vmem:[#allocation2 + $0x198] sm:$0x1] %vm235_vm3, %v4908_v2 }
  0x5c   : > { %271 = vst.msk [vmem:[#allocation2 + $0x1a9] sm:$0x1] %vm235_vm3, %v4908_v2 }
  0x5d   : > { %279 = vst.msk [vmem:[#allocation3] sm:$0x1] %vm235_vm3, %v4908_v2 }
  0x5e   : > { %296 = vst.msk [vmem:[#allocation3 + $0x198] sm:$0x1] %vm235_vm3, %v4908_v2 }
  0x5f   : > { %314 = vst.msk [vmem:[#allocation3 + $0x1a9] sm:$0x1] %vm235_vm3, %v4908_v2 }
  0x60   : > { %362 = vst.msk [vmem:[#allocation2 + $0xc1] sm:$0xff] %vm226_vm1, %v329_v17 }
  0x61   : > { %363 = vst.msk [vmem:[#allocation2 + $0xc9] sm:$0xff] %vm226_vm1, %v330_v18 }
  0x62   : > { %348 = vst.msk [vmem:[#allocation2 + $0x19] sm:$0xff] %vm226_vm1, %v315_v19 }
  0x63   : > { %349 = vst.msk [vmem:[#allocation2 + $0x21] sm:$0xff] %vm226_vm1, %v316_v20 }
  0x64   : > { %364 = vst.msk [vmem:[#allocation2 + $0xd9] sm:$0xff] %vm226_vm1, %v331_v21 }
  0x65   : > { %365 = vst.msk [vmem:[#allocation2 + $0xe1] sm:$0xff] %vm226_vm1, %v332_v22 }
  0x66   : > { %350 = vst.msk [vmem:[#allocation2 + $0x31] sm:$0xff] %vm226_vm1, %v317_v23  ;;  %v325_v23 = vld [vmem:[%s5139_s8 + $0x50] sm:$0xff] }
  0x67   : > { %v445_v27 = vld [vmem:[#allocation2 + $0xc1] sm:$0xff]  ;;  %351 = vst.msk [vmem:[#allocation2 + $0x39] sm:$0xff] %vm226_vm1, %v318_v24  ;;  %v326_v24 = vld [vmem:[%s5139_s8 + $0x58] sm:$0xff] }
  0x68   : > { %v396_v28 = vld [vmem:[#allocation2 + $0xc0] sm:$0xff]  ;;  %v446_v29 = vld [vmem:[#allocation2 + $0xc9] sm:$0xff]  ;;  %366 = vst.msk [vmem:[#allocation2 + $0xf1] sm:$0xff] %vm226_vm1, %v333_v25 }
  0x69   : > { %v397_v30 = vld [vmem:[#allocation2 + $0xc8] sm:$0xff]  ;;  %v5170_v31 = vpack.c.bf16 %v446_v29, %v445_v27  ;;  %v431_v33 = vld [vmem:[#allocation2 + $0x19] sm:$0xff]  ;;  %367 = vst.msk [vmem:[#allocation2 + $0xf9] sm:$0xff] %vm226_vm1, %v334_v26  ;;  %v341_v25 = vld [vmem:[%s5139_s8 + $0xd0] sm:$0xff] }
  0x6a   : > { %v5172_v32 = vpack.c.bf16 %v397_v30, %v396_v28  ;;  %v382_v34 = vld [vmem:[#allocation2 + $0x18] sm:$0xff]  ;;  %v432_v35 = vld [vmem:[#allocation2 + $0x21] sm:$0xff]  ;;  %352 = vst.msk [vmem:[#allocation2 + $0x49] sm:$0xff] %vm226_vm1, %v319_v37 }
  0x6b   : > { %v383_v36 = vld [vmem:[#allocation2 + $0x20] sm:$0xff]  ;;  %4587 = vmatmul.msk.bf16.vlgmr.msra.gmra.mxu2 %vm226_vm1, %v5170_v31  ;;  %v5180_v38 = vpack.c.bf16 %v432_v35, %v431_v33  ;;  %353 = vst.msk [vmem:[#allocation2 + $0x51] sm:$0xff] %vm226_vm1, %v320_v40  ;;  %v398_v45 = vld [vmem:[#allocation2 + $0xd8] sm:$0xff] }
  0x6c   : > { %4603 = vmatmul.msk.bf16.vlgmr.msra.gmra.mxu3 %vm226_vm1, %v5172_v32  ;;  %v5182_v39 = vpack.c.bf16 %v383_v36, %v382_v34  ;;  %368 = vst.msk [vmem:[#allocation2 + $0x109] sm:$0xff] %vm226_vm1, %v335_v41  ;;  %v447_v43 = vld [vmem:[#allocation2 + $0xd9] sm:$0xff]  ;;  %v448_v44 = vld [vmem:[#allocation2 + $0xe1] sm:$0xff] }
  0x6d   : > { %4580 = vmatmul.msk.bf16.gmra.mxu0 %vm226_vm1, %v5180_v38  ;;  %369 = vst.msk [vmem:[#allocation2 + $0x111] sm:$0xff] %vm226_vm1, %v336_v42  ;;  %v399_v46 = vld [vmem:[#allocation2 + $0xe0] sm:$0xff]  ;;  %v433_v47 = vld [vmem:[#allocation2 + $0x31] sm:$0xff]  ;;  %v5195_v51 = vpack.c.bf16 %v448_v44, %v447_v43  ;;  %v328_v44 = vld [vmem:[%s5139_s8 + $0x68] sm:$0xff] }
  0x6e   : > { %4596 = vmatmul.msk.bf16.gmra.mxu1 %vm226_vm1, %v5182_v39  ;;  %v434_v48 = vld [vmem:[#allocation2 + $0x39] sm:$0xff]  ;;  %v384_v49 = vld [vmem:[#allocation2 + $0x30] sm:$0xff]  ;;  %v5197_v52 = vpack.c.bf16 %v399_v46, %v398_v45  ;;  %354 = vst.msk [vmem:[#allocation2 + $0x61] sm:$0xff] %vm226_vm1, %v321_v55  ;;  %v344_v46 = vld [vmem:[%s5139_s8 + $0xe8] sm:$0xff] }
  0x6f   : > { %v385_v50 = vld [vmem:[#allocation2 + $0x38] sm:$0xff]  ;;  %v5199_v53 = vpack.c.bf16 %v434_v48, %v433_v47  ;;  %355 = vst.msk [vmem:[#allocation2 + $0x69] sm:$0xff] %vm226_vm1, %v322_v56  ;;  %v400_v61 = vld [vmem:[#allocation2 + $0xf0] sm:$0xff]  ;;  %v327_v43 = vld [vmem:[%s5139_s8 + $0x60] sm:$0xff] }
  0x70   : > { %v5201_v54 = vpack.c.bf16 %v385_v50, %v384_v49  ;;  %370 = vst.msk [vmem:[#allocation2 + $0x121] sm:$0xff] %vm226_vm1, %v337_v57  ;;  %v449_v59 = vld [vmem:[#allocation2 + $0xf1] sm:$0xff]  ;;  %v450_v60 = vld [vmem:[#allocation2 + $0xf9] sm:$0xff] }
  0x71   : > { %371 = vst.msk [vmem:[#allocation2 + $0x129] sm:$0xff] %vm226_vm1, %v338_v58  ;;  %v401_v62 = vld [vmem:[#allocation2 + $0xf8] sm:$0xff]  ;;  %v435_v63 = vld [vmem:[#allocation2 + $0x49] sm:$0xff]  ;;  %v5219_v3 = vpack.c.bf16 %v450_v60, %v449_v59  ;;  %v343_v45 = vld [vmem:[%s5139_s8 + $0xe0] sm:$0xff] }
  0x72   : > { %v436_v0 = vld [vmem:[#allocation2 + $0x51] sm:$0xff]  ;;  %v386_v1 = vld [vmem:[#allocation2 + $0x48] sm:$0xff]  ;;  %v5221_v4 = vpack.c.bf16 %v401_v62, %v400_v61  ;;  %356 = vst.msk [vmem:[#allocation2 + $0x79] sm:$0xff] %vm226_vm1, %v323_v7 }
  0x73   : > { %v387_v2 = vld [vmem:[#allocation2 + $0x50] sm:$0xff]  ;;  %v5223_v5 = vpack.c.bf16 %v436_v0, %v435_v63  ;;  %357 = vst.msk [vmem:[#allocation2 + $0x81] sm:$0xff] %vm226_vm1, %v324_v8  ;;  %v402_v13 = vld [vmem:[#allocation2 + $0x108] sm:$0xff]  ;;  %v342_v26 = vld [vmem:[%s5139_s8 + $0xd8] sm:$0xff] }
  0x74   : > { %v5225_v6 = vpack.c.bf16 %v387_v2, %v386_v1  ;;  %372 = vst.msk [vmem:[#allocation2 + $0x139] sm:$0xff] %vm226_vm1, %v339_v9  ;;  %v451_v11 = vld [vmem:[#allocation2 + $0x109] sm:$0xff]  ;;  %v452_v12 = vld [vmem:[#allocation2 + $0x111] sm:$0xff] }
  0x75   : > { %373 = vst.msk [vmem:[#allocation2 + $0x141] sm:$0xff] %vm226_vm1, %v340_v10  ;;  %v403_v14 = vld [vmem:[#allocation2 + $0x110] sm:$0xff]  ;;  %v437_v15 = vld [vmem:[#allocation2 + $0x61] sm:$0xff]  ;;  %v5243_v19 = vpack.c.bf16 %v452_v12, %v451_v11 }
  0x76   : > { %v438_v16 = vld [vmem:[#allocation2 + $0x69] sm:$0xff]  ;;  %v388_v17 = vld [vmem:[#allocation2 + $0x60] sm:$0xff]  ;;  %v5245_v20 = vpack.c.bf16 %v403_v14, %v402_v13  ;;  %358 = vst.msk [vmem:[#allocation2 + $0x91] sm:$0xff] %vm226_vm1, %v325_v23  ;;  %v4696_v23 = vld [vmem:[%s6775_s1 + $0x1c] sm:$0xf] }
  0x77   : > { %v389_v18 = vld [vmem:[#allocation2 + $0x68] sm:$0xff]  ;;  %v5247_v21 = vpack.c.bf16 %v438_v16, %v437_v15  ;;  %359 = vst.msk [vmem:[#allocation2 + $0x99] sm:$0xff] %vm226_vm1, %v326_v24  ;;  %v404_v29 = vld [vmem:[#allocation2 + $0x120] sm:$0xff] }
  0x78   : > { %v5249_v22 = vpack.c.bf16 %v389_v18, %v388_v17  ;;  %374 = vst.msk [vmem:[#allocation2 + $0x151] sm:$0xff] %vm226_vm1, %v341_v25  ;;  %v453_v27 = vld [vmem:[#allocation2 + $0x121] sm:$0xff]  ;;  %v454_v28 = vld [vmem:[#allocation2 + $0x129] sm:$0xff]  ;;  %v4679_v18 = vld [vmem:[%s6775_s1 + $0x18] sm:$0xf]  ;;  %v1970_v25 = vsel %vm527_vm0, %v4696_v23, 0 }
  0x79   : > { %375 = vst.msk [vmem:[#allocation2 + $0x159] sm:$0xff] %vm226_vm1, %v342_v26  ;;  %v405_v30 = vld [vmem:[#allocation2 + $0x128] sm:$0xff]  ;;  %v439_v33 = vld [vmem:[#allocation2 + $0x79] sm:$0xff]  ;;  %v5267_v37 = vpack.c.bf16 %v454_v28, %v453_v27  ;;  %v1748_v24 = vsel %vm527_vm0, %v4679_v18, 0  ;;  %1979 = vmatpush.bf16.msra.mxu3 %v1970_v25  ;;  %v4662_v26 = vld [vmem:[%s6775_s1 + $0x14] sm:$0xf] }
  0x7a   : > { %v440_v34 = vld [vmem:[#allocation2 + $0x81] sm:$0xff]  ;;  %v390_v35 = vld [vmem:[#allocation2 + $0x78] sm:$0xff]  ;;  %v5269_v40 = vpack.c.bf16 %v405_v30, %v404_v29  ;;  %360 = vst.msk [vmem:[#allocation2 + $0xa9] sm:$0xff] %vm226_vm1, %v327_v43  ;;  %1757 = vmatpush.bf16.msra.mxu2 %v1748_v24  ;;  %v1525_v28 = vsel %vm527_vm0, %v4662_v26, 0  ;;  %v1430_v18 = vld [vmem:[#allocation2 + $0x4a] sm:$0xff] }
  0x7b   : > { %4588 = vmatmul.msk.bf16.gmra.mxu2 %vm226_vm1, %v5195_v51  ;;  %v391_v36 = vld [vmem:[#allocation2 + $0x80] sm:$0xff]  ;;  %v5271_v41 = vpack.c.bf16 %v440_v34, %v439_v33  ;;  %361 = vst.msk [vmem:[#allocation2 + $0xb1] sm:$0xff] %vm226_vm1, %v328_v44  ;;  %v406_v49 = vld [vmem:[#allocation2 + $0x138] sm:$0xff]  ;;  %1534 = vmatpush.bf16.msrb.mxu1 %v1525_v28 }
  0x7c   : > { %4604 = vmatmul.msk.bf16.gmra.mxu3 %vm226_vm1, %v5197_v52  ;;  %v5273_v42 = vpack.c.bf16 %v391_v36, %v390_v35  ;;  %376 = vst.msk [vmem:[#allocation2 + $0x169] sm:$0xff] %vm226_vm1, %v343_v45  ;;  %v455_v47 = vld [vmem:[#allocation2 + $0x139] sm:$0xff]  ;;  %v456_v48 = vld [vmem:[#allocation2 + $0x141] sm:$0xff] }
  0x7d   : > { %4581 = vmatmul.msk.bf16.gmra.mxu0 %vm226_vm1, %v5199_v53  ;;  %377 = vst.msk [vmem:[#allocation2 + $0x171] sm:$0xff] %vm226_vm1, %v344_v46  ;;  %v407_v50 = vld [vmem:[#allocation2 + $0x140] sm:$0xff]  ;;  %v441_v55 = vld [vmem:[#allocation2 + $0x91] sm:$0xff]  ;;  %v5291_v59 = vpack.c.bf16 %v456_v48, %v455_v47 }
  0x7e   : > { %4597 = vmatmul.msk.bf16.gmra.mxu1 %vm226_vm1, %v5201_v54  ;;  %v442_v56 = vld [vmem:[#allocation2 + $0x99] sm:$0xff]  ;;  %v392_v57 = vld [vmem:[#allocation2 + $0x90] sm:$0xff]  ;;  %v5293_v60 = vpack.c.bf16 %v407_v50, %v406_v49  ;;  %v1427_v43 = vld [vmem:[#allocation2 + $0x22] sm:$0xff] }
  0x7f   : > { %v393_v58 = vld [vmem:[#allocation2 + $0x98] sm:$0xff]  ;;  %v5295_v61 = vpack.c.bf16 %v442_v56, %v441_v55  ;;  %v408_v1 = vld [vmem:[#allocation2 + $0x150] sm:$0xff]  ;;  %v4713_v27 = vld [vmem:[%s6775_s1 + $0x20] sm:$0xf] }
  0x80   : > { %v5297_v62 = vpack.c.bf16 %v393_v58, %v392_v57  ;;  %v457_v63 = vld [vmem:[#allocation2 + $0x151] sm:$0xff]  ;;  %v458_v0 = vld [vmem:[#allocation2 + $0x159] sm:$0xff]  ;;  %v2192_v29 = vsel %vm527_vm0, %v4713_v27, 0  ;;  %v760_v49 = vld [vmem:[#allocation2 + $0x2] sm:$0xff] }
  0x81   : > { %v409_v2 = vld [vmem:[#allocation2 + $0x158] sm:$0xff]  ;;  %v443_v7 = vld [vmem:[#allocation2 + $0xa9] sm:$0xff]  ;;  %v5307_v11 = vpack.c.bf16 %v458_v0, %v457_v63  ;;  %2201 = vmatpush.bf16.msra.mxu0 %v2192_v29 }
  0x82   : > { %v444_v8 = vld [vmem:[#allocation2 + $0xb1] sm:$0xff]  ;;  %v394_v9 = vld [vmem:[#allocation2 + $0xa8] sm:$0xff]  ;;  %v5309_v12 = vpack.c.bf16 %v409_v2, %v408_v1  ;;  %v1426_v36 = vld [vmem:[#allocation2 + $0x1a] sm:$0xff] }
  0x83   : > { %v395_v10 = vld [vmem:[#allocation2 + $0xb0] sm:$0xff]  ;;  %v5311_v13 = vpack.c.bf16 %v444_v8, %v443_v7  ;;  %v410_v34 = vld [vmem:[#allocation2 + $0x168] sm:$0xff]  ;;  %v1458_v46 = vpack.c.bf16 %v1427_v43, %v1426_v36  ;;  %v1429_v56 = vld [vmem:[#allocation2 + $0x3a] sm:$0xff] }
  0x84   : > { %v5313_v14 = vpack.c.bf16 %v395_v10, %v394_v9  ;;  %v459_v30 = vld [vmem:[#allocation2 + $0x169] sm:$0xff]  ;;  %v460_v33 = vld [vmem:[#allocation2 + $0x171] sm:$0xff] }
  0x85   : > { %v411_v35 = vld [vmem:[#allocation2 + $0x170] sm:$0xff]  ;;  %v5341_v44 = vpack.c.bf16 %v460_v33, %v459_v30  ;;  %v1432_v43 = vld [vmem:[#allocation2 + $0x62] sm:$0xff] }
  0x86   : > { %v5343_v45 = vpack.c.bf16 %v411_v35, %v410_v34  ;;  %v761_v50 = vld [vmem:[#allocation2 + $0xa] sm:$0xff]  ;;  %v1428_v55 = vld [vmem:[#allocation2 + $0x32] sm:$0xff] }
  0x87   : > { %v792_v57 = vpack.c.bf16 %v761_v50, %v760_v49  ;;  %v5356_v58 = vpack.c.bf16 %v1429_v56, %v1428_v55 }
  0x8b   : > { %4589 = vmatmul.msk.bf16.gmra.mxu2 %vm226_vm1, %v5219_v3 }
  0x8c   : > { %4605 = vmatmul.msk.bf16.gmra.mxu3 %vm226_vm1, %v5221_v4 }
  0x8d   : > { %4582 = vmatmul.msk.bf16.gmra.mxu0 %vm226_vm1, %v5223_v5 }
  0x8e   : > { %4598 = vmatmul.msk.bf16.gmra.mxu1 %vm226_vm1, %v5225_v6 }
  0x95   : > { %v540_v15 = vpop.f32.mrf.mxu0 }
  0x9b   : > { %4590 = vmatmul.msk.bf16.gmra.mxu2 %vm226_vm1, %v5243_v19 }
  0x9c   : > { %4606 = vmatmul.msk.bf16.gmra.mxu3 %vm226_vm1, %v5245_v20  ;;  %v680_v16 = vpop.f32.mrf.mxu1 }
  0x9d   : > { %4583 = vmatmul.msk.bf16.gmra.mxu0 %vm226_vm1, %v5247_v21  ;;  %v5319_v17 = vadd.f32 %v680_v16, %v540_v15  ;;  %v5352_v47 = vpop.f32.mrf.mxu0 }
  0x9e   : > { %4599 = vmatmul.msk.bf16.gmra.mxu1 %vm226_vm1, %v5249_v22 }
  0xa4   : > { %v5354_v48 = vpop.f32.mrf.mxu1 }
  0xab   : > { %4591 = vmatmul.msk.bf16.gmra.mxu2 %vm226_vm1, %v5267_v37 }
  0xac   : > { %4607 = vmatmul.msk.bf16.gmra.mxu3 %vm226_vm1, %v5269_v40 }
  0xad   : > { %4584 = vmatmul.msk.bf16.gmra.mxu0 %vm226_vm1, %v5271_v41 }
  0xae   : > { %4600 = vmatmul.msk.bf16.gmra.mxu1 %vm226_vm1, %v5273_v42 }
  0xbb   : > { %4592 = vmatmul.msk.bf16.gmra.mxu2 %vm226_vm1, %v5291_v59 }
  0xbc   : > { %4608 = vmatmul.msk.bf16.gmra.mxu3 %vm226_vm1, %v5293_v60 }
  0xbd   : > { %4585 = vmatmul.msk.bf16.gmra.mxu0 %vm226_vm1, %v5295_v61 }
  0xbe   : > { %4601 = vmatmul.msk.bf16.gmra.mxu1 %vm226_vm1, %v5297_v62 }
  0xcb   : > { %4593 = vmatmul.msk.bf16.gmra.mxu2 %vm226_vm1, %v5307_v11 }
  0xcc   : > { %4609 = vmatmul.msk.bf16.gmra.mxu3 %vm226_vm1, %v5309_v12 }
  0xcd   : > { %4586 = vmatmul.msk.bf16.gmra.mxu0 %vm226_vm1, %v5311_v13 }
  0xce   : > { %4602 = vmatmul.msk.bf16.gmra.mxu1 %vm226_vm1, %v5313_v14 }
  0xdb   : > { %4594 = vmatmul.msk.bf16.gmra.mxu2 %vm226_vm1, %v5341_v44 }
  0xdc   : > { %4610 = vmatmul.msk.bf16.gmra.mxu3 %vm226_vm1, %v5343_v45 }
  0xdd   : > { %4646 = vmatmul.msk.bf16.vlgmr.msrb.gmra.mxu0 %vm226_vm1, %v5180_v38 }
  0xde   : > { %4663 = vmatmul.msk.bf16.vlgmr.msrb.gmra.mxu1 %vm226_vm1, %v1458_v46 }
  0xea   : > { %v545_v63 = vpop.f32.mrf.mxu0 }
  0xeb   : > { %v685_v0 = vpop.f32.mrf.mxu1  ;;  %4612 = vmatmul.msk.bf16.vlgmr.msrb.gmra.mxu2 %vm226_vm1, %v792_v57 }
  0xec   : > { %4629 = vmatmul.msk.bf16.vlgmr.msrb.gmra.mxu3 %vm226_vm1, %v5182_v39  ;;  %v5361_v38 = vadd.f32 %v685_v0, %v545_v63  ;;  %v1431_v39 = vld [vmem:[#allocation2 + $0x52] sm:$0xff] }
  0xed   : > { %4647 = vmatmul.msk.bf16.gmra.mxu0 %vm226_vm1, %v5199_v53  ;;  %v5373_v24 = vpack.c.bf16 %v1431_v39, %v1430_v18 }
  0xee   : > { %4664 = vmatmul.msk.bf16.gmra.mxu1 %vm226_vm1, %v5356_v58  ;;  %v580_v1 = vpop.f32.mrf.mxu2 }
  0xef   : > { %v720_v2 = vpop.f32.mrf.mxu3 }
  0xf0   : > { %v5367_v7 = vadd.f32 %v720_v2, %v580_v1 }
  0xf2   : > { %v547_v8 = vpop.f32.mrf.mxu0 }
  0xf3   : > { %v687_v9 = vpop.f32.mrf.mxu1 }
  0xf4   : > { %v5369_v10 = vadd.f32 %v687_v9, %v547_v8 }
  0xf6   : > { %v582_v15 = vpop.f32.mrf.mxu2 }
  0xf7   : > { %v722_v16 = vpop.f32.mrf.mxu3 }
  0xf8   : > { %v5371_v23 = vadd.f32 %v722_v16, %v582_v15  ;;  %v1434_v15 = vld [vmem:[#allocation2 + $0x7a] sm:$0xff] }
  0xfa   : > { %v550_v53 = vpop.f32.mrf.mxu0 }
  0xfb   : > { %v690_v25 = vpop.f32.mrf.mxu1  ;;  %4613 = vmatmul.msk.bf16.gmra.mxu2 %vm226_vm1, %v1458_v46 }
  0xfc   : > { %4630 = vmatmul.msk.bf16.gmra.mxu3 %vm226_vm1, %v5201_v54  ;;  %v5378_v26 = vadd.f32 %v690_v25, %v550_v53  ;;  %v1433_v54 = vld [vmem:[#allocation2 + $0x6a] sm:$0xff] }
  0xfd   : > { %4648 = vmatmul.msk.bf16.gmra.mxu0 %vm226_vm1, %v5223_v5  ;;  %v5390_v49 = vpack.c.bf16 %v1433_v54, %v1432_v43  ;;  %v1436_v54 = vld [vmem:[#allocation2 + $0x92] sm:$0xff] }
  0xfe   : > { %4665 = vmatmul.msk.bf16.gmra.mxu1 %vm226_vm1, %v5373_v24  ;;  %v585_v27 = vpop.f32.mrf.mxu2 }
  0xff   : > { %v725_v28 = vpop.f32.mrf.mxu3 }
 0x100   : > { %v5384_v29 = vadd.f32 %v725_v28, %v585_v27 }
 0x102   : > { %v552_v30 = vpop.f32.mrf.mxu0 }
 0x103   : > { %v692_v33 = vpop.f32.mrf.mxu1 }
 0x104   : > { %v5386_v34 = vadd.f32 %v692_v33, %v552_v30 }
 0x106   : > { %v587_v35 = vpop.f32.mrf.mxu2 }
 0x107   : > { %v727_v36 = vpop.f32.mrf.mxu3 }
 0x108   : > { %v5388_v46 = vadd.f32 %v727_v36, %v587_v35 }
 0x10a   : > { %v555_v5 = vpop.f32.mrf.mxu0 }
 0x10b   : > { %v695_v50 = vpop.f32.mrf.mxu1  ;;  %4614 = vmatmul.msk.bf16.gmra.mxu2 %vm226_vm1, %v5356_v58 }
 0x10c   : > { %4631 = vmatmul.msk.bf16.gmra.mxu3 %vm226_vm1, %v5225_v6  ;;  %v5396_v55 = vadd.f32 %v695_v50, %v555_v5  ;;  %v1435_v6 = vld [vmem:[#allocation2 + $0x82] sm:$0xff] }
 0x10d   : > { %4649 = vmatmul.msk.bf16.gmra.mxu0 %vm226_vm1, %v5247_v21  ;;  %v5408_v18 = vpack.c.bf16 %v1435_v6, %v1434_v15 }
 0x10e   : > { %4666 = vmatmul.msk.bf16.gmra.mxu1 %vm226_vm1, %v5390_v49  ;;  %v590_v56 = vpop.f32.mrf.mxu2 }
 0x10f   : > { %v730_v57 = vpop.f32.mrf.mxu3 }
 0x110   : > { %v5402_v63 = vadd.f32 %v730_v57, %v590_v56 }
 0x112   : > { %v557_v0 = vpop.f32.mrf.mxu0 }
 0x113   : > { %v697_v1 = vpop.f32.mrf.mxu1 }
 0x114   : > { %v5404_v2 = vadd.f32 %v697_v1, %v557_v0 }
 0x116   : > { %v592_v8 = vpop.f32.mrf.mxu2 }
 0x117   : > { %v732_v9 = vpop.f32.mrf.mxu3 }
 0x118   : > { %v5406_v16 = vadd.f32 %v732_v9, %v592_v8 }
 0x11a   : > { %v560_v21 = vpop.f32.mrf.mxu0 }
 0x11b   : > { %v700_v39 = vpop.f32.mrf.mxu1  ;;  %4615 = vmatmul.msk.bf16.gmra.mxu2 %vm226_vm1, %v5373_v24 }
 0x11c   : > { %4632 = vmatmul.msk.bf16.gmra.mxu3 %vm226_vm1, %v5249_v22  ;;  %v5414_v53 = vadd.f32 %v700_v39, %v560_v21  ;;  %v1437_v22 = vld [vmem:[#allocation2 + $0x9a] sm:$0xff] }
 0x11d   : > { %4650 = vmatmul.msk.bf16.gmra.mxu0 %vm226_vm1, %v5271_v41  ;;  %v5426_v50 = vpack.c.bf16 %v1437_v22, %v1436_v54 }
 0x11e   : > { %4667 = vmatmul.msk.bf16.gmra.mxu1 %vm226_vm1, %v5408_v18  ;;  %v595_v25 = vpop.f32.mrf.mxu2 }
 0x11f   : > { %v735_v27 = vpop.f32.mrf.mxu3  ;;  %6806 = vst [vmem:[#allocation6_spill] sm:$0xff] %v5426_v50 }
 0x120   : > { %v5420_v28 = vadd.f32 %v735_v27, %v595_v25  ;;  %v1438_v25 = vld [vmem:[#allocation2 + $0xaa] sm:$0xff] }
 0x122   : > { %6804 = vst [vmem:[#allocation4_spill] sm:$0xff] %v5420_v28  ;;  %v562_v30 = vpop.f32.mrf.mxu0 }
 0x123   : > { %v702_v33 = vpop.f32.mrf.mxu1 }
 0x124   : > { %v5422_v35 = vadd.f32 %v702_v33, %v562_v30 }
 0x126   : > { %v597_v36 = vpop.f32.mrf.mxu2 }
 0x127   : > { %v737_v43 = vpop.f32.mrf.mxu3 }
 0x128   : > { %v5424_v5 = vadd.f32 %v737_v43, %v597_v36 }
 0x12a   : > { %6805 = vst [vmem:[#allocation5_spill] sm:$0xff] %v5424_v5  ;;  %v565_v41 = vpop.f32.mrf.mxu0 }
 0x12b   : > { %v705_v56 = vpop.f32.mrf.mxu1  ;;  %4616 = vmatmul.msk.bf16.gmra.mxu2 %vm226_vm1, %v5390_v49 }
 0x12c   : > { %4633 = vmatmul.msk.bf16.gmra.mxu3 %vm226_vm1, %v5273_v42  ;;  %v5432_v57 = vadd.f32 %v705_v56, %v565_v41  ;;  %v1439_v42 = vld [vmem:[#allocation2 + $0xb2] sm:$0xff] }
 0x12d   : > { %4651 = vmatmul.msk.bf16.gmra.mxu0 %vm226_vm1, %v5295_v61  ;;  %v5444_v30 = vpack.c.bf16 %v1439_v42, %v1438_v25 }
 0x12e   : > { %4668 = vmatmul.msk.bf16.gmra.mxu1 %vm226_vm1, %v5426_v50  ;;  %v600_v0 = vpop.f32.mrf.mxu2 }
 0x12f   : > { %v740_v1 = vpop.f32.mrf.mxu3  ;;  %6809 = vst [vmem:[#allocation9_spill] sm:$0xff] %v5444_v30 }
 0x130   : > { %v5438_v8 = vadd.f32 %v740_v1, %v600_v0 }
 0x132   : > { %6807 = vst [vmem:[#allocation7_spill] sm:$0xff] %v5438_v8  ;;  %v567_v9 = vpop.f32.mrf.mxu0 }
 0x133   : > { %v707_v15 = vpop.f32.mrf.mxu1 }
 0x134   : > { %v5440_v6 = vadd.f32 %v707_v15, %v567_v9  ;;  %v1440_v15 = vld [vmem:[#allocation2 + $0xc2] sm:$0xff] }
 0x136   : > { %v602_v21 = vpop.f32.mrf.mxu2 }
 0x137   : > { %v742_v39 = vpop.f32.mrf.mxu3 }
 0x138   : > { %v5442_v27 = vadd.f32 %v742_v39, %v602_v21 }
 0x13a   : > { %6808 = vst [vmem:[#allocation8_spill] sm:$0xff] %v5442_v27  ;;  %v570_v61 = vpop.f32.mrf.mxu0  ;;  %v1446_v27 = vld [vmem:[#allocation2 + $0x10a] sm:$0xff] }
 0x13b   : > { %v710_v33 = vpop.f32.mrf.mxu1  ;;  %4617 = vmatmul.msk.bf16.gmra.mxu2 %vm226_vm1, %v5408_v18 }
 0x13c   : > { %4634 = vmatmul.msk.bf16.gmra.mxu3 %vm226_vm1, %v5297_v62  ;;  %v5450_v36 = vadd.f32 %v710_v33, %v570_v61  ;;  %v1441_v62 = vld [vmem:[#allocation2 + $0xca] sm:$0xff] }
 0x13d   : > { %4652 = vmatmul.msk.bf16.gmra.mxu0 %vm226_vm1, %v5311_v13  ;;  %v5462_v39 = vpack.c.bf16 %v1441_v62, %v1440_v15  ;;  %v1442_v15 = vld [vmem:[#allocation2 + $0xda] sm:$0xff] }
 0x13e   : > { %4669 = vmatmul.msk.bf16.gmra.mxu1 %vm226_vm1, %v5444_v30  ;;  %v605_v43 = vpop.f32.mrf.mxu2 }
 0x13f   : > { %v745_v54 = vpop.f32.mrf.mxu3  ;;  %6812 = vst [vmem:[#allocation12_spill] sm:$0xff] %v5462_v39 }
 0x140   : > { %v5456_v22 = vadd.f32 %v745_v54, %v605_v43 }
 0x142   : > { %6810 = vst [vmem:[#allocation10_spill] sm:$0xff] %v5456_v22  ;;  %v572_v41 = vpop.f32.mrf.mxu0 }
 0x143   : > { %v712_v56 = vpop.f32.mrf.mxu1 }
 0x144   : > { %v5458_v0 = vadd.f32 %v712_v56, %v572_v41 }
 0x146   : > { %v607_v1 = vpop.f32.mrf.mxu2 }
 0x147   : > { %v747_v9 = vpop.f32.mrf.mxu3 }
 0x148   : > { %v5460_v21 = vadd.f32 %v747_v9, %v607_v1 }
 0x14a   : > { %6811 = vst [vmem:[#allocation11_spill] sm:$0xff] %v5460_v21  ;;  %v575_v13 = vpop.f32.mrf.mxu0 }
 0x14b   : > { %v715_v25 = vpop.f32.mrf.mxu1  ;;  %4618 = vmatmul.msk.bf16.gmra.mxu2 %vm226_vm1, %v5426_v50 }
 0x14c   : > { %4635 = vmatmul.msk.bf16.gmra.mxu3 %vm226_vm1, %v5313_v14  ;;  %v5468_v42 = vadd.f32 %v715_v25, %v575_v13  ;;  %v1443_v14 = vld [vmem:[#allocation2 + $0xe2] sm:$0xff] }
 0x14d   : > { %4653 = vmatmul.msk.bf16.gmra.mxu0 %vm226_vm1, %v5170_v31  ;;  %v5480_v13 = vpack.c.bf16 %v1443_v14, %v1442_v15 }
 0x14e   : > { %4670 = vmatmul.msk.bf16.gmra.mxu1 %vm226_vm1, %v5462_v39  ;;  %v610_v61 = vpop.f32.mrf.mxu2 }
 0x14f   : > { %v750_v33 = vpop.f32.mrf.mxu3 }
 0x150   : > { %v5474_v43 = vadd.f32 %v750_v33, %v610_v61  ;;  %v4730_v61 = vld [vmem:[%s6777_s3 + $0x4] sm:$0xf] }
 0x151   : > { %v2564_v33 = vsel %vm527_vm0, %v4730_v61, 0 }
 0x152   : > { %6813 = vst [vmem:[#allocation13_spill] sm:$0xff] %v5474_v43  ;;  %v577_v54 = vpop.f32.mrf.mxu0  ;;  %2573 = vmatpush.bf16.msra.mxu1 %v2564_v33  ;;  %v1445_v43 = vld [vmem:[#allocation2 + $0xfa] sm:$0xff] }
 0x153   : > { %v717_v41 = vpop.f32.mrf.mxu1 }
 0x154   : > { %v5476_v56 = vadd.f32 %v717_v41, %v577_v54 }
 0x156   : > { %v612_v1 = vpop.f32.mrf.mxu2 }
 0x157   : > { %v752_v9 = vpop.f32.mrf.mxu3 }
 0x158   : > { %v5478_v62 = vadd.f32 %v752_v9, %v612_v1 }
 0x15a   : > { %6814 = vst [vmem:[#allocation14_spill] sm:$0xff] %v5478_v62  ;;  %v1314_v31 = vpop.f32.mrf.mxu0  ;;  %v1444_v62 = vld [vmem:[#allocation2 + $0xf2] sm:$0xff] }
 0x15b   : > { %v1536_v25 = vpop.f32.mrf.mxu1  ;;  %4619 = vmatmul.msk.bf16.gmra.mxu2 %vm226_vm1, %v5444_v30  ;;  %v5498_v61 = vpack.c.bf16 %v1445_v43, %v1444_v62 }
 0x15c   : > { %4636 = vmatmul.msk.bf16.gmra.mxu3 %vm226_vm1, %v5172_v32 }
 0x15d   : > { %4654 = vmatmul.msk.bf16.gmra.mxu0 %vm226_vm1, %v5195_v51 }
 0x15e   : > { %4671 = vmatmul.msk.bf16.gmra.mxu1 %vm226_vm1, %v5480_v13  ;;  %v615_v54 = vpop.f32.mrf.mxu2 }
 0x15f   : > { %v755_v41 = vpop.f32.mrf.mxu3 }
 0x160   : > { %v5494_v1 = vadd.f32 %v755_v41, %v615_v54 }
 0x162   : > { %6815 = vst [vmem:[#allocation15_spill] sm:$0xff] %v5494_v1  ;;  %v1316_v9 = vpop.f32.mrf.mxu0 }
 0x163   : > { %v1538_v15 = vpop.f32.mrf.mxu1 }
 0x166   : > { %v617_v32 = vpop.f32.mrf.mxu2 }
 0x167   : > { %v757_v14 = vpop.f32.mrf.mxu3 }
 0x168   : > { %v5496_v21 = vadd.f32 %v757_v14, %v617_v32 }
 0x16a   : > { %6816 = vst [vmem:[#allocation16_spill] sm:$0xff] %v5496_v21  ;;  %v1319_v22 = vpop.f32.mrf.mxu0  ;;  %v683_v21 = vadd.f32 %v5354_v48, %v5352_v47 }
 0x16b   : > { %v1541_v51 = vpop.f32.mrf.mxu1  ;;  %4620 = vmatmul.msk.bf16.gmra.mxu2 %vm226_vm1, %v5462_v39 }
 0x16c   : > { %4637 = vmatmul.msk.bf16.gmra.mxu3 %vm226_vm1, %v5197_v52 }
 0x16d   : > { %4655 = vmatmul.msk.bf16.gmra.mxu0 %vm226_vm1, %v5219_v3  ;;  %v1447_v3 = vld [vmem:[#allocation2 + $0x112] sm:$0xff] }
 0x16e   : > { %4672 = vmatmul.msk.bf16.gmra.mxu1 %vm226_vm1, %v5498_v61  ;;  %v870_v33 = vpop.f32.mrf.mxu2  ;;  %v5513_v5 = vpack.c.bf16 %v1447_v3, %v1446_v27 }
 0x16f   : > { %v1092_v54 = vpop.f32.mrf.mxu3  ;;  %v950_v41 = vadd.f32 %v870_v33, %v5319_v17 }
 0x171   : > { %v1172_v43 = vadd.f32 %v1092_v54, %v950_v41 }
 0x172   : > { %v1321_v62 = vpop.f32.mrf.mxu0 }
 0x173   : > { %v1543_v32 = vpop.f32.mrf.mxu1  ;;  %v1394_v14 = vadd.f32 %v1314_v31, %v1172_v43 }
 0x175   : > { %v5511_v1 = vadd.f32 %v1536_v25, %v1394_v14 }
 0x176   : > { %v872_v52 = vpop.f32.mrf.mxu2 }
 0x177   : > { %v1094_v39 = vpop.f32.mrf.mxu3  ;;  %v951_v8 = vadd.f32 %v872_v52, %v683_v21 }
 0x179   : > { %v1173_v30 = vadd.f32 %v1094_v39, %v951_v8 }
 0x17a   : > { %v1324_v28 = vpop.f32.mrf.mxu0 }
 0x17b   : > { %v1546_v50 = vpop.f32.mrf.mxu1  ;;  %4621 = vmatmul.msk.bf16.gmra.mxu2 %vm226_vm1, %v5480_v13  ;;  %v1395_v17 = vadd.f32 %v1316_v9, %v1173_v30  ;;  %v1448_v9 = vld [vmem:[#allocation2 + $0x122] sm:$0xff] }
 0x17c   : > { %4638 = vmatmul.msk.bf16.gmra.mxu3 %vm226_vm1, %v5221_v4 }
 0x17d   : > { %v5519_v47 = vadd.f32 %v1538_v15, %v1395_v17  ;;  %4656 = vmatmul.msk.bf16.gmra.mxu0 %vm226_vm1, %v5243_v19  ;;  %v1449_v15 = vld [vmem:[#allocation2 + $0x12a] sm:$0xff] }
 0x17e   : > { %4673 = vmatmul.msk.bf16.gmra.mxu1 %vm226_vm1, %v5513_v5  ;;  %v875_v48 = vpop.f32.mrf.mxu2  ;;  %v5529_v41 = vpack.c.bf16 %v1449_v15, %v1448_v9 }
 0x17f   : > { %v1097_v8 = vpop.f32.mrf.mxu3  ;;  %v952_v27 = vadd.f32 %v875_v48, %v5361_v38 }
 0x181   : > { %v1174_v21 = vadd.f32 %v1097_v8, %v952_v27 }
 0x182   : > { %v1326_v39 = vpop.f32.mrf.mxu0 }
 0x183   : > { %v1548_v31 = vpop.f32.mrf.mxu1  ;;  %v1396_v25 = vadd.f32 %v1319_v22, %v1174_v21  ;;  %v1451_v21 = vld [vmem:[#allocation2 + $0x142] sm:$0xff] }
 0x185   : > { %v5526_v33 = vadd.f32 %v1541_v51, %v1396_v25 }
 0x186   : > { %v877_v4 = vpop.f32.mrf.mxu2 }
 0x187   : > { %v1099_v30 = vpop.f32.mrf.mxu3  ;;  %v953_v54 = vadd.f32 %v877_v4, %v5369_v10 }
 0x189   : > { %v1175_v19 = vadd.f32 %v1099_v30, %v953_v54 }
 0x18a   : > { %v1329_v43 = vpop.f32.mrf.mxu0 }
 0x18b   : > { %v1551_v14 = vpop.f32.mrf.mxu1  ;;  %4622 = vmatmul.msk.bf16.gmra.mxu2 %vm226_vm1, %v5498_v61  ;;  %v1397_v38 = vadd.f32 %v1321_v62, %v1175_v19 }
 0x18c   : > { %4639 = vmatmul.msk.bf16.gmra.mxu3 %vm226_vm1, %v5245_v20 }
 0x18d   : > { %v5535_v22 = vadd.f32 %v1543_v32, %v1397_v38  ;;  %4657 = vmatmul.msk.bf16.gmra.mxu0 %vm226_vm1, %v5267_v37  ;;  %v1450_v32 = vld [vmem:[#allocation2 + $0x13a] sm:$0xff] }
 0x18e   : > { %4674 = vmatmul.msk.bf16.gmra.mxu1 %vm226_vm1, %v5529_v41  ;;  %v880_v10 = vpop.f32.mrf.mxu2  ;;  %v5545_v4 = vpack.c.bf16 %v1451_v21, %v1450_v32  ;;  %v346_v32 = vld [vmem:[%s5139_s8 + $0xf8] sm:$0xff] }
 0x18f   : > { %v1102_v51 = vpop.f32.mrf.mxu3  ;;  %v954_v52 = vadd.f32 %v880_v10, %v5378_v26  ;;  %379 = vst.msk [vmem:[#allocation2 + $0x189] sm:$0xff] %vm226_vm1, %v346_v32 }
 0x191   : > { %v1176_v3 = vadd.f32 %v1102_v51, %v954_v52  ;;  %v1452_v51 = vld [vmem:[#allocation2 + $0x152] sm:$0xff] }
 0x192   : > { %v1331_v17 = vpop.f32.mrf.mxu0 }
 0x193   : > { %v1553_v48 = vpop.f32.mrf.mxu1  ;;  %v1398_v8 = vadd.f32 %v1324_v28, %v1176_v3 }
 0x195   : > { %v5542_v27 = vadd.f32 %v1546_v50, %v1398_v8 }
 0x196   : > { %v882_v20 = vpop.f32.mrf.mxu2 }
 0x197   : > { %v1104_v62 = vpop.f32.mrf.mxu3  ;;  %v955_v25 = vadd.f32 %v882_v20, %v5386_v34 }
 0x199   : > { %v1177_v37 = vadd.f32 %v1104_v62, %v955_v25 }
 0x19a   : > { %v1334_v30 = vpop.f32.mrf.mxu0 }
 0x19b   : > { %v1556_v9 = vpop.f32.mrf.mxu1  ;;  %4623 = vmatmul.msk.bf16.gmra.mxu2 %vm226_vm1, %v5513_v5  ;;  %v1399_v26 = vadd.f32 %v1326_v39, %v1177_v37 }
 0x19c   : > { %4640 = vmatmul.msk.bf16.gmra.mxu3 %vm226_vm1, %v5269_v40 }
 0x19d   : > { %v5551_v28 = vadd.f32 %v1548_v31, %v1399_v26  ;;  %4658 = vmatmul.msk.bf16.gmra.mxu0 %vm226_vm1, %v5291_v59  ;;  %v1453_v59 = vld [vmem:[#allocation2 + $0x15a] sm:$0xff] }
 0x19e   : > { %4675 = vmatmul.msk.bf16.gmra.mxu1 %vm226_vm1, %v5545_v4  ;;  %v885_v34 = vpop.f32.mrf.mxu2  ;;  %v5563_v8 = vpack.c.bf16 %v1453_v59, %v1452_v51 }
 0x19f   : > { %v1107_v50 = vpop.f32.mrf.mxu3  ;;  %v956_v15 = vadd.f32 %v885_v34, %v5396_v55  ;;  %v345_v55 = vld [vmem:[%s5139_s8 + $0xf0] sm:$0xff] }
 0x1a0   : > { %378 = vst.msk [vmem:[#allocation2 + $0x181] sm:$0xff] %vm226_vm1, %v345_v55 }
 0x1a1   : > { %v1178_v54 = vadd.f32 %v1107_v50, %v956_v15  ;;  %v1454_v15 = vld [vmem:[#allocation2 + $0x16a] sm:$0xff] }
 0x1a2   : > { %v1336_v19 = vpop.f32.mrf.mxu0 }
 0x1a3   : > { %v5558_v38 = vpop.f32.mrf.mxu1  ;;  %v1400_v40 = vadd.f32 %v1329_v43, %v1178_v54  ;;  %v1455_v54 = vld [vmem:[#allocation2 + $0x172] sm:$0xff] }
 0x1a5   : > { %v5560_v39 = vadd.f32 %v1551_v14, %v1400_v40 }
 0x1a6   : > { %v887_v31 = vpop.f32.mrf.mxu2 }
 0x1a7   : > { %v1109_v10 = vpop.f32.mrf.mxu3  ;;  %v957_v52 = vadd.f32 %v887_v31, %v5404_v2  ;;  %v5585_v31 = vpack.c.bf16 %v1455_v54, %v1454_v15 }
 0x1a9   : > { %v1179_v3 = vadd.f32 %v1109_v10, %v957_v52 }
 0x1aa   : > { %v1339_v20 = vpop.f32.mrf.mxu0 }
 0x1ab   : > { %v1561_v62 = vpop.f32.mrf.mxu1  ;;  %4624 = vmatmul.msk.bf16.gmra.mxu2 %vm226_vm1, %v5529_v41  ;;  %v1401_v43 = vadd.f32 %v1331_v17, %v1179_v3 }
 0x1ac   : > { %4641 = vmatmul.msk.bf16.gmra.mxu3 %vm226_vm1, %v5293_v60 }
 0x1ad   : > { %v5573_v14 = vadd.f32 %v1553_v48, %v1401_v43  ;;  %4659 = vmatmul.msk.bf16.gmra.mxu0 %vm226_vm1, %v5307_v11 }
 0x1ae   : > { %4676 = vmatmul.msk.bf16.gmra.mxu1 %vm226_vm1, %v5563_v8  ;;  %v890_v2 = vpop.f32.mrf.mxu2 }
 0x1af   : > { %v1112_v21 = vpop.f32.mrf.mxu3  ;;  %v958_v25 = vadd.f32 %v890_v2, %v5414_v53  ;;  %v1235_v2 = vld [vmem:[#allocation2 + $0x189] sm:$0xff] }
 0x1b1   : > { %v1180_v37 = vadd.f32 %v1112_v21, %v958_v25  ;;  %v1456_v21 = vld [vmem:[#allocation2 + $0x182] sm:$0xff] }
 0x1b2   : > { %v1341_v26 = vpop.f32.mrf.mxu0 }
 0x1b3   : > { %v5580_v60 = vpop.f32.mrf.mxu1  ;;  %v1402_v17 = vadd.f32 %v1334_v30, %v1180_v37 }
 0x1b5   : > { %v5582_v34 = vadd.f32 %v1556_v9, %v1402_v17 }
 0x1b6   : > { %v892_v50 = vpop.f32.mrf.mxu2 }
 0x1b7   : > { %v1114_v48 = vpop.f32.mrf.mxu3  ;;  %v959_v11 = vadd.f32 %v892_v50, %v5422_v35 }
 0x1b9   : > { %v1181_v40 = vadd.f32 %v1114_v48, %v959_v11 }
 0x1ba   : > { %v1344_v10 = vpop.f32.mrf.mxu0 }
 0x1bb   : > { %v1566_v51 = vpop.f32.mrf.mxu1  ;;  %4625 = vmatmul.msk.bf16.gmra.mxu2 %vm226_vm1, %v5545_v4  ;;  %v5591_v53 = vadd.f32 %v1336_v19, %v1181_v40 }
 0x1bc   : > { %4642 = vmatmul.msk.bf16.gmra.mxu3 %vm226_vm1, %v5309_v12  ;;  %v1234_v12 = vld [vmem:[#allocation2 + $0x181] sm:$0xff] }
 0x1bd   : > { %4660 = vmatmul.msk.bf16.gmra.mxu0 %vm226_vm1, %v5341_v44  ;;  %v1457_v44 = vld [vmem:[#allocation2 + $0x18a] sm:$0xff]  ;;  %v5603_v17 = vpack.c.bf16 %v1235_v2, %v1234_v12 }
 0x1be   : > { %4677 = vmatmul.msk.bf16.gmra.mxu1 %vm226_vm1, %v5585_v31  ;;  %v895_v35 = vpop.f32.mrf.mxu2  ;;  %v5605_v50 = vpack.c.bf16 %v1457_v44, %v1456_v21 }
 0x1bf   : > { %v1117_v30 = vpop.f32.mrf.mxu3  ;;  %v960_v9 = vadd.f32 %v895_v35, %v5432_v57 }
 0x1c1   : > { %v1182_v59 = vadd.f32 %v1117_v30, %v960_v9  ;;  %v1012_v30 = vld [vmem:[#allocation2 + $0x180] sm:$0xff]  ;;  %v1013_v9 = vld [vmem:[#allocation2 + $0x188] sm:$0xff] }
 0x1c2   : > { %v1346_v52 = vpop.f32.mrf.mxu0  ;;  %v5623_v12 = vpack.c.bf16 %v1013_v9, %v1012_v30 }
 0x1c3   : > { %v5598_v3 = vpop.f32.mrf.mxu1  ;;  %v1404_v55 = vadd.f32 %v1339_v20, %v1182_v59 }
 0x1c5   : > { %v5600_v32 = vadd.f32 %v1561_v62, %v1404_v55 }
 0x1c6   : > { %v897_v19 = vpop.f32.mrf.mxu2 }
 0x1c7   : > { %v1119_v43 = vpop.f32.mrf.mxu3  ;;  %v961_v25 = vadd.f32 %v897_v19, %v5440_v6 }
 0x1c9   : > { %v1183_v37 = vadd.f32 %v1119_v43, %v961_v25 }
 0x1ca   : > { %v1349_v57 = vpop.f32.mrf.mxu0 }
 0x1cb   : > { %v1571_v48 = vpop.f32.mrf.mxu1  ;;  %4626 = vmatmul.msk.bf16.gmra.mxu2 %vm226_vm1, %v5563_v8  ;;  %v5611_v20 = vadd.f32 %v1341_v26, %v1183_v37 }
 0x1cc   : > { %4643 = vmatmul.msk.bf16.gmra.mxu3 %vm226_vm1, %v5343_v45 }
 0x1cd   : > { %4661 = vmatmul.msk.bf16.gmra.mxu0 %vm226_vm1, %v5603_v17 }
 0x1ce   : > { %4678 = vmatmul.msk.bf16.gmra.mxu1 %vm226_vm1, %v5605_v50  ;;  %v900_v6 = vpop.f32.mrf.mxu2 }
 0x1cf   : > { %v1122_v62 = vpop.f32.mrf.mxu3  ;;  %v962_v15 = vadd.f32 %v900_v6, %v5450_v36  ;;  %v1649_v6 = vld [vmem:[#allocation2 + $0x30] sm:$0xff] }
 0x1d1   : > { %v1184_v54 = vadd.f32 %v1122_v62, %v962_v15  ;;  %v1650_v62 = vld [vmem:[#allocation2 + $0x38] sm:$0xff] }
 0x1d2   : > { %v1351_v11 = vpop.f32.mrf.mxu0  ;;  %v1871_v15 = vld [vmem:[#allocation2 + $0x31] sm:$0xff] }
 0x1d3   : > { %v5618_v40 = vpop.f32.mrf.mxu1  ;;  %v1406_v35 = vadd.f32 %v1344_v10, %v1184_v54  ;;  %v1872_v54 = vld [vmem:[#allocation2 + $0x39] sm:$0xff] }
 0x1d5   : > { %v5620_v45 = vadd.f32 %v1566_v51, %v1406_v35 }
 0x1d6   : > { %v902_v26 = vpop.f32.mrf.mxu2 }
 0x1d7   : > { %v1124_v59 = vpop.f32.mrf.mxu3  ;;  %v963_v55 = vadd.f32 %v902_v26, %v5458_v0  ;;  %v1903_v26 = vpack.c.bf16 %v1872_v54, %v1871_v15  ;;  %v1874_v15 = vld [vmem:[#allocation2 + $0x51] sm:$0xff] }
 0x1d9   : > { %v1185_v19 = vadd.f32 %v1124_v59, %v963_v55 }
 0x1da   : > { %v1354_v43 = vpop.f32.mrf.mxu0 }
 0x1db   : > { %v1576_v2 = vpop.f32.mrf.mxu1  ;;  %4627 = vmatmul.msk.bf16.gmra.mxu2 %vm226_vm1, %v5585_v31  ;;  %v5629_v36 = vadd.f32 %v1346_v52, %v1185_v19 }
 0x1dc   : > { %4644 = vmatmul.msk.bf16.gmra.mxu3 %vm226_vm1, %v5623_v12 }
 0x1dd   : > { %4714 = vmatmul.msk.bf16.vlgmr.msra.gmra.mxu0 %vm226_vm1, %v5356_v58  ;;  %v1681_v58 = vpack.c.bf16 %v1650_v62, %v1649_v6  ;;  %v1652_v6 = vld [vmem:[#allocation2 + $0x50] sm:$0xff] }
 0x1de   : > { %v905_v10 = vpop.f32.mrf.mxu2  ;;  %v1873_v62 = vld [vmem:[#allocation2 + $0x49] sm:$0xff] }
 0x1df   : > { %v1127_v51 = vpop.f32.mrf.mxu3  ;;  %v964_v0 = vadd.f32 %v905_v10, %v5468_v42 }
 0x1e1   : > { %v1186_v21 = vadd.f32 %v1127_v51, %v964_v0 }
 0x1e2   : > { %v1356_v44 = vpop.f32.mrf.mxu0 }
 0x1e3   : > { %v5634_v25 = vpop.f32.mrf.mxu1  ;;  %v1408_v37 = vadd.f32 %v1349_v57, %v1186_v21  ;;  %v1651_v21 = vld [vmem:[#allocation2 + $0x48] sm:$0xff] }
 0x1e5   : > { %v5636_v35 = vadd.f32 %v1571_v48, %v1408_v37 }
 0x1e6   : > { %v907_v52 = vpop.f32.mrf.mxu2 }
 0x1e7   : > { %v1129_v30 = vpop.f32.mrf.mxu3  ;;  %v965_v9 = vadd.f32 %v907_v52, %v5476_v56 }
 0x1e9   : > { %v1187_v59 = vadd.f32 %v1129_v30, %v965_v9  ;;  %v1904_v9 = vpack.c.bf16 %v1874_v15, %v1873_v62 }
 0x1ea   : > { %v1359_v55 = vpop.f32.mrf.mxu0 }
 0x1eb   : > { %v1581_v42 = vpop.f32.mrf.mxu1  ;;  %4680 = vmatmul.msk.bf16.vlgmr.msra.gmra.mxu2 %vm226_vm1, %v1681_v58  ;;  %v5641_v57 = vadd.f32 %v1351_v11, %v1187_v59 }
 0x1ec   : > { %4697 = vmatmul.msk.bf16.vlgmr.msra.gmra.mxu3 %vm226_vm1, %v1903_v26 }
 0x1ed   : > { %4715 = vmatmul.msk.bf16.gmra.mxu0 %vm226_vm1, %v5373_v24  ;;  %v1682_v24 = vpack.c.bf16 %v1652_v6, %v1651_v21  ;;  %v1875_v21 = vld [vmem:[#allocation2 + $0x61] sm:$0xff]  ;;  %v1876_v6 = vld [vmem:[#allocation2 + $0x69] sm:$0xff] }
 0x1ee   : > { %v910_v48 = vpop.f32.mrf.mxu2 }
 0x1ef   : > { %v1132_v19 = vpop.f32.mrf.mxu3  ;;  %v966_v10 = vadd.f32 %v910_v48, %v5367_v7 }
 0x1f1   : > { %v1188_v51 = vadd.f32 %v1132_v19, %v966_v10 }
 0x1f2   : > { %v1361_v56 = vpop.f32.mrf.mxu0 }
 0x1f3   : > { %v1410_v0 = vadd.f32 %v1354_v43, %v1188_v51  ;;  %v5646_v37 = vpop.f32.mrf.mxu1  ;;  %v1653_v51 = vld [vmem:[#allocation2 + $0x60] sm:$0xff] }
 0x1f5   : > { %v5648_v54 = vadd.f32 %v1576_v2, %v1410_v0  ;;  %v1654_v0 = vld [vmem:[#allocation2 + $0x68] sm:$0xff] }
 0x1f6   : > { %v912_v11 = vpop.f32.mrf.mxu2 }
 0x1f7   : > { %v1134_v52 = vpop.f32.mrf.mxu3  ;;  %v967_v30 = vadd.f32 %v912_v11, %v5371_v23 }
 0x1f9   : > { %v1189_v58 = vadd.f32 %v1134_v52, %v967_v30  ;;  %v1683_v52 = vpack.c.bf16 %v1654_v0, %v1653_v51  ;;  %v1877_v51 = vld [vmem:[#allocation2 + $0x79] sm:$0xff]  ;;  %v1878_v0 = vld [vmem:[#allocation2 + $0x81] sm:$0xff] }
 0x1fa   : > { %v1364_v26 = vpop.f32.mrf.mxu0 }
 0x1fb   : > { %4681 = vmatmul.msk.bf16.gmra.mxu2 %vm226_vm1, %v1682_v24  ;;  %v5653_v7 = vadd.f32 %v1356_v44, %v1189_v58  ;;  %v1586_v43 = vpop.f32.mrf.mxu1 }
 0x1fc   : > { %4698 = vmatmul.msk.bf16.gmra.mxu3 %vm226_vm1, %v1904_v9 }
 0x1fd   : > { %4716 = vmatmul.msk.bf16.gmra.mxu0 %vm226_vm1, %v5390_v49  ;;  %v1905_v49 = vpack.c.bf16 %v1876_v6, %v1875_v21 }
 0x1fe   : > { %v915_v2 = vpop.f32.mrf.mxu2 }
 0x1ff   : > { %v1137_v59 = vpop.f32.mrf.mxu3  ;;  %v968_v48 = vadd.f32 %v915_v2, %v5384_v29 }
 0x201   : > { %v1190_v19 = vadd.f32 %v1137_v59, %v968_v48 }
 0x202   : > { %v1366_v23 = vpop.f32.mrf.mxu0 }
 0x203   : > { %v1412_v10 = vadd.f32 %v1359_v55, %v1190_v19  ;;  %v5661_v30 = vpop.f32.mrf.mxu1  ;;  %v1655_v19 = vld [vmem:[#allocation2 + $0x78] sm:$0xff] }
 0x205   : > { %v5658_v62 = vadd.f32 %v1581_v42, %v1412_v10  ;;  %v1656_v10 = vld [vmem:[#allocation2 + $0x80] sm:$0xff] }
 0x206   : > { %v917_v15 = vpop.f32.mrf.mxu2 }
 0x207   : > { %v1139_v44 = vpop.f32.mrf.mxu3  ;;  %v969_v11 = vadd.f32 %v917_v15, %v5388_v46 }
 0x209   : > { %v1191_v24 = vadd.f32 %v1139_v44, %v969_v11  ;;  %v1684_v44 = vpack.c.bf16 %v1656_v10, %v1655_v19  ;;  %v1658_v19 = vld [vmem:[#allocation2 + $0x98] sm:$0xff] }
 0x20a   : > { %v1369_v9 = vpop.f32.mrf.mxu0  ;;  %v1879_v10 = vld [vmem:[#allocation2 + $0x91] sm:$0xff] }
 0x20b   : > { %4682 = vmatmul.msk.bf16.gmra.mxu2 %vm226_vm1, %v1683_v52  ;;  %v5665_v29 = vadd.f32 %v1361_v56, %v1191_v24  ;;  %v1591_v2 = vpop.f32.mrf.mxu1 }
 0x20c   : > { %4699 = vmatmul.msk.bf16.gmra.mxu3 %vm226_vm1, %v1905_v49  ;;  %v6818_v49 = vld [vmem:[#allocation6_spill] sm:$0xff] }
 0x20d   : > { %4717 = vmatmul.msk.bf16.gmra.mxu0 %vm226_vm1, %v5408_v18  ;;  %v1906_v18 = vpack.c.bf16 %v1878_v0, %v1877_v51  ;;  %v1880_v51 = vld [vmem:[#allocation2 + $0x99] sm:$0xff] }
 0x20e   : > { %v920_v55 = vpop.f32.mrf.mxu2 }
 0x20f   : > { %v1142_v42 = vpop.f32.mrf.mxu3  ;;  %v970_v58 = vadd.f32 %v920_v55, %v5402_v63  ;;  %v6819_v55 = vld [vmem:[#allocation4_spill] sm:$0xff] }
 0x211   : > { %v1192_v46 = vadd.f32 %v1142_v42, %v970_v58 }
 0x212   : > { %v1371_v59 = vpop.f32.mrf.mxu0 }
 0x213   : > { %v1414_v48 = vadd.f32 %v1364_v26, %v1192_v46  ;;  %v5677_v26 = vpop.f32.mrf.mxu1 }
 0x214   : > { %6817 = vst [vmem:[#allocation17_spill] sm:$0xff] %v5677_v26 }
 0x215   : > { %v5670_v21 = vadd.f32 %v1586_v43, %v1414_v48  ;;  %v1657_v48 = vld [vmem:[#allocation2 + $0x90] sm:$0xff] }
 0x216   : > { %v922_v6 = vpop.f32.mrf.mxu2 }
 0x217   : > { %v1144_v56 = vpop.f32.mrf.mxu3  ;;  %v971_v15 = vadd.f32 %v922_v6, %v5406_v16 }
 0x219   : > { %v1193_v11 = vadd.f32 %v1144_v56, %v971_v15  ;;  %v6821_v15 = vld [vmem:[#allocation5_spill] sm:$0xff] }
 0x21a   : > { %v1374_v52 = vpop.f32.mrf.mxu0 }
 0x21b   : > { %4683 = vmatmul.msk.bf16.gmra.mxu2 %vm226_vm1, %v1684_v44  ;;  %v5675_v63 = vadd.f32 %v1366_v23, %v1193_v11  ;;  %v1596_v23 = vpop.f32.mrf.mxu1  ;;  %v1907_v11 = vpack.c.bf16 %v1880_v51, %v1879_v10  ;;  %v1659_v10 = vld [vmem:[#allocation2 + $0xa8] sm:$0xff]  ;;  %v1660_v51 = vld [vmem:[#allocation2 + $0xb0] sm:$0xff] }
 0x21c   : > { %4700 = vmatmul.msk.bf16.gmra.mxu3 %vm226_vm1, %v1906_v18  ;;  %v1685_v18 = vpack.c.bf16 %v1658_v19, %v1657_v48 }
 0x21d   : > { %4718 = vmatmul.msk.bf16.gmra.mxu0 %vm226_vm1, %v6818_v49 }
 0x21e   : > { %v925_v43 = vpop.f32.mrf.mxu2 }
 0x21f   : > { %v1147_v24 = vpop.f32.mrf.mxu3  ;;  %v972_v42 = vadd.f32 %v925_v43, %v6819_v55  ;;  %v6823_v43 = vld [vmem:[#allocation9_spill] sm:$0xff]  ;;  %v6824_v55 = vld [vmem:[#allocation7_spill] sm:$0xff] }
 0x221   : > { %v1194_v16 = vadd.f32 %v1147_v24, %v972_v42 }
 0x222   : > { %v1376_v58 = vpop.f32.mrf.mxu0 }
 0x223   : > { %v1416_v46 = vadd.f32 %v1369_v9, %v1194_v16  ;;  %v5692_v16 = vpop.f32.mrf.mxu1 }
 0x224   : > { %6825 = vst [vmem:[#allocation5_spill] sm:$0xff] %v5692_v16 }
 0x225   : > { %v5682_v0 = vadd.f32 %v1591_v2, %v1416_v46 }
 0x226   : > { %v927_v6 = vpop.f32.mrf.mxu2 }
 0x227   : > { %6820 = vst [vmem:[#allocation6_spill] sm:$0xff] %v5682_v0  ;;  %v1149_v56 = vpop.f32.mrf.mxu3  ;;  %v973_v44 = vadd.f32 %v927_v6, %v6821_v15  ;;  %v1881_v6 = vld [vmem:[#allocation2 + $0xa9] sm:$0xff] }
 0x229   : > { %v1195_v49 = vadd.f32 %v1149_v56, %v973_v44  ;;  %v1882_v56 = vld [vmem:[#allocation2 + $0xb1] sm:$0xff] }
 0x22a   : > { %v1379_v26 = vpop.f32.mrf.mxu0 }
 0x22b   : > { %4684 = vmatmul.msk.bf16.gmra.mxu2 %vm226_vm1, %v1685_v18  ;;  %v5687_v9 = vadd.f32 %v1371_v59, %v1195_v49  ;;  %v6827_v18 = vld [vmem:[#allocation8_spill] sm:$0xff]  ;;  %v1686_v49 = vpack.c.bf16 %v1660_v51, %v1659_v10  ;;  %v1601_v0 = vpop.f32.mrf.mxu1 }
 0x22c   : > { %4701 = vmatmul.msk.bf16.gmra.mxu3 %vm226_vm1, %v1907_v11  ;;  %v1661_v51 = vld [vmem:[#allocation2 + $0xc0] sm:$0xff] }
 0x22d   : > { %6822 = vst [vmem:[#allocation4_spill] sm:$0xff] %v5687_v9  ;;  %4719 = vmatmul.msk.bf16.gmra.mxu0 %vm226_vm1, %v6823_v43  ;;  %v1908_v43 = vpack.c.bf16 %v1882_v56, %v1881_v6  ;;  %v1662_v56 = vld [vmem:[#allocation2 + $0xc8] sm:$0xff] }
 0x22e   : > { %v930_v2 = vpop.f32.mrf.mxu2 }
 0x22f   : > { %v1152_v24 = vpop.f32.mrf.mxu3  ;;  %v974_v42 = vadd.f32 %v930_v2, %v6824_v55 }
 0x231   : > { %v1196_v46 = vadd.f32 %v1152_v24, %v974_v42  ;;  %v6829_v24 = vld [vmem:[#allocation12_spill] sm:$0xff]  ;;  %v6830_v42 = vld [vmem:[#allocation10_spill] sm:$0xff] }
 0x232   : > { %v1381_v48 = vpop.f32.mrf.mxu0 }
 0x233   : > { %v1418_v19 = vadd.f32 %v1374_v52, %v1196_v46  ;;  %v5704_v6 = vpop.f32.mrf.mxu1 }
 0x234   : > { %6831 = vst [vmem:[#allocation8_spill] sm:$0xff] %v5704_v6 }
 0x235   : > { %v5694_v15 = vadd.f32 %v1596_v23, %v1418_v19 }
 0x236   : > { %v932_v59 = vpop.f32.mrf.mxu2 }
 0x237   : > { %6826 = vst [vmem:[#allocation9_spill] sm:$0xff] %v5694_v15  ;;  %v1154_v44 = vpop.f32.mrf.mxu3  ;;  %v975_v11 = vadd.f32 %v932_v59, %v6827_v18  ;;  %v1884_v18 = vld [vmem:[#allocation2 + $0xc9] sm:$0xff] }
 0x239   : > { %v1197_v9 = vadd.f32 %v1154_v44, %v975_v11  ;;  %v1883_v44 = vld [vmem:[#allocation2 + $0xc1] sm:$0xff] }
 0x23a   : > { %v1384_v2 = vpop.f32.mrf.mxu0  ;;  %v1909_v16 = vpack.c.bf16 %v1884_v18, %v1883_v44 }
 0x23b   : > { %4685 = vmatmul.msk.bf16.gmra.mxu2 %vm226_vm1, %v1686_v49  ;;  %v5699_v52 = vadd.f32 %v1376_v58, %v1197_v9  ;;  %v6832_v49 = vld [vmem:[#allocation11_spill] sm:$0xff] }
 0x23c   : > { %4702 = vmatmul.msk.bf16.gmra.mxu3 %vm226_vm1, %v1908_v43 }
 0x23d   : > { %6828 = vst [vmem:[#allocation7_spill] sm:$0xff] %v5699_v52  ;;  %4720 = vmatmul.msk.bf16.gmra.mxu0 %vm226_vm1, %v6829_v24  ;;  %v1687_v24 = vpack.c.bf16 %v1662_v56, %v1661_v51 }
 0x23e   : > { %v935_v23 = vpop.f32.mrf.mxu2 }
 0x23f   : > { %v1157_v55 = vpop.f32.mrf.mxu3  ;;  %v976_v46 = vadd.f32 %v935_v23, %v6830_v42  ;;  %v1606_v23 = vpop.f32.mrf.mxu1  ;;  %v6833_v42 = vld [vmem:[#allocation13_spill] sm:$0xff] }
 0x241   : > { %v1198_v19 = vadd.f32 %v1157_v55, %v976_v46 }
 0x242   : > { %v1386_v59 = vpop.f32.mrf.mxu0 }
 0x243   : > { %v1420_v10 = vadd.f32 %v1379_v26, %v1198_v19  ;;  %v2465_v19 = vld [vmem:[#allocation3 + $0x1] sm:$0xff] }
 0x245   : > { %v5706_v11 = vadd.f32 %v1601_v0, %v1420_v10  ;;  %v2466_v10 = vld [vmem:[#allocation3 + $0x9] sm:$0xff] }
 0x246   : > { %v937_v58 = vpop.f32.mrf.mxu2  ;;  %v2497_v56 = vpack.c.bf16 %v2466_v10, %v2465_v19 }
 0x247   : > { %v1159_v9 = vpop.f32.mrf.mxu3  ;;  %v977_v43 = vadd.f32 %v937_v58, %v6832_v49  ;;  %v1663_v58 = vld [vmem:[#allocation2 + $0xd8] sm:$0xff] }
 0x248   : > { %4731 = vmatmul.msk.bf16.vlgmr.msra.gmra.mxu1 %vm226_vm1, %v2497_v56 }
 0x249   : > { %v1199_v52 = vadd.f32 %v1159_v9, %v977_v43  ;;  %v6834_v43 = vld [vmem:[#allocation14_spill] sm:$0xff] }
 0x24a   : > { %v1389_v15 = vpop.f32.mrf.mxu0 }
 0x24b   : > { %4686 = vmatmul.msk.bf16.gmra.mxu2 %vm226_vm1, %v1687_v24  ;;  %v5711_v26 = vadd.f32 %v1381_v48, %v1199_v52  ;;  %v1885_v48 = vld [vmem:[#allocation2 + $0xd9] sm:$0xff]  ;;  %v1886_v52 = vld [vmem:[#allocation2 + $0xe1] sm:$0xff] }
 0x24c   : > { %4703 = vmatmul.msk.bf16.gmra.mxu3 %vm226_vm1, %v1909_v16  ;;  %v1664_v16 = vld [vmem:[#allocation2 + $0xe0] sm:$0xff] }
 0x24d   : > { %4721 = vmatmul.msk.bf16.gmra.mxu0 %vm226_vm1, %v5480_v13  ;;  %v1688_v6 = vpack.c.bf16 %v1664_v16, %v1663_v58  ;;  %v6837_v58 = vld [vmem:[#allocation15_spill] sm:$0xff] }
 0x24e   : > { %v940_v0 = vpop.f32.mrf.mxu2 }
 0x24f   : > { %v1162_v55 = vpop.f32.mrf.mxu3  ;;  %v978_v46 = vadd.f32 %v940_v0, %v6833_v42  ;;  %v1910_v0 = vpack.c.bf16 %v1886_v52, %v1885_v48  ;;  %v5720_v42 = vpop.f32.mrf.mxu1  ;;  %v4780_v52 = vld [vmem:[%s6777_s3 + $0xc] sm:$0xf] }
 0x250   : > { %6835 = vst [vmem:[#allocation12_spill] sm:$0xff] %v5720_v42 }
 0x251   : > { %v1200_v51 = vadd.f32 %v1162_v55, %v978_v46  ;;  %v4763_v46 = vld [vmem:[%s6777_s3 + $0x8] sm:$0xf] }
 0x252   : > { %v1391_v44 = vpop.f32.mrf.mxu0  ;;  %v2894_v10 = vsel %vm527_vm0, %v4763_v46, 0 }
 0x253   : > { %v1422_v18 = vadd.f32 %v1384_v2, %v1200_v51  ;;  %v2464_v2 = vld [vmem:[%s6777_s3] sm:$0xf]  ;;  %2903 = vmatpush.bf16.msrb.mxu3 %v2894_v10 }
 0x255   : > { %v5717_v9 = vadd.f32 %v1606_v23, %v1422_v18  ;;  %v2704_v23 = vsel %vm527_vm0, %v2464_v2, 0  ;;  %v1888_v2 = vld [vmem:[#allocation2 + $0xf9] sm:$0xff] }
 0x256   : > { %v942_v49 = vpop.f32.mrf.mxu2  ;;  %2713 = vmatpush.bf16.msrb.mxu2 %v2704_v23 }
 0x257   : > { %v1164_v13 = vpop.f32.mrf.mxu3  ;;  %v979_v24 = vadd.f32 %v942_v49, %v6834_v43 }
 0x259   : > { %v1201_v55 = vadd.f32 %v1164_v13, %v979_v24  ;;  %v3116_v13 = vsel %vm527_vm0, %v4780_v52, 0  ;;  %v1665_v24 = vld [vmem:[#allocation2 + $0xf0] sm:$0xff] }
 0x25a   : > { %v2203_v19 = vpop.f32.mrf.mxu0  ;;  %3125 = vmatpush.bf16.msrb.mxu0 %v3116_v13  ;;  %v5758_v13 = vld [vmem:[%s6776_s2] ss:$0 sm:$0xff] }
 0x25b   : > { %4687 = vmatmul.msk.bf16.gmra.mxu2 %vm226_vm1, %v1688_v6  ;;  %v5732_v51 = vadd.f32 %v1386_v59, %v1201_v55  ;;  %v4797_v6 = vld [vmem:[%s6777_s3 + $0x10] sm:$0xf]  ;;  %v1611_v59 = vpop.f32.mrf.mxu1 }
 0x25c   : > { %4704 = vmatmul.msk.bf16.gmra.mxu3 %vm226_vm1, %v1910_v0  ;;  %v3338_v43 = vsel %vm527_vm0, %v4797_v6, 0  ;;  %v1666_v0 = vld [vmem:[#allocation2 + $0xf8] sm:$0xff] }
 0x25d   : > { %6836 = vst [vmem:[#allocation10_spill] sm:$0xff] %v5732_v51  ;;  %4722 = vmatmul.msk.bf16.gmra.mxu0 %vm226_vm1, %v5498_v61  ;;  %3347 = vmatpush.bf16.msrb.mxu1 %v3338_v43  ;;  %v1887_v55 = vld [vmem:[#allocation2 + $0xf1] sm:$0xff] }
 0x25e   : > { %v945_v56 = vpop.f32.mrf.mxu2 }
 0x25f   : > { %v1167_v18 = vpop.f32.mrf.mxu3  ;;  %v980_v16 = vadd.f32 %v945_v56, %v6837_v58  ;;  %v6838_v56 = vld [vmem:[#allocation16_spill] sm:$0xff]  ;;  %v1689_v58 = vpack.c.bf16 %v1666_v0, %v1665_v24  ;;  %v1667_v24 = vld [vmem:[#allocation2 + $0x108] sm:$0xff]  ;;  %v1668_v0 = vld [vmem:[#allocation2 + $0x110] sm:$0xff] }
 0x261   : > { %v1202_v48 = vadd.f32 %v1167_v18, %v980_v16  ;;  %v1911_v16 = vpack.c.bf16 %v1888_v2, %v1887_v55  ;;  %v1889_v55 = vld [vmem:[#allocation2 + $0x109] sm:$0xff] }
 0x262   : > { %v2205_v49 = vpop.f32.mrf.mxu0 }
 0x263   : > { %v1424_v61 = vadd.f32 %v1389_v15, %v1202_v48 }
 0x265   : > { %v5745_v46 = vadd.f32 %v1611_v59, %v1424_v61 }
 0x266   : > { %v947_v23 = vpop.f32.mrf.mxu2 }
 0x267   : > { %v1169_v10 = vpop.f32.mrf.mxu3  ;;  %v981_v18 = vadd.f32 %v947_v23, %v6838_v56 }
 0x269   : > { %v1203_v42 = vadd.f32 %v1169_v10, %v981_v18 }
 0x26a   : > { %v2208_v51 = vpop.f32.mrf.mxu0 }
 0x26b   : > { %4688 = vmatmul.msk.bf16.gmra.mxu2 %vm226_vm1, %v1689_v58  ;;  %v5750_v15 = vadd.f32 %v1391_v44, %v1203_v42  ;;  %v1890_v44 = vld [vmem:[#allocation2 + $0x111] sm:$0xff] }
 0x26c   : > { %4705 = vmatmul.msk.bf16.gmra.mxu3 %vm226_vm1, %v1911_v16  ;;  %v1912_v56 = vpack.c.bf16 %v1890_v44, %v1889_v55  ;;  %v1891_v55 = vld [vmem:[#allocation2 + $0x121] sm:$0xff]  ;;  %v1892_v44 = vld [vmem:[#allocation2 + $0x129] sm:$0xff] }
 0x26d   : > { %4723 = vmatmul.msk.bf16.gmra.mxu0 %vm226_vm1, %v5513_v5 }
 0x26e   : > { %v1759_v48 = vpop.f32.mrf.mxu2 }
 0x26f   : > { %v1981_v52 = vpop.f32.mrf.mxu3  ;;  %v1839_v6 = vadd.f32 %v1759_v48, %v5511_v1  ;;  %v1690_v1 = vpack.c.bf16 %v1668_v0, %v1667_v24  ;;  %v1670_v0 = vld [vmem:[#allocation2 + $0x128] sm:$0xff] }
 0x271   : > { %v2061_v59 = vadd.f32 %v1981_v52, %v1839_v6 }
 0x272   : > { %v2210_v43 = vpop.f32.mrf.mxu0 }
 0x273   : > { %v2283_v61 = vadd.f32 %v2203_v19, %v2061_v59 }
 0x275   : > { %v2319_v42 = vadd.f32 %v5758_v13, %v2283_v61 }
 0x276   : > { %v1761_v2 = vpop.f32.mrf.mxu2 }
 0x277   : > { %v1983_v5 = vpop.f32.mrf.mxu3  ;;  %v2351_v23 = vmax.f32 %v2319_v42, 0.0  ;;  %v1840_v10 = vadd.f32 %v1761_v2, %v5519_v47 }
 0x279   : > { %2384 = vst.msk [vmem:[#allocation3 + $0x19] sm:$0xff] %vm226_vm1, %v2351_v23  ;;  %v2062_v18 = vadd.f32 %v1983_v5, %v1840_v10 }
 0x27a   : > { %v2213_v58 = vpop.f32.mrf.mxu0 }
 0x27b   : > { %v2284_v16 = vadd.f32 %v2205_v49, %v2062_v18  ;;  %4689 = vmatmul.msk.bf16.gmra.mxu2 %vm226_vm1, %v1690_v1  ;;  %v1669_v49 = vld [vmem:[#allocation2 + $0x120] sm:$0xff]  ;;  %v1913_v1 = vpack.c.bf16 %v1892_v44, %v1891_v55 }
 0x27c   : > { %4706 = vmatmul.msk.bf16.gmra.mxu3 %vm226_vm1, %v1912_v56  ;;  %v1691_v10 = vpack.c.bf16 %v1670_v0, %v1669_v49  ;;  %v1671_v49 = vld [vmem:[#allocation2 + $0x138] sm:$0xff]  ;;  %v1672_v0 = vld [vmem:[#allocation2 + $0x140] sm:$0xff] }
 0x27d   : > { %v2320_v19 = vadd.f32 %v5758_v13, %v2284_v16  ;;  %4724 = vmatmul.msk.bf16.gmra.mxu0 %vm226_vm1, %v5529_v41  ;;  %v1893_v55 = vld [vmem:[#allocation2 + $0x139] sm:$0xff]  ;;  %v1894_v44 = vld [vmem:[#allocation2 + $0x141] sm:$0xff] }
 0x27e   : > { %v1764_v48 = vpop.f32.mrf.mxu2 }
 0x27f   : > { %v1986_v52 = vpop.f32.mrf.mxu3  ;;  %v2352_v6 = vmax.f32 %v2320_v19, 0.0  ;;  %v1841_v47 = vadd.f32 %v1764_v48, %v5526_v33 }
 0x280   : > { %v2467_v56 = vld [vmem:[#allocation3 + $0x19] sm:$0xff] }
 0x281   : > { %2385 = vst.msk [vmem:[#allocation3 + $0x21] sm:$0xff] %vm226_vm1, %v2352_v6  ;;  %v2063_v59 = vadd.f32 %v1986_v52, %v1841_v47 }
 0x282   : > { %v2215_v61 = vpop.f32.mrf.mxu0 }
 0x283   : > { %v2285_v24 = vadd.f32 %v2208_v51, %v2063_v59 }
 0x285   : > { %v2321_v42 = vadd.f32 %v5758_v13, %v2285_v24 }
 0x286   : > { %v1766_v2 = vpop.f32.mrf.mxu2 }
 0x287   : > { %v1988_v5 = vpop.f32.mrf.mxu3  ;;  %v2353_v23 = vmax.f32 %v2321_v42, 0.0  ;;  %v1842_v41 = vadd.f32 %v1766_v2, %v5535_v22 }
 0x288   : > { %v2468_v33 = vld [vmem:[#allocation3 + $0x21] sm:$0xff] }
 0x289   : > { %2386 = vst.msk [vmem:[#allocation3 + $0x31] sm:$0xff] %vm226_vm1, %v2353_v23  ;;  %v2064_v18 = vadd.f32 %v1988_v5, %v1842_v41  ;;  %v2498_v16 = vpack.c.bf16 %v2468_v33, %v2467_v56  ;;  %v1692_v41 = vpack.c.bf16 %v1672_v0, %v1671_v49  ;;  %v1896_v49 = vld [vmem:[#allocation2 + $0x159] sm:$0xff] }
 0x28a   : > { %v2218_v51 = vpop.f32.mrf.mxu0 }
 0x28b   : > { %v2286_v19 = vadd.f32 %v2210_v43, %v2064_v18  ;;  %4690 = vmatmul.msk.bf16.gmra.mxu2 %vm226_vm1, %v1691_v10  ;;  %4732 = vmatmul.msk.bf16.gmra.mxu1 %vm226_vm1, %v2498_v16  ;;  %v1914_v10 = vpack.c.bf16 %v1894_v44, %v1893_v55 }
 0x28c   : > { %4707 = vmatmul.msk.bf16.gmra.mxu3 %vm226_vm1, %v1913_v1 }
 0x28d   : > { %v2322_v48 = vadd.f32 %v5758_v13, %v2286_v19  ;;  %4725 = vmatmul.msk.bf16.gmra.mxu0 %vm226_vm1, %v5545_v4 }
 0x28e   : > { %v1769_v22 = vpop.f32.mrf.mxu2 }
 0x28f   : > { %v1991_v52 = vpop.f32.mrf.mxu3  ;;  %v2354_v6 = vmax.f32 %v2322_v48, 0.0  ;;  %v1843_v47 = vadd.f32 %v1769_v22, %v5542_v27 }
 0x290   : > { %v2469_v1 = vld [vmem:[#allocation3 + $0x31] sm:$0xff] }
 0x291   : > { %2387 = vst.msk [vmem:[#allocation3 + $0x39] sm:$0xff] %vm226_vm1, %v2354_v6  ;;  %v2065_v59 = vadd.f32 %v1991_v52, %v1843_v47  ;;  %v1673_v47 = vld [vmem:[#allocation2 + $0x150] sm:$0xff] }
 0x292   : > { %v2220_v43 = vpop.f32.mrf.mxu0 }
 0x293   : > { %v2287_v24 = vadd.f32 %v2213_v58, %v2065_v59  ;;  %v1674_v59 = vld [vmem:[#allocation2 + $0x158] sm:$0xff] }
 0x295   : > { %v2323_v42 = vadd.f32 %v5758_v13, %v2287_v24  ;;  %v1895_v24 = vld [vmem:[#allocation2 + $0x151] sm:$0xff] }
 0x296   : > { %v1771_v2 = vpop.f32.mrf.mxu2 }
 0x297   : > { %v1993_v5 = vpop.f32.mrf.mxu3  ;;  %v2355_v23 = vmax.f32 %v2323_v42, 0.0  ;;  %v1844_v4 = vadd.f32 %v1771_v2, %v5551_v28  ;;  %v1693_v2 = vpack.c.bf16 %v1674_v59, %v1673_v47 }
 0x298   : > { %v2470_v27 = vld [vmem:[#allocation3 + $0x39] sm:$0xff] }
 0x299   : > { %2388 = vst.msk [vmem:[#allocation3 + $0x49] sm:$0xff] %vm226_vm1, %v2355_v23  ;;  %v2066_v56 = vadd.f32 %v1993_v5, %v1844_v4  ;;  %v2499_v33 = vpack.c.bf16 %v2470_v27, %v2469_v1  ;;  %v1915_v5 = vpack.c.bf16 %v1896_v49, %v1895_v24 }
 0x29a   : > { %v2223_v58 = vpop.f32.mrf.mxu0 }
 0x29b   : > { %v2288_v18 = vadd.f32 %v2215_v61, %v2066_v56  ;;  %4691 = vmatmul.msk.bf16.gmra.mxu2 %vm226_vm1, %v1692_v41  ;;  %4733 = vmatmul.msk.bf16.gmra.mxu1 %vm226_vm1, %v2499_v33 }
 0x29c   : > { %4708 = vmatmul.msk.bf16.gmra.mxu3 %vm226_vm1, %v1914_v10 }
 0x29d   : > { %v2324_v16 = vadd.f32 %v5758_v13, %v2288_v18  ;;  %4726 = vmatmul.msk.bf16.gmra.mxu0 %vm226_vm1, %v5563_v8 }
 0x29e   : > { %v1774_v28 = vpop.f32.mrf.mxu2 }
 0x29f   : > { %v1996_v19 = vpop.f32.mrf.mxu3  ;;  %v2356_v48 = vmax.f32 %v2324_v16, 0.0  ;;  %v1845_v22 = vadd.f32 %v1774_v28, %v5560_v39  ;;  %v1675_v28 = vld [vmem:[#allocation2 + $0x168] sm:$0xff] }
 0x2a0   : > { %v2471_v23 = vld [vmem:[#allocation3 + $0x49] sm:$0xff] }
 0x2a1   : > { %2389 = vst.msk [vmem:[#allocation3 + $0x51] sm:$0xff] %vm226_vm1, %v2356_v48  ;;  %v2067_v52 = vadd.f32 %v1996_v19, %v1845_v22  ;;  %v1676_v19 = vld [vmem:[#allocation2 + $0x170] sm:$0xff] }
 0x2a2   : > { %v2225_v61 = vpop.f32.mrf.mxu0  ;;  %v1897_v48 = vld [vmem:[#allocation2 + $0x169] sm:$0xff]  ;;  %v1898_v22 = vld [vmem:[#allocation2 + $0x171] sm:$0xff]  ;;  %v1694_v49 = vpack.c.bf16 %v1676_v19, %v1675_v28 }
 0x2a3   : > { %v2289_v6 = vadd.f32 %v2218_v51, %v2067_v52  ;;  %v1625_v52 = vadd.f32 %v5558_v38, %v5591_v53 }
 0x2a5   : > { %v2325_v0 = vadd.f32 %v5758_v13, %v2289_v6 }
 0x2a6   : > { %v1776_v55 = vpop.f32.mrf.mxu2 }
 0x2a7   : > { %v1998_v44 = vpop.f32.mrf.mxu3  ;;  %v2357_v42 = vmax.f32 %v2325_v0, 0.0  ;;  %v1846_v8 = vadd.f32 %v1776_v55, %v5573_v14 }
 0x2a8   : > { %v2472_v39 = vld [vmem:[#allocation3 + $0x51] sm:$0xff] }
 0x2a9   : > { %2390 = vst.msk [vmem:[#allocation3 + $0x61] sm:$0xff] %vm226_vm1, %v2357_v42  ;;  %v2068_v4 = vadd.f32 %v1998_v44, %v1846_v8  ;;  %v2500_v41 = vpack.c.bf16 %v2472_v39, %v2471_v23 }
 0x2aa   : > { %v2228_v51 = vpop.f32.mrf.mxu0 }
 0x2ab   : > { %v2290_v10 = vadd.f32 %v2220_v43, %v2068_v4  ;;  %4692 = vmatmul.msk.bf16.gmra.mxu2 %vm226_vm1, %v1693_v2  ;;  %4734 = vmatmul.msk.bf16.gmra.mxu1 %vm226_vm1, %v2500_v41  ;;  %v1627_v41 = vadd.f32 %v5580_v60, %v5611_v20 }
 0x2ac   : > { %4709 = vmatmul.msk.bf16.gmra.mxu3 %vm226_vm1, %v1915_v5 }
 0x2ad   : > { %v2326_v1 = vadd.f32 %v5758_v13, %v2290_v10  ;;  %4727 = vmatmul.msk.bf16.gmra.mxu0 %vm226_vm1, %v5585_v31 }
 0x2ae   : > { %v1779_v14 = vpop.f32.mrf.mxu2 }
 0x2af   : > { %v2001_v27 = vpop.f32.mrf.mxu3  ;;  %v2358_v56 = vmax.f32 %v2326_v1, 0.0  ;;  %v1847_v33 = vadd.f32 %v1779_v14, %v5582_v34  ;;  %v1916_v34 = vpack.c.bf16 %v1898_v22, %v1897_v48 }
 0x2b0   : > { %v2473_v0 = vld [vmem:[#allocation3 + $0x61] sm:$0xff] }
 0x2b1   : > { %2391 = vst.msk [vmem:[#allocation3 + $0x69] sm:$0xff] %vm226_vm1, %v2358_v56  ;;  %v2069_v18 = vadd.f32 %v2001_v27, %v1847_v33  ;;  %v2123_v27 = vld [vmem:[#allocation2 + $0x19a] sm:$0xff]  ;;  %v2124_v56 = vld [vmem:[#allocation2 + $0x1a2] sm:$0xff] }
 0x2b2   : > { %v2230_v43 = vpop.f32.mrf.mxu0  ;;  %v2140_v19 = vpack.c.bf16 %v2124_v56, %v2123_v27 }
 0x2b3   : > { %v2291_v16 = vadd.f32 %v2223_v58, %v2069_v18 }
 0x2b5   : > { %v2327_v6 = vadd.f32 %v5758_v13, %v2291_v16 }
 0x2b6   : > { %v1781_v31 = vpop.f32.mrf.mxu2 }
 0x2b7   : > { %v2003_v47 = vpop.f32.mrf.mxu3  ;;  %v2359_v59 = vmax.f32 %v2327_v6, 0.0  ;;  %v1848_v24 = vadd.f32 %v1781_v31, %v1625_v52 }
 0x2b8   : > { %v2474_v55 = vld [vmem:[#allocation3 + $0x69] sm:$0xff] }
 0x2b9   : > { %2392 = vst.msk [vmem:[#allocation3 + $0x79] sm:$0xff] %vm226_vm1, %v2359_v59  ;;  %v2070_v58 = vadd.f32 %v2003_v47, %v1848_v24  ;;  %v2501_v44 = vpack.c.bf16 %v2474_v55, %v2473_v0  ;;  %v1679_v47 = vld [vmem:[#allocation2 + $0x198] sm:$0xff]  ;;  %v1680_v59 = vld [vmem:[#allocation2 + $0x1a0] sm:$0xff] }
 0x2ba   : > { %v2233_v42 = vpop.f32.mrf.mxu0  ;;  %v1902_v24 = vld [vmem:[#allocation2 + $0x1a1] sm:$0xff] }
 0x2bb   : > { %v2292_v8 = vadd.f32 %v2225_v61, %v2070_v58  ;;  %4693 = vmatmul.msk.bf16.gmra.mxu2 %vm226_vm1, %v1694_v49  ;;  %4735 = vmatmul.msk.bf16.gmra.mxu1 %vm226_vm1, %v2501_v44  ;;  %v1629_v49 = vadd.f32 %v5598_v3, %v5629_v36 }
 0x2bc   : > { %4710 = vmatmul.msk.bf16.gmra.mxu3 %vm226_vm1, %v1916_v34 }
 0x2bd   : > { %v2328_v38 = vadd.f32 %v5758_v13, %v2292_v8  ;;  %4728 = vmatmul.msk.bf16.gmra.mxu0 %vm226_vm1, %v5605_v50  ;;  %v1696_v8 = vpack.c.bf16 %v1680_v59, %v1679_v47 }
 0x2be   : > { %v1784_v53 = vpop.f32.mrf.mxu2 }
 0x2bf   : > { %v2006_v2 = vpop.f32.mrf.mxu3  ;;  %v2360_v5 = vmax.f32 %v2328_v38, 0.0  ;;  %v1849_v23 = vadd.f32 %v1784_v53, %v5600_v32 }
 0x2c0   : > { %v2475_v18 = vld [vmem:[#allocation3 + $0x79] sm:$0xff] }
 0x2c1   : > { %2393 = vst.msk [vmem:[#allocation3 + $0x81] sm:$0xff] %vm226_vm1, %v2360_v5  ;;  %v2071_v39 = vadd.f32 %v2006_v2, %v1849_v23  ;;  %v3018_v2 = vld [vmem:[#allocation3 + $0x20] sm:$0xff] }
 0x2c2   : > { %v2235_v61 = vpop.f32.mrf.mxu0 }
 0x2c3   : > { %v2293_v4 = vadd.f32 %v2228_v51, %v2071_v39  ;;  %v3017_v39 = vld [vmem:[#allocation3 + $0x18] sm:$0xff] }
 0x2c4   : > { %v5839_v3 = vpack.c.bf16 %v3018_v2, %v3017_v39  ;;  %v2798_v39 = vld [vmem:[#allocation3 + $0x22] sm:$0xff] }
 0x2c5   : > { %v2329_v10 = vadd.f32 %v5758_v13, %v2293_v4 }
 0x2c6   : > { %v1786_v1 = vpop.f32.mrf.mxu2 }
 0x2c7   : > { %v2008_v14 = vpop.f32.mrf.mxu3  ;;  %v2361_v50 = vmax.f32 %v2329_v10, 0.0  ;;  %v1850_v33 = vadd.f32 %v1786_v1, %v1627_v41 }
 0x2c8   : > { %v2476_v16 = vld [vmem:[#allocation3 + $0x81] sm:$0xff] }
 0x2c9   : > { %2394 = vst.msk [vmem:[#allocation3 + $0x91] sm:$0xff] %vm226_vm1, %v2361_v50  ;;  %v2072_v32 = vadd.f32 %v2008_v14, %v1850_v33  ;;  %v5819_v28 = vpack.c.bf16 %v2476_v16, %v2475_v18  ;;  %v2416_v50 = vld [vmem:[#allocation3] sm:$0xff]  ;;  %v2417_v33 = vld [vmem:[#allocation3 + $0x8] sm:$0xff] }
 0x2ca   : > { %v2238_v51 = vpop.f32.mrf.mxu0  ;;  %v2795_v18 = vld [vmem:[#allocation3 + $0x2] sm:$0xff]  ;;  %v2796_v16 = vld [vmem:[#allocation3 + $0xa] sm:$0xff] }
 0x2cb   : > { %v2294_v48 = vadd.f32 %v2230_v43, %v2072_v32  ;;  %4694 = vmatmul.msk.bf16.gmra.mxu2 %vm226_vm1, %v5623_v12  ;;  %4736 = vmatmul.msk.bf16.gmra.mxu1 %vm226_vm1, %v5819_v28  ;;  %v1631_v32 = vadd.f32 %v5618_v40, %v5641_v57 }
 0x2cc   : > { %4711 = vmatmul.msk.bf16.gmra.mxu3 %vm226_vm1, %v5603_v17  ;;  %v1901_v17 = vld [vmem:[#allocation2 + $0x199] sm:$0xff] }
 0x2cd   : > { %v2330_v60 = vadd.f32 %v5758_v13, %v2294_v48  ;;  %4729 = vmatmul.msk.bf16.gmra.mxu0 %vm226_vm1, %v2140_v19 }
 0x2ce   : > { %v1789_v20 = vpop.f32.mrf.mxu2 }
 0x2cf   : > { %v2011_v22 = vpop.f32.mrf.mxu3  ;;  %v2362_v52 = vmax.f32 %v2330_v60, 0.0  ;;  %v1851_v6 = vadd.f32 %v1789_v20, %v5620_v45  ;;  %v1918_v45 = vpack.c.bf16 %v1902_v24, %v1901_v17  ;;  %v3019_v17 = vld [vmem:[#allocation3 + $0x30] sm:$0xff] }
 0x2d0   : > { %v2477_v38 = vld [vmem:[#allocation3 + $0x91] sm:$0xff] }
 0x2d1   : > { %2395 = vst.msk [vmem:[#allocation3 + $0x99] sm:$0xff] %vm226_vm1, %v2362_v52  ;;  %v2073_v43 = vadd.f32 %v2011_v22, %v1851_v6  ;;  %v2448_v52 = vpack.c.bf16 %v2417_v33, %v2416_v50 }
 0x2d2   : > { %v2240_v31 = vpop.f32.mrf.mxu0 }
 0x2d3   : > { %v2295_v12 = vadd.f32 %v2233_v42, %v2073_v43 }
 0x2d5   : > { %v2331_v34 = vadd.f32 %v5758_v13, %v2295_v12  ;;  %v3020_v12 = vld [vmem:[#allocation3 + $0x38] sm:$0xff] }
 0x2d6   : > { %v1791_v0 = vpop.f32.mrf.mxu2  ;;  %v5856_v40 = vpack.c.bf16 %v3020_v12, %v3019_v17 }
 0x2d7   : > { %v2013_v55 = vpop.f32.mrf.mxu3  ;;  %v2363_v58 = vmax.f32 %v2331_v34, 0.0  ;;  %v1852_v44 = vadd.f32 %v1791_v0, %v1629_v49  ;;  %v5863_v0 = vpop.f32.mrf.mxu1 }
 0x2d8   : > { %v2478_v53 = vld [vmem:[#allocation3 + $0x99] sm:$0xff] }
 0x2d9   : > { %2396 = vst.msk [vmem:[#allocation3 + $0xa9] sm:$0xff] %vm226_vm1, %v2363_v58  ;;  %v2074_v42 = vadd.f32 %v2013_v55, %v1852_v44  ;;  %v5835_v5 = vpack.c.bf16 %v2478_v53, %v2477_v38 }
 0x2da   : > { %v2243_v23 = vpop.f32.mrf.mxu0 }
 0x2db   : > { %v2296_v4 = vadd.f32 %v2235_v61, %v2074_v42  ;;  %4695 = vmatmul.msk.bf16.gmra.mxu2 %vm226_vm1, %v1696_v8  ;;  %4737 = vmatmul.msk.bf16.gmra.mxu1 %vm226_vm1, %v5835_v5  ;;  %v2797_v42 = vld [vmem:[#allocation3 + $0x1a] sm:$0xff] }
 0x2dc   : > { %4712 = vmatmul.msk.bf16.gmra.mxu3 %vm226_vm1, %v1918_v45  ;;  %v1633_v45 = vadd.f32 %v5634_v25, %v5653_v7  ;;  %v3021_v7 = vld [vmem:[#allocation3 + $0x48] sm:$0xff] }
 0x2dd   : > { %v2332_v36 = vadd.f32 %v5758_v13, %v2296_v4  ;;  %4781 = vmatmul.msk.bf16.vlgmr.msrb.gmra.mxu0 %vm226_vm1, %v5839_v3 }
 0x2de   : > { %v1794_v41 = vpop.f32.mrf.mxu2 }
 0x2df   : > { %v2016_v10 = vpop.f32.mrf.mxu3  ;;  %v2364_v1 = vmax.f32 %v2332_v36, 0.0  ;;  %v1853_v14 = vadd.f32 %v1794_v41, %v5636_v35  ;;  %v2827_v35 = vpack.c.bf16 %v2796_v16, %v2795_v18  ;;  %v5870_v36 = vpop.f32.mrf.mxu1 }
 0x2e0   : > { %v2479_v6 = vld [vmem:[#allocation3 + $0xa9] sm:$0xff] }
 0x2e1   : > { %2397 = vst.msk [vmem:[#allocation3 + $0xb1] sm:$0xff] %vm226_vm1, %v2364_v1  ;;  %v2075_v61 = vadd.f32 %v2016_v10, %v1853_v14  ;;  %v3022_v1 = vld [vmem:[#allocation3 + $0x50] sm:$0xff] }
 0x2e2   : > { %v2245_v27 = vpop.f32.mrf.mxu0  ;;  %v5881_v50 = vpack.c.bf16 %v3022_v1, %v3021_v7  ;;  %v2801_v1 = vld [vmem:[#allocation3 + $0x4a] sm:$0xff] }
 0x2e3   : > { %v2297_v56 = vadd.f32 %v2238_v51, %v2075_v61  ;;  %v5875_v61 = vpack.c.bf16 %v2798_v39, %v2797_v42 }
 0x2e5   : > { %v2333_v19 = vadd.f32 %v5758_v13, %v2297_v56 }
 0x2e6   : > { %v1796_v48 = vpop.f32.mrf.mxu2 }
 0x2e7   : > { %v2018_v60 = vpop.f32.mrf.mxu3  ;;  %v2365_v20 = vmax.f32 %v2333_v19, 0.0  ;;  %v1854_v22 = vadd.f32 %v1796_v48, %v1631_v32 }
 0x2e8   : > { %v2480_v43 = vld [vmem:[#allocation3 + $0xb1] sm:$0xff] }
 0x2e9   : > { %2398 = vst.msk [vmem:[#allocation3 + $0xc1] sm:$0xff] %vm226_vm1, %v2365_v20  ;;  %v2076_v51 = vadd.f32 %v2018_v60, %v1854_v22  ;;  %v5852_v47 = vpack.c.bf16 %v2480_v43, %v2479_v6  ;;  %v1635_v20 = vadd.f32 %v5646_v37, %v5665_v29  ;;  %v2799_v6 = vld [vmem:[#allocation3 + $0x32] sm:$0xff]  ;;  %v2800_v43 = vld [vmem:[#allocation3 + $0x3a] sm:$0xff] }
 0x2ea   : > { %v2248_v59 = vpop.f32.mrf.mxu0  ;;  %v3023_v29 = vld [vmem:[#allocation3 + $0x60] sm:$0xff] }
 0x2eb   : > { %v2298_v24 = vadd.f32 %v2240_v31, %v2076_v51  ;;  %4747 = vmatmul.msk.bf16.vlgmr.msrb.gmra.mxu2 %vm226_vm1, %v2448_v52  ;;  %4738 = vmatmul.msk.bf16.gmra.mxu1 %vm226_vm1, %v5852_v47 }
 0x2ec   : > { %4764 = vmatmul.msk.bf16.vlgmr.msrb.gmra.mxu3 %vm226_vm1, %v2827_v35 }
 0x2ed   : > { %v2334_v57 = vadd.f32 %v5758_v13, %v2298_v24  ;;  %4782 = vmatmul.msk.bf16.gmra.mxu0 %vm226_vm1, %v5856_v40  ;;  %v3024_v24 = vld [vmem:[#allocation3 + $0x68] sm:$0xff] }
 0x2ee   : > { %v1799_v49 = vpop.f32.mrf.mxu2 }
 0x2ef   : > { %v2021_v34 = vpop.f32.mrf.mxu3  ;;  %v2366_v55 = vmax.f32 %v2334_v57, 0.0  ;;  %v1855_v31 = vadd.f32 %v1799_v49, %v5648_v54 }
 0x2f0   : > { %v2481_v10 = vld [vmem:[#allocation3 + $0xc1] sm:$0xff] }
 0x2f1   : > { %2399 = vst.msk [vmem:[#allocation3 + $0xc9] sm:$0xff] %vm226_vm1, %v2366_v55  ;;  %v2077_v58 = vadd.f32 %v2021_v34, %v1855_v31  ;;  %v5900_v34 = vpack.c.bf16 %v2800_v43, %v2799_v6  ;;  %v5906_v31 = vpack.c.bf16 %v3024_v24, %v3023_v29  ;;  %v6841_v24 = vld [vmem:[#allocation17_spill] sm:$0xff] }
 0x2f2   : > { %v2250_v44 = vpop.f32.mrf.mxu0 }
 0x2f3   : > { %v2299_v8 = vadd.f32 %v2243_v23, %v2077_v58 }
 0x2f5   : > { %v2335_v38 = vadd.f32 %v5758_v13, %v2299_v8 }
 0x2f6   : > { %v1801_v53 = vpop.f32.mrf.mxu2 }
 0x2f7   : > { %v2023_v2 = vpop.f32.mrf.mxu3  ;;  %v2367_v4 = vmax.f32 %v2335_v38, 0.0  ;;  %v1856_v41 = vadd.f32 %v1801_v53, %v1633_v45 }
 0x2f8   : > { %v2482_v54 = vld [vmem:[#allocation3 + $0xc9] sm:$0xff] }
 0x2f9   : > { %2400 = vst.msk [vmem:[#allocation3 + $0xd9] sm:$0xff] %vm226_vm1, %v2367_v4  ;;  %v2078_v14 = vadd.f32 %v2023_v2, %v1856_v41  ;;  %v5873_v23 = vpack.c.bf16 %v2482_v54, %v2481_v10  ;;  %v1637_v4 = vadd.f32 %v5661_v30, %v5675_v63  ;;  %v3025_v63 = vld [vmem:[#allocation3 + $0x78] sm:$0xff] }
 0x2fa   : > { %v2253_v25 = vpop.f32.mrf.mxu0 }
 0x2fb   : > { %v2300_v56 = vadd.f32 %v2245_v27, %v2078_v14  ;;  %4748 = vmatmul.msk.bf16.gmra.mxu2 %vm226_vm1, %v5839_v3  ;;  %4739 = vmatmul.msk.bf16.gmra.mxu1 %vm226_vm1, %v5873_v23  ;;  %v5890_v3 = vpop.f32.mrf.mxu1  ;;  %v2802_v14 = vld [vmem:[#allocation3 + $0x52] sm:$0xff] }
 0x2fc   : > { %4765 = vmatmul.msk.bf16.gmra.mxu3 %vm226_vm1, %v5875_v61 }
 0x2fd   : > { %v2336_v33 = vadd.f32 %v5758_v13, %v2300_v56  ;;  %4783 = vmatmul.msk.bf16.gmra.mxu0 %vm226_vm1, %v5881_v50 }
 0x2fe   : > { %v1804_v18 = vpop.f32.mrf.mxu2 }
 0x2ff   : > { %v2026_v16 = vpop.f32.mrf.mxu3  ;;  %v2368_v32 = vmax.f32 %v2336_v33, 0.0  ;;  %v1857_v27 = vadd.f32 %v1804_v18, %v5658_v62  ;;  %v3026_v18 = vld [vmem:[#allocation3 + $0x80] sm:$0xff] }
 0x300   : > { %v2483_v17 = vld [vmem:[#allocation3 + $0xd9] sm:$0xff] }
 0x301   : > { %2401 = vst.msk [vmem:[#allocation3 + $0xe1] sm:$0xff] %vm226_vm1, %v2368_v32  ;;  %v2079_v19 = vadd.f32 %v2026_v16, %v1857_v27  ;;  %v5925_v27 = vpack.c.bf16 %v2802_v14, %v2801_v1  ;;  %v3027_v14 = vld [vmem:[#allocation3 + $0x90] sm:$0xff] }
 0x302   : > { %v2255_v48 = vpop.f32.mrf.mxu0 }
 0x303   : > { %v2301_v60 = vadd.f32 %v2248_v59, %v2079_v19 }
 0x305   : > { %v2337_v22 = vadd.f32 %v5758_v13, %v2301_v60  ;;  %v5931_v60 = vpack.c.bf16 %v3026_v18, %v3025_v63 }
 0x306   : > { %v1806_v52 = vpop.f32.mrf.mxu2 }
 0x307   : > { %v2028_v35 = vpop.f32.mrf.mxu3  ;;  %v2369_v12 = vmax.f32 %v2337_v22, 0.0  ;;  %v1858_v51 = vadd.f32 %v1806_v52, %v1635_v20 }
 0x308   : > { %v2484_v62 = vld [vmem:[#allocation3 + $0xe1] sm:$0xff]  ;;  %v5896_v49 = vpop.f32.mrf.mxu1 }
 0x309   : > { %2402 = vst.msk [vmem:[#allocation3 + $0xf1] sm:$0xff] %vm226_vm1, %v2369_v12  ;;  %v2080_v57 = vadd.f32 %v2028_v35, %v1858_v51  ;;  %v5898_v59 = vpack.c.bf16 %v2484_v62, %v2483_v17  ;;  %v6840_v62 = vld [vmem:[#allocation4_spill] sm:$0xff] }
 0x30a   : > { %v2258_v37 = vpop.f32.mrf.mxu0 }
 0x30b   : > { %v2302_v55 = vadd.f32 %v2250_v44, %v2080_v57  ;;  %4749 = vmatmul.msk.bf16.gmra.mxu2 %vm226_vm1, %v5856_v40  ;;  %4740 = vmatmul.msk.bf16.gmra.mxu1 %vm226_vm1, %v5898_v59  ;;  %v1639_v57 = vadd.f32 %v6841_v24, %v6840_v62  ;;  %v2805_v24 = vld [vmem:[#allocation3 + $0x7a] sm:$0xff] }
 0x30c   : > { %4766 = vmatmul.msk.bf16.gmra.mxu3 %vm226_vm1, %v5900_v34 }
 0x30d   : > { %v2338_v58 = vadd.f32 %v5758_v13, %v2302_v55  ;;  %4784 = vmatmul.msk.bf16.gmra.mxu0 %vm226_vm1, %v5906_v31 }
 0x30e   : > { %v1809_v8 = vpop.f32.mrf.mxu2 }
 0x30f   : > { %v2031_v45 = vpop.f32.mrf.mxu3  ;;  %v2370_v38 = vmax.f32 %v2338_v58, 0.0  ;;  %v1859_v44 = vadd.f32 %v1809_v8, %v5670_v21  ;;  %v2803_v8 = vld [vmem:[#allocation3 + $0x62] sm:$0xff] }
 0x310   : > { %v5915_v2 = vpop.f32.mrf.mxu1  ;;  %v2485_v33 = vld [vmem:[#allocation3 + $0xf1] sm:$0xff] }
 0x311   : > { %2403 = vst.msk [vmem:[#allocation3 + $0xf9] sm:$0xff] %vm226_vm1, %v2370_v38  ;;  %v2081_v53 = vadd.f32 %v2031_v45, %v1859_v44  ;;  %v2804_v45 = vld [vmem:[#allocation3 + $0x6a] sm:$0xff] }
 0x312   : > { %v2260_v42 = vpop.f32.mrf.mxu0 }
 0x313   : > { %v2303_v39 = vadd.f32 %v2253_v25, %v2081_v53 }
 0x315   : > { %v2339_v41 = vadd.f32 %v5758_v13, %v2303_v39 }
 0x316   : > { %v1811_v10 = vpop.f32.mrf.mxu2 }
 0x317   : > { %v2033_v54 = vpop.f32.mrf.mxu3  ;;  %v2371_v7 = vmax.f32 %v2339_v41, 0.0  ;;  %v1860_v56 = vadd.f32 %v1811_v10, %v1637_v4  ;;  %v3028_v4 = vld [vmem:[#allocation3 + $0x98] sm:$0xff] }
 0x318   : > { %v2486_v21 = vld [vmem:[#allocation3 + $0xf9] sm:$0xff]  ;;  %v5921_v32 = vpop.f32.mrf.mxu1 }
 0x319   : > { %2404 = vst.msk [vmem:[#allocation3 + $0x109] sm:$0xff] %vm226_vm1, %v2371_v7  ;;  %v2082_v16 = vadd.f32 %v2033_v54, %v1860_v56  ;;  %v5923_v25 = vpack.c.bf16 %v2486_v21, %v2485_v33  ;;  %v5950_v54 = vpack.c.bf16 %v2804_v45, %v2803_v8  ;;  %v5956_v56 = vpack.c.bf16 %v3028_v4, %v3027_v14  ;;  %v3030_v45 = vld [vmem:[#allocation3 + $0xb0] sm:$0xff]  ;;  %v3029_v4 = vld [vmem:[#allocation3 + $0xa8] sm:$0xff] }
 0x31a   : > { %v2263_v30 = vpop.f32.mrf.mxu0  ;;  %v5981_v14 = vpack.c.bf16 %v3030_v45, %v3029_v4 }
 0x31b   : > { %v2304_v19 = vadd.f32 %v2255_v48, %v2082_v16  ;;  %4750 = vmatmul.msk.bf16.gmra.mxu2 %vm226_vm1, %v5881_v50  ;;  %4741 = vmatmul.msk.bf16.gmra.mxu1 %vm226_vm1, %v5923_v25  ;;  %v6839_v48 = vld [vmem:[#allocation6_spill] sm:$0xff] }
 0x31c   : > { %4767 = vmatmul.msk.bf16.gmra.mxu3 %vm226_vm1, %v5925_v27  ;;  %6846 = vst [vmem:[#allocation13_spill] sm:$0xff] %v5981_v14 }
 0x31d   : > { %v2340_v20 = vadd.f32 %v5758_v13, %v2304_v19  ;;  %4785 = vmatmul.msk.bf16.gmra.mxu0 %vm226_vm1, %v5931_v60 }
 0x31e   : > { %v1814_v22 = vpop.f32.mrf.mxu2 }
 0x31f   : > { %v2036_v52 = vpop.f32.mrf.mxu3  ;;  %v2372_v35 = vmax.f32 %v2340_v20, 0.0  ;;  %v1861_v6 = vadd.f32 %v1814_v22, %v6839_v48  ;;  %v6844_v48 = vld [vmem:[#allocation5_spill] sm:$0xff] }
 0x320   : > { %v5940_v12 = vpop.f32.mrf.mxu1  ;;  %v2487_v53 = vld [vmem:[#allocation3 + $0x109] sm:$0xff] }
 0x321   : > { %2405 = vst.msk [vmem:[#allocation3 + $0x111] sm:$0xff] %vm226_vm1, %v2372_v35  ;;  %v2083_v43 = vadd.f32 %v2036_v52, %v1861_v6  ;;  %v6843_v35 = vld [vmem:[#allocation7_spill] sm:$0xff] }
 0x322   : > { %v2265_v51 = vpop.f32.mrf.mxu0  ;;  %v1641_v6 = vadd.f32 %v6844_v48, %v6843_v35 }
 0x323   : > { %v2305_v17 = vadd.f32 %v2258_v37, %v2083_v43 }
 0x325   : > { %v2341_v29 = vadd.f32 %v5758_v13, %v2305_v17 }
 0x326   : > { %v1816_v55 = vpop.f32.mrf.mxu2 }
 0x327   : > { %v2038_v58 = vpop.f32.mrf.mxu3  ;;  %v2373_v38 = vmax.f32 %v2341_v29, 0.0  ;;  %v1862_v44 = vadd.f32 %v1816_v55, %v1639_v57  ;;  %v2806_v57 = vld [vmem:[#allocation3 + $0x82] sm:$0xff] }
 0x328   : > { %v2488_v39 = vld [vmem:[#allocation3 + $0x111] sm:$0xff]  ;;  %v5946_v10 = vpop.f32.mrf.mxu1 }
 0x329   : > { %2406 = vst.msk [vmem:[#allocation3 + $0x121] sm:$0xff] %vm226_vm1, %v2373_v38  ;;  %v2084_v41 = vadd.f32 %v2038_v58, %v1862_v44  ;;  %v5948_v37 = vpack.c.bf16 %v2488_v39, %v2487_v53  ;;  %v5975_v53 = vpack.c.bf16 %v2806_v57, %v2805_v24 }
 0x32a   : > { %v2268_v1 = vpop.f32.mrf.mxu0 }
 0x32b   : > { %v2306_v7 = vadd.f32 %v2260_v42, %v2084_v41  ;;  %4751 = vmatmul.msk.bf16.gmra.mxu2 %vm226_vm1, %v5906_v31  ;;  %4742 = vmatmul.msk.bf16.gmra.mxu1 %vm226_vm1, %v5948_v37  ;;  %v6842_v42 = vld [vmem:[#allocation9_spill] sm:$0xff] }
 0x32c   : > { %4768 = vmatmul.msk.bf16.gmra.mxu3 %vm226_vm1, %v5950_v54 }
 0x32d   : > { %v2342_v33 = vadd.f32 %v5758_v13, %v2306_v7  ;;  %4786 = vmatmul.msk.bf16.gmra.mxu0 %vm226_vm1, %v5956_v56 }
 0x32e   : > { %v1819_v21 = vpop.f32.mrf.mxu2 }
 0x32f   : > { %v2041_v18 = vpop.f32.mrf.mxu3  ;;  %v2374_v16 = vmax.f32 %v2342_v33, 0.0  ;;  %v1863_v63 = vadd.f32 %v1819_v21, %v6842_v42 }
 0x330   : > { %v5965_v20 = vpop.f32.mrf.mxu1  ;;  %v2489_v58 = vld [vmem:[#allocation3 + $0x121] sm:$0xff] }
 0x331   : > { %2407 = vst.msk [vmem:[#allocation3 + $0x129] sm:$0xff] %vm226_vm1, %v2374_v16  ;;  %v2085_v19 = vadd.f32 %v2041_v18, %v1863_v63 }
 0x332   : > { %v2270_v22 = vpop.f32.mrf.mxu0 }
 0x333   : > { %v2307_v52 = vadd.f32 %v2263_v30, %v2085_v19 }
 0x335   : > { %v2343_v43 = vadd.f32 %v5758_v13, %v2307_v52  ;;  %v6847_v52 = vld [vmem:[#allocation8_spill] sm:$0xff] }
 0x336   : > { %v1821_v17 = vpop.f32.mrf.mxu2  ;;  %v1643_v35 = vadd.f32 %v6847_v52, %v5711_v26  ;;  %v4831_v52 = vld [vmem:[%s6777_s3 + $0x18] sm:$0xf] }
 0x337   : > { %v2043_v62 = vpop.f32.mrf.mxu3  ;;  %v2375_v29 = vmax.f32 %v2343_v43, 0.0  ;;  %v1864_v55 = vadd.f32 %v1821_v17, %v1641_v6  ;;  %v2807_v17 = vld [vmem:[#allocation3 + $0x92] sm:$0xff] }
 0x338   : > { %v2490_v8 = vld [vmem:[#allocation3 + $0x129] sm:$0xff]  ;;  %v5971_v44 = vpop.f32.mrf.mxu1 }
 0x339   : > { %2408 = vst.msk [vmem:[#allocation3 + $0x139] sm:$0xff] %vm226_vm1, %v2375_v29  ;;  %v2086_v38 = vadd.f32 %v2043_v62, %v1864_v55  ;;  %v5973_v30 = vpack.c.bf16 %v2490_v8, %v2489_v58  ;;  %v2808_v62 = vld [vmem:[#allocation3 + $0x9a] sm:$0xff]  ;;  %v3032_v55 = vld [vmem:[#allocation3 + $0xc8] sm:$0xff] }
 0x33a   : > { %v2273_v39 = vpop.f32.mrf.mxu0  ;;  %v6000_v45 = vpack.c.bf16 %v2808_v62, %v2807_v17  ;;  %v6852_v17 = vld [vmem:[#allocation12_spill] sm:$0xff] }
 0x33b   : > { %6845 = vst [vmem:[#allocation11_spill] sm:$0xff] %v5973_v30  ;;  %v2308_v41 = vadd.f32 %v2265_v51, %v2086_v38  ;;  %4752 = vmatmul.msk.bf16.gmra.mxu2 %vm226_vm1, %v5931_v60  ;;  %4743 = vmatmul.msk.bf16.gmra.mxu1 %vm226_vm1, %v5973_v30  ;;  %v3031_v38 = vld [vmem:[#allocation3 + $0xc0] sm:$0xff] }
 0x33c   : > { %4769 = vmatmul.msk.bf16.gmra.mxu3 %vm226_vm1, %v5975_v53  ;;  %6849 = vst [vmem:[#allocation15_spill] sm:$0xff] %v6000_v45 }
 0x33d   : > { %v2344_v7 = vadd.f32 %v5758_v13, %v2308_v41  ;;  %4787 = vmatmul.msk.bf16.gmra.mxu0 %vm226_vm1, %v5981_v14  ;;  %v6008_v41 = vpack.c.bf16 %v3032_v55, %v3031_v38  ;;  %v2810_v55 = vld [vmem:[#allocation3 + $0xb2] sm:$0xff] }
 0x33e   : > { %v1824_v33 = vpop.f32.mrf.mxu2 }
 0x33f   : > { %v2046_v21 = vpop.f32.mrf.mxu3  ;;  %v2376_v18 = vmax.f32 %v2344_v7, 0.0  ;;  %v1865_v51 = vadd.f32 %v1824_v33, %v5706_v11  ;;  %6850 = vst [vmem:[#allocation16_spill] sm:$0xff] %v6008_v41 }
 0x340   : > { %v5990_v42 = vpop.f32.mrf.mxu1  ;;  %v2491_v29 = vld [vmem:[#allocation3 + $0x139] sm:$0xff] }
 0x341   : > { %2409 = vst.msk [vmem:[#allocation3 + $0x141] sm:$0xff] %vm226_vm1, %v2376_v18  ;;  %v2087_v16 = vadd.f32 %v2046_v21, %v1865_v51 }
 0x342   : > { %v2275_v63 = vpop.f32.mrf.mxu0 }
 0x343   : > { %v2309_v19 = vadd.f32 %v2268_v1, %v2087_v16 }
 0x345   : > { %v2345_v48 = vadd.f32 %v5758_v13, %v2309_v19  ;;  %v4814_v19 = vld [vmem:[%s6777_s3 + $0x14] sm:$0xf] }
 0x346   : > { %v1826_v6 = vpop.f32.mrf.mxu2 }
 0x347   : > { %v2048_v43 = vpop.f32.mrf.mxu3  ;;  %v2377_v24 = vmax.f32 %v2345_v48, 0.0  ;;  %v1866_v57 = vadd.f32 %v1826_v6, %v1643_v35  ;;  %v3560_v48 = vsel %vm527_vm0, %v4814_v19, 0  ;;  %v3783_v6 = vsel %vm527_vm0, %v4831_v52, 0  ;;  %v3033_v52 = vld [vmem:[#allocation3 + $0xd8] sm:$0xff] }
 0x348   : > { %v2492_v11 = vld [vmem:[#allocation3 + $0x141] sm:$0xff]  ;;  %v5996_v8 = vpop.f32.mrf.mxu1  ;;  %3569 = vmatpush.bf16.msra.mxu2 %v3560_v48  ;;  %3792 = vmatpush.bf16.msra.mxu3 %v3783_v6 }
 0x349   : > { %2410 = vst.msk [vmem:[#allocation3 + $0x151] sm:$0xff] %vm226_vm1, %v2377_v24  ;;  %v2088_v58 = vadd.f32 %v2048_v43, %v1866_v57  ;;  %v5998_v1 = vpack.c.bf16 %v2492_v11, %v2491_v29  ;;  %v6851_v43 = vld [vmem:[#allocation10_spill] sm:$0xff]  ;;  %v2809_v11 = vld [vmem:[#allocation3 + $0xaa] sm:$0xff] }
 0x34a   : > { %v6002_v26 = vpop.f32.mrf.mxu0  ;;  %v1645_v62 = vadd.f32 %v6852_v17, %v6851_v43  ;;  %v4865_v43 = vld [vmem:[%s6777_s3 + $0x20] sm:$0xf] }
 0x34b   : > { %6848 = vst [vmem:[#allocation14_spill] sm:$0xff] %v5998_v1  ;;  %v2310_v4 = vadd.f32 %v2270_v22, %v2088_v58  ;;  %4753 = vmatmul.msk.bf16.gmra.mxu2 %vm226_vm1, %v5956_v56  ;;  %4744 = vmatmul.msk.bf16.gmra.mxu1 %vm226_vm1, %v5998_v1 }
 0x34c   : > { %4770 = vmatmul.msk.bf16.gmra.mxu3 %vm226_vm1, %v6000_v45 }
 0x34d   : > { %v2346_v7 = vadd.f32 %v5758_v13, %v2310_v4  ;;  %4788 = vmatmul.msk.bf16.gmra.mxu0 %vm226_vm1, %v6008_v41 }
 0x34e   : > { %v1829_v33 = vpop.f32.mrf.mxu2 }
 0x34f   : > { %v2051_v21 = vpop.f32.mrf.mxu3  ;;  %v2378_v18 = vmax.f32 %v2346_v7, 0.0  ;;  %v1867_v22 = vadd.f32 %v1829_v33, %v5717_v9  ;;  %v3034_v33 = vld [vmem:[#allocation3 + $0xe0] sm:$0xff] }
 0x350   : > { %v6017_v16 = vpop.f32.mrf.mxu1  ;;  %v2493_v4 = vld [vmem:[#allocation3 + $0x151] sm:$0xff] }
 0x351   : > { %2411 = vst.msk [vmem:[#allocation3 + $0x159] sm:$0xff] %vm226_vm1, %v2378_v18  ;;  %v2089_v51 = vadd.f32 %v2051_v21, %v1867_v22  ;;  %v6037_v22 = vpack.c.bf16 %v2810_v55, %v2809_v11 }
 0x352   : > { %v6025_v35 = vpop.f32.mrf.mxu0 }
 0x353   : > { %v2311_v9 = vadd.f32 %v2273_v39, %v2089_v51  ;;  %6854 = vst [vmem:[#allocation4_spill] sm:$0xff] %v6037_v22  ;;  %v4848_v51 = vld [vmem:[%s6777_s3 + $0x1c] sm:$0xf] }
 0x354   : > { %v4005_v48 = vsel %vm527_vm0, %v4848_v51, 0  ;;  %v2811_v51 = vld [vmem:[#allocation3 + $0xc2] sm:$0xff] }
 0x355   : > { %v2347_v24 = vadd.f32 %v5758_v13, %v2311_v9  ;;  %v6047_v9 = vpack.c.bf16 %v3034_v33, %v3033_v52  ;;  %4014 = vmatpush.bf16.msra.mxu0 %v4005_v48  ;;  %v2812_v52 = vld [vmem:[#allocation3 + $0xca] sm:$0xff] }
 0x356   : > { %v1831_v57 = vpop.f32.mrf.mxu2 }
 0x357   : > { %v2053_v29 = vpop.f32.mrf.mxu3  ;;  %v2379_v58 = vmax.f32 %v2347_v24, 0.0  ;;  %v1868_v38 = vadd.f32 %v1831_v57, %v1645_v62  ;;  %6855 = vst [vmem:[#allocation17_spill] sm:$0xff] %v6047_v9 }
 0x358   : > { %v2494_v7 = vld [vmem:[#allocation3 + $0x159] sm:$0xff]  ;;  %v6033_v39 = vpop.f32.mrf.mxu1 }
 0x359   : > { %2412 = vst.msk [vmem:[#allocation3 + $0x169] sm:$0xff] %vm226_vm1, %v2379_v58  ;;  %v2090_v21 = vadd.f32 %v2053_v29, %v1868_v38  ;;  %v6035_v18 = vpack.c.bf16 %v2494_v7, %v2493_v4  ;;  %v1647_v4 = vadd.f32 %v5863_v0, %v5750_v15 }
 0x35a   : > { %v3127_v19 = vpop.f32.mrf.mxu0 }
 0x35b   : > { %6853 = vst [vmem:[#allocation6_spill] sm:$0xff] %v6035_v18  ;;  %v2312_v6 = vadd.f32 %v2275_v63, %v2090_v21  ;;  %4754 = vmatmul.msk.bf16.gmra.mxu2 %vm226_vm1, %v5981_v14  ;;  %4745 = vmatmul.msk.bf16.gmra.mxu1 %vm226_vm1, %v6035_v18  ;;  %v4227_v63 = vsel %vm527_vm0, %v4865_v43, 0 }
 0x35c   : > { %4771 = vmatmul.msk.bf16.gmra.mxu3 %vm226_vm1, %v6037_v22  ;;  %4236 = vmatpush.bf16.msra.mxu1 %v4227_v63 }
 0x35d   : > { %v2348_v17 = vadd.f32 %v5758_v13, %v2312_v6  ;;  %4789 = vmatmul.msk.bf16.gmra.mxu0 %vm226_vm1, %v6047_v9 }
 0x35e   : > { %v1834_v62 = vpop.f32.mrf.mxu2 }
 0x35f   : > { %v2056_v24 = vpop.f32.mrf.mxu3  ;;  %v2380_v57 = vmax.f32 %v2348_v17, 0.0  ;;  %v1869_v29 = vadd.f32 %v1834_v62, %v5745_v46  ;;  %v3036_v17 = vld [vmem:[#allocation3 + $0xf8] sm:$0xff] }
 0x360   : > { %v6060_v55 = vpop.f32.mrf.mxu1  ;;  %v2495_v46 = vld [vmem:[#allocation3 + $0x169] sm:$0xff] }
 0x361   : > { %2413 = vst.msk [vmem:[#allocation3 + $0x171] sm:$0xff] %vm226_vm1, %v2380_v57  ;;  %v2091_v11 = vadd.f32 %v2056_v24, %v1869_v29  ;;  %v6071_v24 = vpack.c.bf16 %v2812_v52, %v2811_v51  ;;  %v4899_v29 = vld [vmem:[%s6776_s2] ss:$0 sm:$0xff] }
 0x362   : > { %v3129_v58 = vpop.f32.mrf.mxu0 }
 0x363   : > { %v2313_v38 = vadd.f32 %v6002_v26, %v2091_v11  ;;  %6857 = vst [vmem:[#allocation7_spill] sm:$0xff] %v6071_v24 }
 0x365   : > { %v2349_v7 = vadd.f32 %v5758_v13, %v2313_v38  ;;  %v3035_v13 = vld [vmem:[#allocation3 + $0xf0] sm:$0xff] }
 0x366   : > { %v1836_v33 = vpop.f32.mrf.mxu2  ;;  %v6078_v57 = vpack.c.bf16 %v3036_v17, %v3035_v13  ;;  %v3038_v13 = vld [vmem:[#allocation3 + $0x110] sm:$0xff] }
 0x367   : > { %v2058_v21 = vpop.f32.mrf.mxu3  ;;  %v2381_v48 = vmax.f32 %v2349_v7, 0.0  ;;  %v1870_v6 = vadd.f32 %v1836_v33, %v1647_v4 }
 0x368   : > { %v2496_v43 = vld [vmem:[#allocation3 + $0x171] sm:$0xff]  ;;  %v6067_v62 = vpop.f32.mrf.mxu1  ;;  %6858 = vst [vmem:[#allocation5_spill] sm:$0xff] %v6078_v57 }
 0x369   : > { %2414 = vst.msk [vmem:[#allocation3 + $0x181] sm:$0xff] %vm226_vm1, %v2381_v48  ;;  %v2092_v63 = vadd.f32 %v2058_v21, %v1870_v6  ;;  %v6069_v26 = vpack.c.bf16 %v2496_v43, %v2495_v46  ;;  %v2813_v46 = vld [vmem:[#allocation3 + $0xda] sm:$0xff]  ;;  %v2814_v43 = vld [vmem:[#allocation3 + $0xe2] sm:$0xff] }
 0x36a   : > { %v3132_v15 = vpop.f32.mrf.mxu0 }
 0x36b   : > { %6856 = vst [vmem:[#allocation9_spill] sm:$0xff] %v6069_v26  ;;  %v2314_v0 = vadd.f32 %v6025_v35, %v2092_v63  ;;  %4755 = vmatmul.msk.bf16.gmra.mxu2 %vm226_vm1, %v6008_v41  ;;  %4746 = vmatmul.msk.bf16.gmra.mxu1 %vm226_vm1, %v6069_v26  ;;  %v3240_v63 = vld [vmem:[#allocation3 + $0x21] sm:$0xff] }
 0x36c   : > { %4772 = vmatmul.msk.bf16.gmra.mxu3 %vm226_vm1, %v6071_v24 }
 0x36d   : > { %v2350_v11 = vadd.f32 %v4899_v29, %v2314_v0  ;;  %4790 = vmatmul.msk.bf16.gmra.mxu0 %vm226_vm1, %v6078_v57 }
 0x36e   : > { %v2715_v35 = vpop.f32.mrf.mxu2 }
 0x36f   : > { %v2905_v38 = vpop.f32.mrf.mxu3  ;;  %v2382_v4 = vmax.f32 %v2350_v11, 0.0  ;;  %v2716_v7 = vadd.f32 %v2715_v35, %v5870_v36  ;;  %v6096_v36 = vpack.c.bf16 %v2814_v43, %v2813_v46  ;;  %v3239_v11 = vld [vmem:[#allocation3 + $0x19] sm:$0xff] }
 0x370   : > { %v6089_v21 = vpop.f32.mrf.mxu1  ;;  %v3271_v35 = vpack.c.bf16 %v3240_v63, %v3239_v11  ;;  %v2815_v11 = vld [vmem:[#allocation3 + $0xf2] sm:$0xff] }
 0x371   : > { %2415 = vst.msk [vmem:[#allocation3 + $0x189] sm:$0xff] %vm226_vm1, %v2382_v4  ;;  %v2985_v33 = vadd.f32 %v2905_v38, %v2716_v7  ;;  %v3037_v4 = vld [vmem:[#allocation3 + $0x108] sm:$0xff] }
 0x372   : > { %v3134_v51 = vpop.f32.mrf.mxu0  ;;  %6859 = vst [vmem:[#allocation8_spill] sm:$0xff] %v6096_v36 }
 0x373   : > { %v6091_v52 = vadd.f32 %v3127_v19, %v2985_v33  ;;  %v6102_v19 = vpack.c.bf16 %v3038_v13, %v3037_v4  ;;  %v3040_v4 = vld [vmem:[#allocation3 + $0x128] sm:$0xff] }
 0x375   : > { %6860 = vst [vmem:[#allocation10_spill] sm:$0xff] %v6102_v19 }
 0x376   : > { %v2717_v48 = vpop.f32.mrf.mxu2 }
 0x377   : > { %v2907_v6 = vpop.f32.mrf.mxu3  ;;  %v2718_v17 = vadd.f32 %v2717_v48, %v5890_v3 }
 0x378   : > { %v6094_v29 = vpop.f32.mrf.mxu1 }
 0x379   : > { %v2986_v0 = vadd.f32 %v2907_v6, %v2718_v17 }
 0x37a   : > { %v3137_v38 = vpop.f32.mrf.mxu0 }
 0x37b   : > { %4756 = vmatmul.msk.bf16.gmra.mxu2 %vm226_vm1, %v6047_v9  ;;  %v6104_v3 = vadd.f32 %v3129_v58, %v2986_v0  ;;  %4798 = vmatmul.msk.bf16.vlgmr.msrb.gmra.mxu1 %vm226_vm1, %v3271_v35  ;;  %v2816_v58 = vld [vmem:[#allocation3 + $0xfa] sm:$0xff] }
 0x37c   : > { %4773 = vmatmul.msk.bf16.gmra.mxu3 %vm226_vm1, %v6096_v36  ;;  %v3242_v35 = vld [vmem:[#allocation3 + $0x39] sm:$0xff]  ;;  %v6117_v9 = vpack.c.bf16 %v2816_v58, %v2815_v11 }
 0x37d   : > { %4791 = vmatmul.msk.bf16.gmra.mxu0 %vm226_vm1, %v6102_v19 }
 0x37e   : > { %v2720_v7 = vpop.f32.mrf.mxu2  ;;  %6861 = vst [vmem:[#allocation12_spill] sm:$0xff] %v6117_v9 }
 0x37f   : > { %v2910_v33 = vpop.f32.mrf.mxu3  ;;  %v2721_v48 = vadd.f32 %v2720_v7, %v5896_v49  ;;  %v3241_v49 = vld [vmem:[#allocation3 + $0x31] sm:$0xff] }
 0x380   : > { %v6110_v46 = vpop.f32.mrf.mxu1  ;;  %v6119_v7 = vpack.c.bf16 %v3242_v35, %v3241_v49 }
 0x381   : > { %v2987_v6 = vadd.f32 %v2910_v33, %v2721_v48  ;;  %v3039_v48 = vld [vmem:[#allocation3 + $0x120] sm:$0xff] }
 0x382   : > { %v3139_v43 = vpop.f32.mrf.mxu0 }
 0x383   : > { %v6112_v17 = vadd.f32 %v3132_v15, %v2987_v6  ;;  %v6125_v15 = vpack.c.bf16 %v3040_v4, %v3039_v48 }
 0x385   : > { %6862 = vst [vmem:[#allocation18_spill] sm:$0xff] %v6125_v15 }
 0x386   : > { %v2722_v63 = vpop.f32.mrf.mxu2 }
 0x387   : > { %v2912_v13 = vpop.f32.mrf.mxu3  ;;  %v2723_v0 = vadd.f32 %v2722_v63, %v5915_v2 }
 0x388   : > { %v6115_v26 = vpop.f32.mrf.mxu1 }
 0x389   : > { %v2988_v36 = vadd.f32 %v2912_v13, %v2723_v0 }
 0x38a   : > { %v3142_v33 = vpop.f32.mrf.mxu0 }
 0x38b   : > { %4757 = vmatmul.msk.bf16.gmra.mxu2 %vm226_vm1, %v6078_v57  ;;  %v6127_v2 = vadd.f32 %v3134_v51, %v2988_v36  ;;  %4799 = vmatmul.msk.bf16.gmra.mxu1 %vm226_vm1, %v6119_v7  ;;  %v2817_v51 = vld [vmem:[#allocation3 + $0x10a] sm:$0xff]  ;;  %v2818_v36 = vld [vmem:[#allocation3 + $0x112] sm:$0xff]  ;;  %v3042_v57 = vld [vmem:[#allocation3 + $0x140] sm:$0xff] }
 0x38c   : > { %4774 = vmatmul.msk.bf16.gmra.mxu3 %vm226_vm1, %v6117_v9  ;;  %v3244_v9 = vld [vmem:[#allocation3 + $0x51] sm:$0xff]  ;;  %v6141_v41 = vpack.c.bf16 %v2818_v36, %v2817_v51 }
 0x38d   : > { %4792 = vmatmul.msk.bf16.gmra.mxu0 %vm226_vm1, %v6125_v15 }
 0x38e   : > { %v2725_v6 = vpop.f32.mrf.mxu2  ;;  %6863 = vst [vmem:[#allocation19_spill] sm:$0xff] %v6141_v41 }
 0x38f   : > { %v2915_v63 = vpop.f32.mrf.mxu3  ;;  %v2726_v13 = vadd.f32 %v2725_v6, %v5921_v32  ;;  %v3243_v32 = vld [vmem:[#allocation3 + $0x49] sm:$0xff] }
 0x390   : > { %v6134_v58 = vpop.f32.mrf.mxu1  ;;  %v6143_v6 = vpack.c.bf16 %v3244_v9, %v3243_v32 }
 0x391   : > { %v2989_v11 = vadd.f32 %v2915_v63, %v2726_v13  ;;  %v3041_v13 = vld [vmem:[#allocation3 + $0x138] sm:$0xff] }
 0x392   : > { %v3144_v0 = vpop.f32.mrf.mxu0 }
 0x393   : > { %v6136_v35 = vadd.f32 %v3137_v38, %v2989_v11  ;;  %v6149_v38 = vpack.c.bf16 %v3042_v57, %v3041_v13 }
 0x395   : > { %6864 = vst [vmem:[#allocation20_spill] sm:$0xff] %v6149_v38 }
 0x396   : > { %v2727_v4 = vpop.f32.mrf.mxu2 }
 0x397   : > { %v2917_v49 = vpop.f32.mrf.mxu3  ;;  %v2728_v48 = vadd.f32 %v2727_v4, %v5940_v12 }
 0x398   : > { %v6139_v18 = vpop.f32.mrf.mxu1 }
 0x399   : > { %v2990_v24 = vadd.f32 %v2917_v49, %v2728_v48 }
 0x39a   : > { %v3147_v63 = vpop.f32.mrf.mxu0 }
 0x39b   : > { %4758 = vmatmul.msk.bf16.gmra.mxu2 %vm226_vm1, %v6102_v19  ;;  %v6151_v12 = vadd.f32 %v3139_v43, %v2990_v24  ;;  %4800 = vmatmul.msk.bf16.gmra.mxu1 %vm226_vm1, %v6143_v6  ;;  %v2819_v24 = vld [vmem:[#allocation3 + $0x122] sm:$0xff]  ;;  %v2820_v43 = vld [vmem:[#allocation3 + $0x12a] sm:$0xff]  ;;  %v3044_v19 = vld [vmem:[#allocation3 + $0x158] sm:$0xff] }
 0x39c   : > { %4775 = vmatmul.msk.bf16.gmra.mxu3 %vm226_vm1, %v6141_v41  ;;  %v3246_v41 = vld [vmem:[#allocation3 + $0x69] sm:$0xff]  ;;  %v6165_v14 = vpack.c.bf16 %v2820_v43, %v2819_v24 }
 0x39d   : > { %4793 = vmatmul.msk.bf16.gmra.mxu0 %vm226_vm1, %v6149_v38 }
 0x39e   : > { %v2730_v9 = vpop.f32.mrf.mxu2  ;;  %6865 = vst [vmem:[#allocation21_spill] sm:$0xff] %v6165_v14 }
 0x39f   : > { %v2920_v11 = vpop.f32.mrf.mxu3  ;;  %v2731_v4 = vadd.f32 %v2730_v9, %v5946_v10  ;;  %v3245_v10 = vld [vmem:[#allocation3 + $0x61] sm:$0xff] }
 0x3a0   : > { %v6158_v51 = vpop.f32.mrf.mxu1  ;;  %v6167_v9 = vpack.c.bf16 %v3246_v41, %v3245_v10 }
 0x3a1   : > { %v2991_v49 = vadd.f32 %v2920_v11, %v2731_v4  ;;  %v3043_v4 = vld [vmem:[#allocation3 + $0x150] sm:$0xff] }
 0x3a2   : > { %v3149_v36 = vpop.f32.mrf.mxu0 }
 0x3a3   : > { %v6160_v48 = vadd.f32 %v3142_v33, %v2991_v49  ;;  %v6173_v33 = vpack.c.bf16 %v3044_v19, %v3043_v4 }
 0x3a6   : > { %v2732_v57 = vpop.f32.mrf.mxu2 }
 0x3a7   : > { %v2922_v32 = vpop.f32.mrf.mxu3  ;;  %v2733_v13 = vadd.f32 %v2732_v57, %v5965_v20 }
 0x3a8   : > { %v6163_v1 = vpop.f32.mrf.mxu1 }
 0x3a9   : > { %v2992_v22 = vadd.f32 %v2922_v32, %v2733_v13 }
 0x3aa   : > { %v3152_v11 = vpop.f32.mrf.mxu0 }
 0x3ab   : > { %4759 = vmatmul.msk.bf16.gmra.mxu2 %vm226_vm1, %v6125_v15  ;;  %v6175_v20 = vadd.f32 %v3144_v0, %v2992_v22  ;;  %4801 = vmatmul.msk.bf16.gmra.mxu1 %vm226_vm1, %v6167_v9  ;;  %v2821_v22 = vld [vmem:[#allocation3 + $0x13a] sm:$0xff]  ;;  %v2822_v0 = vld [vmem:[#allocation3 + $0x142] sm:$0xff] }
 0x3ac   : > { %4776 = vmatmul.msk.bf16.gmra.mxu3 %vm226_vm1, %v6165_v14  ;;  %v3046_v14 = vld [vmem:[#allocation3 + $0x170] sm:$0xff] }
 0x3ad   : > { %6866 = vst [vmem:[#allocation22_spill] sm:$0xff] %v6175_v20  ;;  %4794 = vmatmul.msk.bf16.gmra.mxu0 %vm226_vm1, %v6173_v33  ;;  %v6189_v20 = vpack.c.bf16 %v2822_v0, %v2821_v22 }
 0x3ae   : > { %v2735_v41 = vpop.f32.mrf.mxu2 }
 0x3af   : > { %v2925_v49 = vpop.f32.mrf.mxu3  ;;  %v2736_v57 = vadd.f32 %v2735_v41, %v5971_v44  ;;  %6867 = vst [vmem:[#allocation23_spill] sm:$0xff] %v6189_v20  ;;  %v3045_v44 = vld [vmem:[#allocation3 + $0x168] sm:$0xff] }
 0x3b0   : > { %v6182_v24 = vpop.f32.mrf.mxu1 }
 0x3b1   : > { %v2993_v32 = vadd.f32 %v2925_v49, %v2736_v57 }
 0x3b2   : > { %v3154_v43 = vpop.f32.mrf.mxu0 }
 0x3b3   : > { %v6184_v13 = vadd.f32 %v3147_v63, %v2993_v32  ;;  %v6195_v63 = vpack.c.bf16 %v3046_v14, %v3045_v44 }
 0x3b6   : > { %v2737_v19 = vpop.f32.mrf.mxu2 }
 0x3b7   : > { %v2927_v10 = vpop.f32.mrf.mxu3  ;;  %v2738_v4 = vadd.f32 %v2737_v19, %v5990_v42 }
 0x3b8   : > { %v6187_v45 = vpop.f32.mrf.mxu1 }
 0x3b9   : > { %v2994_v15 = vadd.f32 %v2927_v10, %v2738_v4 }
 0x3ba   : > { %v3157_v30 = vpop.f32.mrf.mxu0 }
 0x3bb   : > { %4760 = vmatmul.msk.bf16.gmra.mxu2 %vm226_vm1, %v6149_v38  ;;  %v6197_v41 = vadd.f32 %v3149_v36, %v2994_v15  ;;  %4802 = vmatmul.msk.bf16.gmra.mxu1 %vm226_vm1, %v5819_v28  ;;  %v2823_v15 = vld [vmem:[#allocation3 + $0x152] sm:$0xff]  ;;  %v2824_v36 = vld [vmem:[#allocation3 + $0x15a] sm:$0xff]  ;;  %v3048_v28 = vld [vmem:[#allocation3 + $0x188] sm:$0xff] }
 0x3bc   : > { %4777 = vmatmul.msk.bf16.gmra.mxu3 %vm226_vm1, %v6189_v20  ;;  %v6211_v38 = vpack.c.bf16 %v2824_v36, %v2823_v15 }
 0x3bd   : > { %6868 = vst [vmem:[#allocation24_spill] sm:$0xff] %v6197_v41  ;;  %4795 = vmatmul.msk.bf16.gmra.mxu0 %vm226_vm1, %v6195_v63 }
 0x3be   : > { %v2740_v42 = vpop.f32.mrf.mxu2  ;;  %6869 = vst [vmem:[#allocation25_spill] sm:$0xff] %v6211_v38 }
 0x3bf   : > { %v2930_v49 = vpop.f32.mrf.mxu3  ;;  %v2741_v57 = vadd.f32 %v2740_v42, %v5996_v8  ;;  %v3047_v8 = vld [vmem:[#allocation3 + $0x180] sm:$0xff] }
 0x3c0   : > { %v6204_v19 = vpop.f32.mrf.mxu1 }
 0x3c1   : > { %v2995_v32 = vadd.f32 %v2930_v49, %v2741_v57 }
 0x3c2   : > { %v3159_v10 = vpop.f32.mrf.mxu0 }
 0x3c3   : > { %v6206_v22 = vadd.f32 %v3152_v11, %v2995_v32  ;;  %v6217_v11 = vpack.c.bf16 %v3048_v28, %v3047_v8  ;;  %v2826_v28 = vld [vmem:[#allocation3 + $0x172] sm:$0xff] }
 0x3c5   : > { %6870 = vst [vmem:[#allocation26_spill] sm:$0xff] %v6217_v11 }
 0x3c6   : > { %v2742_v14 = vpop.f32.mrf.mxu2 }
 0x3c7   : > { %v2932_v0 = vpop.f32.mrf.mxu3  ;;  %v2743_v4 = vadd.f32 %v2742_v14, %v6017_v16 }
 0x3c8   : > { %v6209_v20 = vpop.f32.mrf.mxu1 }
 0x3c9   : > { %v2996_v44 = vadd.f32 %v2932_v0, %v2743_v4 }
 0x3ca   : > { %v3162_v41 = vpop.f32.mrf.mxu0 }
 0x3cb   : > { %4761 = vmatmul.msk.bf16.gmra.mxu2 %vm226_vm1, %v6173_v33  ;;  %v6219_v42 = vadd.f32 %v3154_v43, %v2996_v44  ;;  %4803 = vmatmul.msk.bf16.gmra.mxu1 %vm226_vm1, %v5835_v5  ;;  %v2825_v43 = vld [vmem:[#allocation3 + $0x16a] sm:$0xff] }
 0x3cc   : > { %4778 = vmatmul.msk.bf16.gmra.mxu3 %vm226_vm1, %v6211_v38 }
 0x3cd   : > { %4796 = vmatmul.msk.bf16.gmra.mxu0 %vm226_vm1, %v6217_v11  ;;  %v6233_v11 = vpack.c.bf16 %v2826_v28, %v2825_v43 }
 0x3ce   : > { %v2745_v16 = vpop.f32.mrf.mxu2 }
 0x3cf   : > { %v2935_v49 = vpop.f32.mrf.mxu3  ;;  %v2746_v57 = vadd.f32 %v2745_v16, %v6033_v39 }
 0x3d0   : > { %v6226_v14 = vpop.f32.mrf.mxu1 }
 0x3d1   : > { %v2997_v32 = vadd.f32 %v2935_v49, %v2746_v57 }
 0x3d2   : > { %v3164_v0 = vpop.f32.mrf.mxu0 }
 0x3d3   : > { %v6228_v15 = vadd.f32 %v3157_v30, %v2997_v32 }
 0x3d6   : > { %v2747_v36 = vpop.f32.mrf.mxu2 }
 0x3d7   : > { %v2937_v4 = vpop.f32.mrf.mxu3  ;;  %v2748_v44 = vadd.f32 %v2747_v36, %v6060_v55 }
 0x3d8   : > { %v6231_v8 = vpop.f32.mrf.mxu1 }
 0x3d9   : > { %v2998_v5 = vadd.f32 %v2937_v4, %v2748_v44 }
 0x3da   : > { %v3167_v38 = vpop.f32.mrf.mxu0 }
 0x3db   : > { %4762 = vmatmul.msk.bf16.gmra.mxu2 %vm226_vm1, %v6195_v63  ;;  %v6239_v30 = vadd.f32 %v3159_v10, %v2998_v5  ;;  %4804 = vmatmul.msk.bf16.gmra.mxu1 %vm226_vm1, %v5852_v47 }
 0x3dc   : > { %4779 = vmatmul.msk.bf16.gmra.mxu3 %vm226_vm1, %v6233_v11 }
 0x3dd   : > { %4849 = vmatmul.msk.bf16.vlgmr.msra.gmra.mxu0 %vm226_vm1, %v6119_v7 }
 0x3de   : > { %v2750_v39 = vpop.f32.mrf.mxu2 }
 0x3df   : > { %v2940_v55 = vpop.f32.mrf.mxu3  ;;  %v2751_v16 = vadd.f32 %v2750_v39, %v6067_v62 }
 0x3e0   : > { %v6246_v57 = vpop.f32.mrf.mxu1 }
 0x3e1   : > { %v2999_v49 = vadd.f32 %v2940_v55, %v2751_v16 }
 0x3e2   : > { %v3169_v32 = vpop.f32.mrf.mxu0 }
 0x3e3   : > { %v6248_v36 = vadd.f32 %v3162_v41, %v2999_v49 }
 0x3e6   : > { %v2752_v4 = vpop.f32.mrf.mxu2 }
 0x3e7   : > { %v2942_v43 = vpop.f32.mrf.mxu3  ;;  %v2753_v10 = vadd.f32 %v2752_v4, %v6089_v21 }
 0x3e8   : > { %v6251_v44 = vpop.f32.mrf.mxu1 }
 0x3e9   : > { %v3000_v28 = vadd.f32 %v2942_v43, %v2753_v10 }
 0x3ea   : > { %v3172_v47 = vpop.f32.mrf.mxu0 }
 0x3eb   : > { %4815 = vmatmul.msk.bf16.vlgmr.msra.gmra.mxu2 %vm226_vm1, %v5875_v61  ;;  %v6257_v62 = vadd.f32 %v3164_v0, %v3000_v28  ;;  %4805 = vmatmul.msk.bf16.gmra.mxu1 %vm226_vm1, %v5873_v23 }
 0x3ec   : > { %4832 = vmatmul.msk.bf16.vlgmr.msra.gmra.mxu3 %vm226_vm1, %v5856_v40 }
 0x3ed   : > { %4850 = vmatmul.msk.bf16.gmra.mxu0 %vm226_vm1, %v6143_v6 }
 0x3ee   : > { %v2755_v7 = vpop.f32.mrf.mxu2 }
 0x3ef   : > { %v2945_v21 = vpop.f32.mrf.mxu3  ;;  %v2756_v41 = vadd.f32 %v2755_v7, %v6094_v29 }
 0x3f0   : > { %v6264_v39 = vpop.f32.mrf.mxu1 }
 0x3f1   : > { %v3001_v5 = vadd.f32 %v2945_v21, %v2756_v41 }
 0x3f2   : > { %v3174_v55 = vpop.f32.mrf.mxu0 }
 0x3f3   : > { %v6266_v61 = vadd.f32 %v3167_v38, %v3001_v5 }
 0x3f6   : > { %v2757_v16 = vpop.f32.mrf.mxu2 }
 0x3f7   : > { %v2947_v40 = vpop.f32.mrf.mxu3  ;;  %v2758_v0 = vadd.f32 %v2757_v16, %v6110_v46 }
 0x3f8   : > { %v3349_v4 = vpop.f32.mrf.mxu1 }
 0x3f9   : > { %v3002_v49 = vadd.f32 %v2947_v40, %v2758_v0  ;;  %v6270_v23 = vadd.f32 %v3349_v4, %v6091_v52 }
 0x3fa   : > { %v3177_v6 = vpop.f32.mrf.mxu0 }
 0x3fb   : > { %4816 = vmatmul.msk.bf16.gmra.mxu2 %vm226_vm1, %v5900_v34  ;;  %v6276_v29 = vadd.f32 %v3169_v32, %v3002_v49  ;;  %4806 = vmatmul.msk.bf16.gmra.mxu1 %vm226_vm1, %v5898_v59  ;;  %v3913_v59 = vld [vmem:[#allocation3 + $0x81] sm:$0xff] }
 0x3fc   : > { %4833 = vmatmul.msk.bf16.gmra.mxu3 %vm226_vm1, %v5881_v50 }
 0x3fd   : > { %4851 = vmatmul.msk.bf16.gmra.mxu0 %vm226_vm1, %v6167_v9 }
 0x3fe   : > { %v2760_v46 = vpop.f32.mrf.mxu2 }
 0x3ff   : > { %v2950_v38 = vpop.f32.mrf.mxu3  ;;  %v2761_v52 = vadd.f32 %v2760_v46, %v6115_v26  ;;  %v3912_v26 = vld [vmem:[#allocation3 + $0x79] sm:$0xff] }
 0x400   : > { %v3351_v10 = vpop.f32.mrf.mxu1 }
 0x401   : > { %v3003_v43 = vadd.f32 %v2950_v38, %v2761_v52  ;;  %v6284_v28 = vadd.f32 %v3351_v10, %v6104_v3  ;;  %v3941_v3 = vpack.c.bf16 %v3913_v59, %v3912_v26  ;;  %v3915_v52 = vld [vmem:[#allocation3 + $0x99] sm:$0xff] }
 0x402   : > { %v3179_v34 = vpop.f32.mrf.mxu0 }
 0x403   : > { %v6286_v7 = vadd.f32 %v3172_v47, %v3003_v43 }
 0x406   : > { %v2762_v50 = vpop.f32.mrf.mxu2 }
 0x407   : > { %v2952_v32 = vpop.f32.mrf.mxu3  ;;  %v2763_v21 = vadd.f32 %v2762_v50, %v6134_v58 }
 0x408   : > { %v3354_v5 = vpop.f32.mrf.mxu1 }
 0x409   : > { %v3004_v41 = vadd.f32 %v2952_v32, %v2763_v21  ;;  %v6290_v9 = vadd.f32 %v3354_v5, %v6112_v17 }
 0x40a   : > { %v3182_v16 = vpop.f32.mrf.mxu0 }
 0x40b   : > { %4817 = vmatmul.msk.bf16.gmra.mxu2 %vm226_vm1, %v5925_v27  ;;  %v6296_v47 = vadd.f32 %v3174_v55, %v3004_v41  ;;  %4807 = vmatmul.msk.bf16.gmra.mxu1 %vm226_vm1, %v5923_v25 }
 0x40c   : > { %4834 = vmatmul.msk.bf16.gmra.mxu3 %vm226_vm1, %v5906_v31 }
 0x40d   : > { %4852 = vmatmul.msk.bf16.gmra.mxu0 %vm226_vm1, %v3941_v3  ;;  %v3917_v3 = vld [vmem:[#allocation3 + $0xb1] sm:$0xff] }
 0x40e   : > { %v2765_v58 = vpop.f32.mrf.mxu2 }
 0x40f   : > { %v2955_v40 = vpop.f32.mrf.mxu3  ;;  %v2766_v17 = vadd.f32 %v2765_v58, %v6139_v18  ;;  %v3914_v18 = vld [vmem:[#allocation3 + $0x91] sm:$0xff] }
 0x410   : > { %v3356_v49 = vpop.f32.mrf.mxu1 }
 0x411   : > { %v3005_v0 = vadd.f32 %v2955_v40, %v2766_v17  ;;  %v6303_v4 = vadd.f32 %v3356_v49, %v6127_v2  ;;  %v3942_v2 = vpack.c.bf16 %v3915_v52, %v3914_v18  ;;  %v3919_v18 = vld [vmem:[#allocation3 + $0xc9] sm:$0xff] }
 0x412   : > { %v3184_v27 = vpop.f32.mrf.mxu0 }
 0x413   : > { %v6305_v46 = vadd.f32 %v3177_v6, %v3005_v0  ;;  %v6871_v0 = vld [vmem:[#allocation11_spill] sm:$0xff] }
 0x416   : > { %v2767_v31 = vpop.f32.mrf.mxu2 }
 0x417   : > { %v2957_v55 = vpop.f32.mrf.mxu3  ;;  %v2768_v38 = vadd.f32 %v2767_v31, %v6158_v51 }
 0x418   : > { %v3359_v43 = vpop.f32.mrf.mxu1 }
 0x419   : > { %v3006_v25 = vadd.f32 %v2957_v55, %v2768_v38  ;;  %v6309_v10 = vadd.f32 %v3359_v43, %v6136_v35  ;;  %v6872_v38 = vld [vmem:[#allocation22_spill] sm:$0xff] }
 0x41a   : > { %v3187_v50 = vpop.f32.mrf.mxu0 }
 0x41b   : > { %4818 = vmatmul.msk.bf16.gmra.mxu2 %vm226_vm1, %v5950_v54  ;;  %v6315_v6 = vadd.f32 %v3179_v34, %v3006_v25  ;;  %4808 = vmatmul.msk.bf16.gmra.mxu1 %vm226_vm1, %v5948_v37 }
 0x41c   : > { %4835 = vmatmul.msk.bf16.gmra.mxu3 %vm226_vm1, %v5931_v60 }
 0x41d   : > { %4853 = vmatmul.msk.bf16.gmra.mxu0 %vm226_vm1, %v3942_v2 }
 0x41e   : > { %v2770_v51 = vpop.f32.mrf.mxu2 }
 0x41f   : > { %v2960_v32 = vpop.f32.mrf.mxu3  ;;  %v2771_v35 = vadd.f32 %v2770_v51, %v6163_v1  ;;  %v3916_v1 = vld [vmem:[#allocation3 + $0xa9] sm:$0xff] }
 0x420   : > { %v3361_v59 = vpop.f32.mrf.mxu1 }
 0x421   : > { %v3007_v21 = vadd.f32 %v2960_v32, %v2771_v35  ;;  %v6322_v41 = vadd.f32 %v3361_v59, %v6151_v12  ;;  %v3943_v12 = vpack.c.bf16 %v3917_v3, %v3916_v1  ;;  %v3918_v35 = vld [vmem:[#allocation3 + $0xc1] sm:$0xff] }
 0x422   : > { %v3189_v54 = vpop.f32.mrf.mxu0 }
 0x423   : > { %v6324_v5 = vadd.f32 %v3182_v16, %v3007_v21  ;;  %v6874_v21 = vld [vmem:[#allocation13_spill] sm:$0xff] }
 0x426   : > { %v2772_v60 = vpop.f32.mrf.mxu2 }
 0x427   : > { %v2962_v34 = vpop.f32.mrf.mxu3  ;;  %v2773_v26 = vadd.f32 %v2772_v60, %v6182_v24 }
 0x428   : > { %v3364_v58 = vpop.f32.mrf.mxu1 }
 0x429   : > { %v3008_v37 = vadd.f32 %v2962_v34, %v2773_v26  ;;  %v6328_v40 = vadd.f32 %v3364_v58, %v6160_v48  ;;  %v6875_v34 = vld [vmem:[#allocation14_spill] sm:$0xff]  ;;  %v6876_v58 = vld [vmem:[#allocation24_spill] sm:$0xff] }
 0x42a   : > { %v3192_v17 = vpop.f32.mrf.mxu0 }
 0x42b   : > { %4819 = vmatmul.msk.bf16.gmra.mxu2 %vm226_vm1, %v5975_v53  ;;  %v6334_v16 = vadd.f32 %v3184_v27, %v3008_v37  ;;  %4809 = vmatmul.msk.bf16.gmra.mxu1 %vm226_vm1, %v6871_v0 }
 0x42c   : > { %4836 = vmatmul.msk.bf16.gmra.mxu3 %vm226_vm1, %v5956_v56 }
 0x42d   : > { %4854 = vmatmul.msk.bf16.gmra.mxu0 %vm226_vm1, %v3943_v12 }
 0x42e   : > { %v2775_v24 = vpop.f32.mrf.mxu2 }
 0x42f   : > { %v2965_v49 = vpop.f32.mrf.mxu3  ;;  %v2776_v48 = vadd.f32 %v2775_v24, %v6187_v45  ;;  %v6873_v45 = vld [vmem:[#allocation15_spill] sm:$0xff] }
 0x430   : > { %v3366_v55 = vpop.f32.mrf.mxu1 }
 0x431   : > { %v3009_v31 = vadd.f32 %v2965_v49, %v2776_v48  ;;  %v6341_v52 = vadd.f32 %v3366_v55, %v6872_v38  ;;  %v3921_v48 = vld [vmem:[#allocation3 + $0xe1] sm:$0xff] }
 0x432   : > { %v3194_v53 = vpop.f32.mrf.mxu0 }
 0x433   : > { %v6343_v25 = vadd.f32 %v3187_v50, %v3009_v31  ;;  %v3944_v50 = vpack.c.bf16 %v3919_v18, %v3918_v35  ;;  %v6879_v18 = vld [vmem:[#allocation6_spill] sm:$0xff] }
 0x436   : > { %v2777_v56 = vpop.f32.mrf.mxu2 }
 0x437   : > { %v2967_v27 = vpop.f32.mrf.mxu3  ;;  %v2778_v43 = vadd.f32 %v2777_v56, %v6204_v19  ;;  %v3920_v56 = vld [vmem:[#allocation3 + $0xd9] sm:$0xff] }
 0x438   : > { %v3369_v51 = vpop.f32.mrf.mxu1 }
 0x439   : > { %v3010_v2 = vadd.f32 %v2967_v27, %v2778_v43  ;;  %v6347_v32 = vadd.f32 %v3369_v51, %v6184_v13  ;;  %v6878_v27 = vld [vmem:[#allocation16_spill] sm:$0xff] }
 0x43a   : > { %v3197_v59 = vpop.f32.mrf.mxu0 }
 0x43b   : > { %4820 = vmatmul.msk.bf16.gmra.mxu2 %vm226_vm1, %v6873_v45  ;;  %v6353_v60 = vadd.f32 %v3189_v54, %v3010_v2  ;;  %4810 = vmatmul.msk.bf16.gmra.mxu1 %vm226_vm1, %v6875_v34 }
 0x43c   : > { %4837 = vmatmul.msk.bf16.gmra.mxu3 %vm226_vm1, %v6874_v21 }
 0x43d   : > { %4855 = vmatmul.msk.bf16.gmra.mxu0 %vm226_vm1, %v3944_v50 }
 0x43e   : > { %v2780_v19 = vpop.f32.mrf.mxu2 }
 0x43f   : > { %v2970_v26 = vpop.f32.mrf.mxu3  ;;  %v2781_v13 = vadd.f32 %v2780_v19, %v6209_v20  ;;  %v6877_v20 = vld [vmem:[#allocation4_spill] sm:$0xff] }
 0x440   : > { %v3371_v37 = vpop.f32.mrf.mxu1 }
 0x441   : > { %v3011_v3 = vadd.f32 %v2970_v26, %v2781_v13  ;;  %v6360_v1 = vadd.f32 %v3371_v37, %v6876_v58  ;;  %v3923_v26 = vld [vmem:[#allocation3 + $0xf9] sm:$0xff] }
 0x442   : > { %v3199_v0 = vpop.f32.mrf.mxu0 }
 0x443   : > { %v6362_v12 = vadd.f32 %v3192_v17, %v3011_v3  ;;  %v3945_v17 = vpack.c.bf16 %v3921_v48, %v3920_v56 }
 0x446   : > { %v2782_v24 = vpop.f32.mrf.mxu2 }
 0x447   : > { %v2972_v54 = vpop.f32.mrf.mxu3  ;;  %v2783_v49 = vadd.f32 %v2782_v24, %v6226_v14  ;;  %v6880_v24 = vld [vmem:[#allocation7_spill] sm:$0xff] }
 0x448   : > { %v3374_v55 = vpop.f32.mrf.mxu1 }
 0x449   : > { %v3012_v31 = vadd.f32 %v2972_v54, %v2783_v49  ;;  %v6366_v38 = vadd.f32 %v3374_v55, %v6206_v22  ;;  %v6881_v54 = vld [vmem:[#allocation17_spill] sm:$0xff] }
 0x44a   : > { %v3202_v51 = vpop.f32.mrf.mxu0  ;;  %v6882_v49 = vld [vmem:[#allocation9_spill] sm:$0xff] }
 0x44b   : > { %4821 = vmatmul.msk.bf16.gmra.mxu2 %vm226_vm1, %v6877_v20  ;;  %v6372_v43 = vadd.f32 %v3194_v53, %v3012_v31  ;;  %4811 = vmatmul.msk.bf16.gmra.mxu1 %vm226_vm1, %v6879_v18 }
 0x44c   : > { %4838 = vmatmul.msk.bf16.gmra.mxu3 %vm226_vm1, %v6878_v27 }
 0x44d   : > { %4856 = vmatmul.msk.bf16.gmra.mxu0 %vm226_vm1, %v3945_v17 }
 0x44e   : > { %v2785_v14 = vpop.f32.mrf.mxu2 }
 0x44f   : > { %v2975_v2 = vpop.f32.mrf.mxu3  ;;  %v2786_v22 = vadd.f32 %v2785_v14, %v6231_v8  ;;  %v3922_v8 = vld [vmem:[#allocation3 + $0xf1] sm:$0xff]  ;;  %v3270_v14 = vld [vmem:[#allocation3 + $0x189] sm:$0xff] }
 0x450   : > { %v3376_v45 = vpop.f32.mrf.mxu1 }
 0x451   : > { %v3013_v35 = vadd.f32 %v2975_v2, %v2786_v22  ;;  %v6379_v21 = vadd.f32 %v3376_v45, %v6219_v42  ;;  %v3946_v42 = vpack.c.bf16 %v3923_v26, %v3922_v8  ;;  %v3925_v2 = vld [vmem:[#allocation3 + $0x111] sm:$0xff]  ;;  %v3269_v45 = vld [vmem:[#allocation3 + $0x181] sm:$0xff] }
 0x452   : > { %v3204_v37 = vpop.f32.mrf.mxu0 }
 0x453   : > { %v6381_v50 = vadd.f32 %v3197_v59, %v3013_v35 }
 0x456   : > { %v2787_v34 = vpop.f32.mrf.mxu2 }
 0x457   : > { %v2977_v53 = vpop.f32.mrf.mxu3  ;;  %v2788_v19 = vadd.f32 %v2787_v34, %v6246_v57 }
 0x458   : > { %v3379_v3 = vpop.f32.mrf.mxu1 }
 0x459   : > { %v3014_v13 = vadd.f32 %v2977_v53, %v2788_v19  ;;  %v6385_v58 = vadd.f32 %v3379_v3, %v6228_v15  ;;  %v3924_v53 = vld [vmem:[#allocation3 + $0x109] sm:$0xff] }
 0x45a   : > { %v4016_v20 = vpop.f32.mrf.mxu0  ;;  %v3947_v19 = vpack.c.bf16 %v3925_v2, %v3924_v53  ;;  %v6885_v2 = vld [vmem:[#allocation12_spill] sm:$0xff] }
 0x45b   : > { %4822 = vmatmul.msk.bf16.gmra.mxu2 %vm226_vm1, %v6880_v24  ;;  %v6391_v59 = vadd.f32 %v3199_v0, %v3014_v13  ;;  %4812 = vmatmul.msk.bf16.gmra.mxu1 %vm226_vm1, %v6882_v49 }
 0x45c   : > { %4839 = vmatmul.msk.bf16.gmra.mxu3 %vm226_vm1, %v6881_v54 }
 0x45d   : > { %4857 = vmatmul.msk.bf16.gmra.mxu0 %vm226_vm1, %v3946_v42 }
 0x45e   : > { %v2790_v57 = vpop.f32.mrf.mxu2 }
 0x45f   : > { %v2980_v48 = vpop.f32.mrf.mxu3  ;;  %v2791_v15 = vadd.f32 %v2790_v57, %v6251_v44  ;;  %v6406_v44 = vpack.c.bf16 %v3270_v14, %v3269_v45  ;;  %v3926_v14 = vld [vmem:[#allocation3 + $0x121] sm:$0xff] }
 0x460   : > { %v3381_v55 = vpop.f32.mrf.mxu1 }
 0x461   : > { %v3015_v31 = vadd.f32 %v2980_v48, %v2791_v15  ;;  %v6398_v56 = vadd.f32 %v3381_v55, %v6239_v30  ;;  %v6883_v30 = vld [vmem:[#allocation8_spill] sm:$0xff] }
 0x462   : > { %v4128_v15 = vld [vmem:[#allocation3 + $0x32] sm:$0xff]  ;;  %v3927_v55 = vld [vmem:[#allocation3 + $0x129] sm:$0xff] }
 0x463   : > { %v6400_v27 = vadd.f32 %v3202_v51, %v3015_v31  ;;  %v6884_v51 = vld [vmem:[#allocation5_spill] sm:$0xff] }
 0x464   : > { %v4129_v31 = vld [vmem:[#allocation3 + $0x3a] sm:$0xff] }
 0x466   : > { %v2792_v17 = vpop.f32.mrf.mxu2 }
 0x467   : > { %v2982_v0 = vpop.f32.mrf.mxu3  ;;  %v2793_v18 = vadd.f32 %v2792_v17, %v6264_v39  ;;  %v4018_v39 = vpop.f32.mrf.mxu0 }
 0x468   : > { %v3384_v35 = vpop.f32.mrf.mxu1 }
 0x469   : > { %v3016_v22 = vadd.f32 %v2982_v0, %v2793_v18  ;;  %v6404_v34 = vadd.f32 %v3384_v35, %v6248_v36 }
 0x46b   : > { %4823 = vmatmul.msk.bf16.gmra.mxu2 %vm226_vm1, %v6883_v30  ;;  %v6412_v26 = vadd.f32 %v3204_v37, %v3016_v22  ;;  %4813 = vmatmul.msk.bf16.gmra.mxu1 %vm226_vm1, %v6406_v44 }
 0x46c   : > { %4840 = vmatmul.msk.bf16.gmra.mxu3 %vm226_vm1, %v6884_v51 }
 0x46d   : > { %4858 = vmatmul.msk.bf16.gmra.mxu0 %vm226_vm1, %v3947_v19 }
 0x46e   : > { %v3571_v36 = vpop.f32.mrf.mxu2 }
 0x46f   : > { %v3794_v13 = vpop.f32.mrf.mxu3  ;;  %v3651_v3 = vadd.f32 %v3571_v36, %v6270_v23  ;;  %v4021_v57 = vpop.f32.mrf.mxu0  ;;  %v4160_v23 = vpack.c.bf16 %v4129_v31, %v4128_v15  ;;  %v3928_v15 = vld [vmem:[#allocation3 + $0x139] sm:$0xff] }
 0x470   : > { %v3386_v24 = vpop.f32.mrf.mxu1 }
 0x471   : > { %v3874_v8 = vadd.f32 %v3794_v13, %v3651_v3  ;;  %v6419_v54 = vadd.f32 %v3386_v24, %v6257_v62  ;;  %v6886_v62 = vld [vmem:[#allocation10_spill] sm:$0xff]  ;;  %v4130_v3 = vld [vmem:[#allocation3 + $0x4a] sm:$0xff] }
 0x472   : > { %v3929_v24 = vld [vmem:[#allocation3 + $0x141] sm:$0xff] }
 0x473   : > { %v6421_v42 = vadd.f32 %v4016_v20, %v3874_v8  ;;  %v3948_v20 = vpack.c.bf16 %v3927_v55, %v3926_v14  ;;  %v4131_v8 = vld [vmem:[#allocation3 + $0x52] sm:$0xff]  ;;  %v6887_v55 = vld [vmem:[#allocation19_spill] sm:$0xff] }
 0x476   : > { %v3573_v49 = vpop.f32.mrf.mxu2 }
 0x477   : > { %v3796_v37 = vpop.f32.mrf.mxu3  ;;  %v3652_v48 = vadd.f32 %v3573_v49, %v6284_v28  ;;  %v4023_v45 = vpop.f32.mrf.mxu0 }
 0x478   : > { %v3389_v0 = vpop.f32.mrf.mxu1 }
 0x479   : > { %v3875_v17 = vadd.f32 %v3796_v37, %v3652_v48  ;;  %v6425_v18 = vadd.f32 %v3389_v0, %v6266_v61 }
 0x47b   : > { %4824 = vmatmul.msk.bf16.gmra.mxu2 %vm226_vm1, %v6885_v2  ;;  %v6431_v22 = vadd.f32 %v4018_v39, %v3875_v17  ;;  %4866 = vmatmul.msk.bf16.vlgmr.msra.gmra.mxu1 %vm226_vm1, %v4160_v23 }
 0x47c   : > { %4841 = vmatmul.msk.bf16.gmra.mxu3 %vm226_vm1, %v6886_v62 }
 0x47d   : > { %4859 = vmatmul.msk.bf16.gmra.mxu0 %vm226_vm1, %v3948_v20 }
 0x47e   : > { %v3576_v28 = vpop.f32.mrf.mxu2 }
 0x47f   : > { %v3799_v35 = vpop.f32.mrf.mxu3  ;;  %v3653_v61 = vadd.f32 %v3576_v28, %v6290_v9  ;;  %v4161_v9 = vpack.c.bf16 %v4131_v8, %v4130_v3  ;;  %v4026_v31 = vpop.f32.mrf.mxu0  ;;  %v3930_v3 = vld [vmem:[#allocation3 + $0x151] sm:$0xff] }
 0x480   : > { %v3391_v30 = vpop.f32.mrf.mxu1  ;;  %v6889_v8 = vld [vmem:[#allocation21_spill] sm:$0xff] }
 0x481   : > { %v3876_v53 = vadd.f32 %v3799_v35, %v3653_v61  ;;  %v6437_v51 = vadd.f32 %v3391_v30, %v6276_v29  ;;  %v6888_v29 = vld [vmem:[#allocation18_spill] sm:$0xff] }
 0x482   : > { %v3931_v30 = vld [vmem:[#allocation3 + $0x159] sm:$0xff] }
 0x483   : > { %v6439_v19 = vadd.f32 %v4021_v57, %v3876_v53  ;;  %v3949_v57 = vpack.c.bf16 %v3929_v24, %v3928_v15  ;;  %v4133_v53 = vld [vmem:[#allocation3 + $0x6a] sm:$0xff]  ;;  %v3950_v24 = vpack.c.bf16 %v3931_v30, %v3930_v3 }
 0x486   : > { %v3578_v36 = vpop.f32.mrf.mxu2 }
 0x487   : > { %v3801_v13 = vpop.f32.mrf.mxu3  ;;  %v3654_v39 = vadd.f32 %v3578_v36, %v6303_v4  ;;  %v4028_v20 = vpop.f32.mrf.mxu0 }
 0x488   : > { %v3394_v37 = vpop.f32.mrf.mxu1 }
 0x489   : > { %v3877_v49 = vadd.f32 %v3801_v13, %v3654_v39  ;;  %v6443_v48 = vadd.f32 %v3394_v37, %v6286_v7 }
 0x48b   : > { %4825 = vmatmul.msk.bf16.gmra.mxu2 %vm226_vm1, %v6887_v55  ;;  %v6449_v17 = vadd.f32 %v4023_v45, %v3877_v49  ;;  %4867 = vmatmul.msk.bf16.gmra.mxu1 %vm226_vm1, %v4161_v9  ;;  %v4132_v45 = vld [vmem:[#allocation3 + $0x62] sm:$0xff] }
 0x48c   : > { %4842 = vmatmul.msk.bf16.gmra.mxu3 %vm226_vm1, %v6888_v29 }
 0x48d   : > { %4860 = vmatmul.msk.bf16.gmra.mxu0 %vm226_vm1, %v3949_v57 }
 0x48e   : > { %v3581_v4 = vpop.f32.mrf.mxu2 }
 0x48f   : > { %v3804_v0 = vpop.f32.mrf.mxu3  ;;  %v3655_v7 = vadd.f32 %v3581_v4, %v6309_v10  ;;  %v4162_v10 = vpack.c.bf16 %v4133_v53, %v4132_v45  ;;  %v4031_v9 = vpop.f32.mrf.mxu0  ;;  %v3932_v45 = vld [vmem:[#allocation3 + $0x169] sm:$0xff] }
 0x490   : > { %v3396_v14 = vpop.f32.mrf.mxu1  ;;  %v6891_v53 = vld [vmem:[#allocation23_spill] sm:$0xff] }
 0x491   : > { %v3878_v23 = vadd.f32 %v3804_v0, %v3655_v7  ;;  %v6455_v2 = vadd.f32 %v3396_v14, %v6296_v47  ;;  %v6890_v47 = vld [vmem:[#allocation20_spill] sm:$0xff]  ;;  %v4134_v0 = vld [vmem:[#allocation3 + $0x7a] sm:$0xff]  ;;  %v4135_v7 = vld [vmem:[#allocation3 + $0x82] sm:$0xff] }
 0x492   : > { %v3933_v14 = vld [vmem:[#allocation3 + $0x171] sm:$0xff] }
 0x493   : > { %v6457_v62 = vadd.f32 %v4026_v31, %v3878_v23 }
 0x496   : > { %v3583_v28 = vpop.f32.mrf.mxu2 }
 0x497   : > { %v3806_v35 = vpop.f32.mrf.mxu3  ;;  %v3656_v61 = vadd.f32 %v3583_v28, %v6322_v41 }
 0x498   : > { %v3399_v13 = vpop.f32.mrf.mxu1 }
 0x499   : > { %v3879_v36 = vadd.f32 %v3806_v35, %v3656_v61  ;;  %v6461_v39 = vadd.f32 %v3399_v13, %v6305_v46  ;;  %v4033_v35 = vpop.f32.mrf.mxu0  ;;  %v4163_v61 = vpack.c.bf16 %v4135_v7, %v4134_v0  ;;  %v4137_v13 = vld [vmem:[#allocation3 + $0x9a] sm:$0xff]  ;;  %v3491_v0 = vld [vmem:[#allocation3 + $0x182] sm:$0xff] }
 0x49a   : > { %v4140_v7 = vld [vmem:[#allocation3 + $0xc2] sm:$0xff] }
 0x49b   : > { %4826 = vmatmul.msk.bf16.gmra.mxu2 %vm226_vm1, %v6889_v8  ;;  %v6467_v49 = vadd.f32 %v4028_v20, %v3879_v36  ;;  %4868 = vmatmul.msk.bf16.gmra.mxu1 %vm226_vm1, %v4162_v10 }
 0x49c   : > { %4843 = vmatmul.msk.bf16.gmra.mxu3 %vm226_vm1, %v6890_v47  ;;  %v6892_v47 = vld [vmem:[#allocation25_spill] sm:$0xff] }
 0x49d   : > { %4861 = vmatmul.msk.bf16.gmra.mxu0 %vm226_vm1, %v3950_v24  ;;  %v3936_v24 = vld [vmem:[#allocation3 + $0x199] sm:$0xff] }
 0x49e   : > { %v3586_v41 = vpop.f32.mrf.mxu2 }
 0x49f   : > { %v3809_v37 = vpop.f32.mrf.mxu3  ;;  %v3657_v46 = vadd.f32 %v3586_v41, %v6328_v40  ;;  %v3937_v41 = vld [vmem:[#allocation3 + $0x1a1] sm:$0xff] }
 0x4a0   : > { %v3401_v31 = vpop.f32.mrf.mxu1 }
 0x4a1   : > { %v3880_v15 = vadd.f32 %v3809_v37, %v3657_v46  ;;  %v6473_v55 = vadd.f32 %v3401_v31, %v6315_v6  ;;  %v3951_v6 = vpack.c.bf16 %v3933_v14, %v3932_v45  ;;  %v4139_v37 = vld [vmem:[#allocation3 + $0xb2] sm:$0xff]  ;;  %v4142_v45 = vld [vmem:[#allocation3 + $0xda] sm:$0xff] }
 0x4a3   : > { %v6475_v29 = vadd.f32 %v4031_v9, %v3880_v15  ;;  %v3953_v9 = vpack.c.bf16 %v3937_v41, %v3936_v24  ;;  %v4386_v24 = vld [vmem:[%s5139_s8] sm:$0xff] }
 0x4a6   : > { %v3588_v57 = vpop.f32.mrf.mxu2 }
 0x4a7   : > { %v3658_v4 = vadd.f32 %v3588_v57, %v6341_v52  ;;  %v3811_v23 = vpop.f32.mrf.mxu3  ;;  %v3714_v57 = vld [vmem:[#allocation3 + $0x198] sm:$0xff] }
 0x4a8   : > { %v3404_v28 = vpop.f32.mrf.mxu1 }
 0x4a9   : > { %v3881_v20 = vadd.f32 %v3811_v23, %v3658_v4  ;;  %v6479_v40 = vadd.f32 %v3404_v28, %v6324_v5  ;;  %v4136_v5 = vld [vmem:[#allocation3 + $0x92] sm:$0xff]  ;;  %v3715_v4 = vld [vmem:[#allocation3 + $0x1a0] sm:$0xff]  ;;  %v4141_v23 = vld [vmem:[#allocation3 + $0xca] sm:$0xff] }
 0x4aa   : > { %v4164_v8 = vpack.c.bf16 %v4137_v13, %v4136_v5  ;;  %v3731_v14 = vpack.c.bf16 %v3715_v4, %v3714_v57  ;;  %v4146_v57 = vld [vmem:[#allocation3 + $0x10a] sm:$0xff]  ;;  %v4147_v4 = vld [vmem:[#allocation3 + $0x112] sm:$0xff] }
 0x4ab   : > { %4827 = vmatmul.msk.bf16.gmra.mxu2 %vm226_vm1, %v6891_v53  ;;  %v6485_v52 = vadd.f32 %v4033_v35, %v3881_v20  ;;  %4869 = vmatmul.msk.bf16.gmra.mxu1 %vm226_vm1, %v4163_v61  ;;  %v4166_v35 = vpack.c.bf16 %v4141_v23, %v4140_v7  ;;  %v4143_v53 = vld [vmem:[#allocation3 + $0xe2] sm:$0xff] }
 0x4ac   : > { %4844 = vmatmul.msk.bf16.gmra.mxu3 %vm226_vm1, %v6173_v33 }
 0x4ad   : > { %4862 = vmatmul.msk.bf16.gmra.mxu0 %vm226_vm1, %v3951_v6 }
 0x4b0   : > { %v3406_v30 = vpop.f32.mrf.mxu1 }
 0x4b1   : > { %v6490_v36 = vadd.f32 %v3406_v30, %v6334_v16 }
 0x4b8   : > { %v3409_v10 = vpop.f32.mrf.mxu1 }
 0x4b9   : > { %v6493_v3 = vadd.f32 %v3409_v10, %v6343_v25  ;;  %v4138_v25 = vld [vmem:[#allocation3 + $0xaa] sm:$0xff]  ;;  %v4144_v10 = vld [vmem:[#allocation3 + $0xf2] sm:$0xff] }
 0x4ba   : > { %v4165_v31 = vpack.c.bf16 %v4139_v37, %v4138_v25 }
 0x4bb   : > { %4828 = vmatmul.msk.bf16.gmra.mxu2 %vm226_vm1, %v6892_v47  ;;  %4870 = vmatmul.msk.bf16.gmra.mxu1 %vm226_vm1, %v4164_v8  ;;  %v4145_v8 = vld [vmem:[#allocation3 + $0xfa] sm:$0xff] }
 0x4bc   : > { %4845 = vmatmul.msk.bf16.gmra.mxu3 %vm226_vm1, %v6195_v63  ;;  %v6893_v63 = vld [vmem:[#allocation26_spill] sm:$0xff] }
 0x4bd   : > { %4863 = vmatmul.msk.bf16.gmra.mxu0 %vm226_vm1, %v6406_v44 }
 0x4c0   : > { %v3411_v33 = vpop.f32.mrf.mxu1 }
 0x4c1   : > { %v6503_v16 = vadd.f32 %v3411_v33, %v6353_v60  ;;  %v4168_v33 = vpack.c.bf16 %v4145_v8, %v4144_v10  ;;  %v4389_v10 = vld [vmem:[%s5139_s8 + $0x18] sm:$0xff] }
 0x4c8   : > { %v3414_v46 = vpop.f32.mrf.mxu1 }
 0x4c9   : > { %v6506_v15 = vadd.f32 %v3414_v46, %v6362_v12  ;;  %v3492_v12 = vld [vmem:[#allocation3 + $0x18a] sm:$0xff] }
 0x4cb   : > { %4829 = vmatmul.msk.bf16.gmra.mxu2 %vm226_vm1, %v6233_v11  ;;  %4871 = vmatmul.msk.bf16.gmra.mxu1 %vm226_vm1, %v4165_v31  ;;  %v6517_v11 = vpack.c.bf16 %v3492_v12, %v3491_v0  ;;  %v6561_v0 = vpop.f32.mrf.mxu0 }
 0x4cc   : > { %4846 = vmatmul.msk.bf16.gmra.mxu3 %vm226_vm1, %v6893_v63  ;;  %v6559_v63 = vpop.f32.mrf.mxu3 }
 0x4cd   : > { %4864 = vmatmul.msk.bf16.gmra.mxu0 %vm226_vm1, %v3953_v9  ;;  %v4387_v9 = vld [vmem:[%s5139_s8 + $0x8] sm:$0xff] }
 0x4d0   : > { %v3416_v60 = vpop.f32.mrf.mxu1 }
 0x4d1   : > { %v6515_v44 = vadd.f32 %v3416_v60, %v6372_v43 }
 0x4d8   : > { %v3419_v20 = vpop.f32.mrf.mxu1 }
 0x4d9   : > { %v6520_v28 = vadd.f32 %v3419_v20, %v6381_v50  ;;  %v4167_v50 = vpack.c.bf16 %v4143_v53, %v4142_v45  ;;  %v4388_v20 = vld [vmem:[%s5139_s8 + $0x10] sm:$0xff]  ;;  %v6571_v45 = vpop.f32.mrf.mxu3 }
 0x4db   : > { %4830 = vmatmul.msk.bf16.gmra.mxu2 %vm226_vm1, %v6517_v11  ;;  %4872 = vmatmul.msk.bf16.gmra.mxu1 %vm226_vm1, %v4166_v35 }
 0x4dc   : > { %4847 = vmatmul.msk.bf16.gmra.mxu3 %vm226_vm1, %v3731_v14  ;;  %v4169_v14 = vpack.c.bf16 %v4147_v4, %v4146_v57 }
 0x4e0   : > { %v3421_v43 = vpop.f32.mrf.mxu1 }
 0x4e1   : > { %v6527_v61 = vadd.f32 %v3421_v43, %v6391_v59  ;;  %v6539_v59 = vld [vmem:[%s6778_s4] ss:$0 sm:$0xff] }
 0x4e8   : > { %v3424_v6 = vpop.f32.mrf.mxu1 }
 0x4e9   : > { %v6530_v30 = vadd.f32 %v3424_v6, %v6400_v27 }
 0x4eb   : > { %4873 = vmatmul.msk.bf16.gmra.mxu1 %vm226_vm1, %v4167_v50  ;;  %v6573_v50 = vpop.f32.mrf.mxu0 }
 0x4f0   : > { %v3426_v5 = vpop.f32.mrf.mxu1 }
 0x4f1   : > { %v6534_v13 = vadd.f32 %v3426_v5, %v6412_v26  ;;  %v6545_v26 = vpop.f32.mrf.mxu2 }
 0x4f8   : > { %v4238_v47 = vpop.f32.mrf.mxu1 }
 0x4f9   : > { %v4318_v27 = vadd.f32 %v4238_v47, %v6421_v42  ;;  %v6563_v7 = vpop.f32.mrf.mxu2 }
 0x4fb   : > { %v4354_v41 = vadd.f32 %v6539_v59, %v4318_v27  ;;  %4874 = vmatmul.msk.bf16.gmra.mxu1 %vm226_vm1, %v4168_v33  ;;  %v4148_v27 = vld [vmem:[#allocation3 + $0x122] sm:$0xff]  ;;  %v4149_v33 = vld [vmem:[#allocation3 + $0x12a] sm:$0xff] }
 0x4fd   : > { %v4418_v25 = vadd.f32 %v4386_v24, %v4354_v41  ;;  %v6582_v41 = vpop.f32.mrf.mxu3 }
 0x4ff   : > { %v4450_v37 = vmax.f32 %v4418_v25, 0.0 }
 0x500   : > { %v4240_v46 = vpop.f32.mrf.mxu1 }
 0x501   : > { %4482 = vst.msk [vmem:[%s6552_s24] sm:$0xff] %vm226_vm1, %v4450_v37  ;;  %v4319_v42 = vadd.f32 %v4240_v46, %v6431_v22  ;;  %v4170_v46 = vpack.c.bf16 %v4149_v33, %v4148_v27 }
 0x503   : > { %v4355_v31 = vadd.f32 %v6539_v59, %v4319_v42  ;;  %v6588_v42 = vpop.f32.mrf.mxu0 }
 0x505   : > { %v4419_v60 = vadd.f32 %v4387_v9, %v4355_v31 }
 0x507   : > { %v4451_v12 = vmax.f32 %v4419_v60, 0.0 }
 0x508   : > { %v4243_v23 = vpop.f32.mrf.mxu1 }
 0x509   : > { %4483 = vst.msk [vmem:[%s6552_s24 + $0x8] sm:$0xff] %vm226_vm1, %v4451_v12  ;;  %v4320_v22 = vadd.f32 %v4243_v23, %v6439_v19  ;;  %v6578_v19 = vpop.f32.mrf.mxu2  ;;  %v4391_v23 = vld [vmem:[%s5139_s8 + $0x28] sm:$0xff] }
 0x50b   : > { %v4356_v35 = vadd.f32 %v6539_v59, %v4320_v22  ;;  %4875 = vmatmul.msk.bf16.gmra.mxu1 %vm226_vm1, %v4169_v14  ;;  %v6601_v14 = vpop.f32.mrf.mxu0 }
 0x50d   : > { %v4420_v43 = vadd.f32 %v4388_v20, %v4356_v35 }
 0x50f   : > { %v4452_v53 = vmax.f32 %v4420_v43, 0.0  ;;  %v4150_v43 = vld [vmem:[#allocation3 + $0x13a] sm:$0xff] }
 0x510   : > { %v4245_v6 = vpop.f32.mrf.mxu1 }
 0x511   : > { %4484 = vst.msk [vmem:[%s6552_s24 + $0x10] sm:$0xff] %vm226_vm1, %v4452_v53  ;;  %v4321_v5 = vadd.f32 %v4245_v6, %v6449_v17  ;;  %v4390_v17 = vld [vmem:[%s5139_s8 + $0x20] sm:$0xff]  ;;  %v6592_v31 = vpop.f32.mrf.mxu2  ;;  %v4151_v53 = vld [vmem:[#allocation3 + $0x142] sm:$0xff] }
 0x513   : > { %v4357_v8 = vadd.f32 %v6539_v59, %v4321_v5 }
 0x515   : > { %v4421_v47 = vadd.f32 %v4389_v10, %v4357_v8  ;;  %v4171_v10 = vpack.c.bf16 %v4151_v53, %v4150_v43  ;;  %v4392_v8 = vld [vmem:[%s5139_s8 + $0x30] sm:$0xff] }
 0x517   : > { %v4453_v24 = vmax.f32 %v4421_v47, 0.0 }
 0x518   : > { %v4248_v25 = vpop.f32.mrf.mxu1 }
 0x519   : > { %4485 = vst.msk [vmem:[%s6552_s24 + $0x18] sm:$0xff] %vm226_vm1, %v4453_v24  ;;  %v4322_v37 = vadd.f32 %v4248_v25, %v6457_v62  ;;  %v6597_v62 = vpop.f32.mrf.mxu3  ;;  %v6603_v35 = vpop.f32.mrf.mxu2  ;;  %v3659_v24 = vadd.f32 %v6545_v26, %v6347_v32  ;;  %v4152_v32 = vld [vmem:[#allocation3 + $0x152] sm:$0xff]  ;;  %v4153_v26 = vld [vmem:[#allocation3 + $0x15a] sm:$0xff] }
 0x51a   : > { %v6615_v25 = vpop.f32.mrf.mxu0  ;;  %v4172_v53 = vpack.c.bf16 %v4153_v26, %v4152_v32 }
 0x51b   : > { %v4358_v9 = vadd.f32 %v6539_v59, %v4322_v37  ;;  %4876 = vmatmul.msk.bf16.gmra.mxu1 %vm226_vm1, %v4170_v46 }
 0x51d   : > { %v4422_v60 = vadd.f32 %v4390_v17, %v4358_v9  ;;  %v4393_v9 = vld [vmem:[%s5139_s8 + $0x38] sm:$0xff] }
 0x51f   : > { %v4454_v57 = vmax.f32 %v4422_v60, 0.0  ;;  %v3882_v60 = vadd.f32 %v6559_v63, %v3659_v24 }
 0x520   : > { %v4250_v4 = vpop.f32.mrf.mxu1 }
 0x521   : > { %4486 = vst.msk [vmem:[%s6552_s24 + $0x20] sm:$0xff] %vm226_vm1, %v4454_v57  ;;  %v4323_v12 = vadd.f32 %v4250_v4, %v6467_v49  ;;  %v6611_v27 = vpop.f32.mrf.mxu3  ;;  %v6617_v46 = vpop.f32.mrf.mxu2 }
 0x523   : > { %v4359_v22 = vadd.f32 %v6539_v59, %v4323_v12 }
 0x525   : > { %v4423_v20 = vadd.f32 %v4391_v23, %v4359_v22  ;;  %v3660_v23 = vadd.f32 %v6563_v7, %v6360_v1 }
 0x527   : > { %v4455_v6 = vmax.f32 %v4423_v20, 0.0  ;;  %v4104_v20 = vadd.f32 %v6561_v0, %v3882_v60  ;;  %v3661_v0 = vadd.f32 %v6578_v19, %v6366_v38  ;;  %v4155_v38 = vld [vmem:[#allocation3 + $0x172] sm:$0xff] }
 0x528   : > { %v4253_v5 = vpop.f32.mrf.mxu1 }
 0x529   : > { %4487 = vst.msk [vmem:[%s6552_s24 + $0x28] sm:$0xff] %vm226_vm1, %v4455_v6  ;;  %v4324_v49 = vadd.f32 %v4253_v5, %v6475_v29  ;;  %v6625_v12 = vpop.f32.mrf.mxu3  ;;  %v3606_v6 = vpop.f32.mrf.mxu2  ;;  %v4394_v5 = vld [vmem:[%s5139_s8 + $0x40] sm:$0xff] }
 0x52b   : > { %v4360_v47 = vadd.f32 %v6539_v59, %v4324_v49  ;;  %4877 = vmatmul.msk.bf16.gmra.mxu1 %vm226_vm1, %v4171_v10  ;;  %v3883_v49 = vadd.f32 %v6571_v45, %v3660_v23  ;;  %v3884_v45 = vadd.f32 %v6582_v41, %v3661_v0 }
 0x52d   : > { %v4424_v33 = vadd.f32 %v4392_v8, %v4360_v47  ;;  %v4105_v8 = vadd.f32 %v6573_v50, %v3883_v49  ;;  %v3662_v50 = vadd.f32 %v6592_v31, %v6379_v21 }
 0x52f   : > { %v4456_v37 = vmax.f32 %v4424_v33, 0.0 }
 0x530   : > { %v4255_v17 = vpop.f32.mrf.mxu1 }
 0x531   : > { %4488 = vst.msk [vmem:[%s6552_s24 + $0x30] sm:$0xff] %vm226_vm1, %v4456_v37  ;;  %v4325_v29 = vadd.f32 %v4255_v17, %v6485_v52  ;;  %v6630_v52 = vpop.f32.mrf.mxu0  ;;  %v3829_v47 = vpop.f32.mrf.mxu3  ;;  %v4395_v37 = vld [vmem:[%s5139_s8 + $0x48] sm:$0xff] }
 0x533   : > { %v4361_v57 = vadd.f32 %v6539_v59, %v4325_v29 }
 0x535   : > { %v4425_v4 = vadd.f32 %v4393_v9, %v4361_v57  ;;  %v3608_v9 = vpop.f32.mrf.mxu2  ;;  %v4154_v57 = vld [vmem:[#allocation3 + $0x16a] sm:$0xff] }
 0x536   : > { %v4173_v41 = vpack.c.bf16 %v4155_v38, %v4154_v57  ;;  %v3665_v57 = vadd.f32 %v3606_v6, %v6404_v34  ;;  %v3666_v34 = vadd.f32 %v3608_v9, %v6419_v54 }
 0x537   : > { %v4457_v22 = vmax.f32 %v4425_v4, 0.0  ;;  %v4106_v4 = vadd.f32 %v6588_v42, %v3884_v45  ;;  %v3663_v42 = vadd.f32 %v6603_v35, %v6385_v58 }
 0x538   : > { %v4258_v43 = vpop.f32.mrf.mxu1 }
 0x539   : > { %4489 = vst.msk [vmem:[%s6552_s24 + $0x38] sm:$0xff] %vm226_vm1, %v4457_v22  ;;  %v4326_v63 = vadd.f32 %v4258_v43, %v4104_v20  ;;  %v4051_v17 = vpop.f32.mrf.mxu0  ;;  %v3831_v23 = vpop.f32.mrf.mxu3  ;;  %v4396_v22 = vld [vmem:[%s5139_s8 + $0x50] sm:$0xff]  ;;  %v3885_v20 = vadd.f32 %v6597_v62, %v3662_v50  ;;  %v4397_v62 = vld [vmem:[%s5139_s8 + $0x58] sm:$0xff] }
 0x53b   : > { %v4362_v10 = vadd.f32 %v6539_v59, %v4326_v63  ;;  %4878 = vmatmul.msk.bf16.gmra.mxu1 %vm226_vm1, %v4172_v53 }
 0x53d   : > { %v4426_v1 = vadd.f32 %v4394_v5, %v4362_v10  ;;  %v3611_v31 = vpop.f32.mrf.mxu2  ;;  %v4107_v5 = vadd.f32 %v6601_v14, %v3885_v20 }
 0x53e   : > { %v3667_v54 = vadd.f32 %v3611_v31, %v6425_v18 }
 0x53f   : > { %v4458_v7 = vmax.f32 %v4426_v1, 0.0  ;;  %v3886_v1 = vadd.f32 %v6611_v27, %v3663_v42 }
 0x540   : > { %v4260_v33 = vpop.f32.mrf.mxu1 }
 0x541   : > { %4490 = vst.msk [vmem:[%s6552_s24 + $0x40] sm:$0xff] %vm226_vm1, %v4458_v7  ;;  %v4327_v24 = vadd.f32 %v4260_v33, %v4105_v8  ;;  %v4053_v63 = vpop.f32.mrf.mxu0  ;;  %v3834_v7 = vpop.f32.mrf.mxu3  ;;  %v3664_v33 = vadd.f32 %v6617_v46, %v6398_v56 }
 0x543   : > { %v4363_v29 = vadd.f32 %v6539_v59, %v4327_v24  ;;  %v4108_v24 = vadd.f32 %v6615_v25, %v3886_v1  ;;  %v3887_v27 = vadd.f32 %v6625_v12, %v3664_v33 }
 0x545   : > { %v4427_v60 = vadd.f32 %v4395_v37, %v4363_v29  ;;  %v3613_v14 = vpop.f32.mrf.mxu2  ;;  %v4398_v29 = vld [vmem:[%s5139_s8 + $0x60] sm:$0xff]  ;;  %v4109_v38 = vadd.f32 %v6630_v52, %v3887_v27 }
 0x546   : > { %v3668_v27 = vadd.f32 %v3613_v14, %v6437_v51 }
 0x547   : > { %v4459_v19 = vmax.f32 %v4427_v60, 0.0 }
 0x548   : > { %v4263_v32 = vpop.f32.mrf.mxu1 }
 0x549   : > { %4491 = vst.msk [vmem:[%s6552_s24 + $0x48] sm:$0xff] %vm226_vm1, %v4459_v19  ;;  %v4328_v26 = vadd.f32 %v4263_v32, %v4106_v4  ;;  %v4056_v58 = vpop.f32.mrf.mxu0  ;;  %v3836_v46 = vpop.f32.mrf.mxu3  ;;  %v4399_v32 = vld [vmem:[%s5139_s8 + $0x68] sm:$0xff] }
 0x54b   : > { %v4364_v43 = vadd.f32 %v6539_v59, %v4328_v26  ;;  %4879 = vmatmul.msk.bf16.gmra.mxu1 %vm226_vm1, %v4173_v41  ;;  %v3888_v26 = vadd.f32 %v3829_v47, %v3665_v57  ;;  %v3891_v57 = vadd.f32 %v3836_v46, %v3668_v27 }
 0x54d   : > { %v4428_v21 = vadd.f32 %v4396_v22, %v4364_v43  ;;  %v3616_v12 = vpop.f32.mrf.mxu2  ;;  %v4159_v22 = vld [vmem:[#allocation3 + $0x1a2] sm:$0xff]  ;;  %v4110_v43 = vadd.f32 %v4051_v17, %v3888_v26 }
 0x54f   : > { %v4460_v53 = vmax.f32 %v4428_v21, 0.0 }
 0x550   : > { %v4265_v49 = vpop.f32.mrf.mxu1 }
 0x551   : > { %4492 = vst.msk [vmem:[%s6552_s24 + $0x50] sm:$0xff] %vm226_vm1, %v4460_v53  ;;  %v4329_v10 = vadd.f32 %v4265_v49, %v4107_v5  ;;  %v4058_v19 = vpop.f32.mrf.mxu0  ;;  %v3839_v21 = vpop.f32.mrf.mxu3  ;;  %v4400_v5 = vld [vmem:[%s5139_s8 + $0x70] sm:$0xff]  ;;  %v3889_v49 = vadd.f32 %v3831_v23, %v3666_v34  ;;  %v3890_v23 = vadd.f32 %v3834_v7, %v3667_v54  ;;  %v4405_v54 = vld [vmem:[%s5139_s8 + $0x98] sm:$0xff] }
 0x552   : > { %v4113_v51 = vadd.f32 %v4058_v19, %v3891_v57 }
 0x553   : > { %v4365_v0 = vadd.f32 %v6539_v59, %v4329_v10  ;;  %v4111_v9 = vadd.f32 %v4053_v63, %v3889_v49  ;;  %v4112_v18 = vadd.f32 %v4056_v58, %v3890_v23 }
 0x555   : > { %v4429_v8 = vadd.f32 %v4397_v62, %v4365_v0  ;;  %v3618_v62 = vpop.f32.mrf.mxu2 }
 0x556   : > { %v3670_v34 = vadd.f32 %v3618_v62, %v6455_v2 }
 0x557   : > { %v4461_v35 = vmax.f32 %v4429_v8, 0.0 }
 0x558   : > { %v4268_v37 = vpop.f32.mrf.mxu1 }
 0x559   : > { %4493 = vst.msk [vmem:[%s6552_s24 + $0x58] sm:$0xff] %vm226_vm1, %v4461_v35  ;;  %v4330_v45 = vadd.f32 %v4268_v37, %v4108_v24  ;;  %v4061_v47 = vpop.f32.mrf.mxu0  ;;  %v3841_v33 = vpop.f32.mrf.mxu3  ;;  %v4401_v35 = vld [vmem:[%s5139_s8 + $0x78] sm:$0xff] }
 0x55b   : > { %v4366_v60 = vadd.f32 %v6539_v59, %v4330_v45  ;;  %4880 = vmatmul.msk.bf16.gmra.mxu1 %vm226_vm1, %v6517_v11  ;;  %v4158_v11 = vld [vmem:[#allocation3 + $0x19a] sm:$0xff] }
 0x55c   : > { %v4175_v52 = vpack.c.bf16 %v4159_v22, %v4158_v11 }
 0x55d   : > { %v4430_v56 = vadd.f32 %v4398_v29, %v4366_v60  ;;  %v3621_v29 = vpop.f32.mrf.mxu2 }
 0x55e   : > { %v3671_v49 = vadd.f32 %v3621_v29, %v6461_v39  ;;  %v4406_v29 = vld [vmem:[%s5139_s8 + $0xa0] sm:$0xff] }
 0x55f   : > { %v4462_v25 = vmax.f32 %v4430_v56, 0.0  ;;  %v4402_v56 = vld [vmem:[%s5139_s8 + $0x80] sm:$0xff] }
 0x560   : > { %v4270_v50 = vpop.f32.mrf.mxu1 }
 0x561   : > { %4494 = vst.msk [vmem:[%s6552_s24 + $0x60] sm:$0xff] %vm226_vm1, %v4462_v25  ;;  %v4331_v4 = vadd.f32 %v4270_v50, %v4109_v38  ;;  %v4063_v37 = vpop.f32.mrf.mxu0  ;;  %v3844_v7 = vpop.f32.mrf.mxu3  ;;  %v3669_v50 = vadd.f32 %v3616_v12, %v6443_v48 }
 0x563   : > { %v4367_v41 = vadd.f32 %v6539_v59, %v4331_v4  ;;  %v3892_v11 = vadd.f32 %v3839_v21, %v3669_v50 }
 0x565   : > { %v4431_v20 = vadd.f32 %v4399_v32, %v4367_v41  ;;  %v3623_v14 = vpop.f32.mrf.mxu2  ;;  %v4403_v41 = vld [vmem:[%s5139_s8 + $0x88] sm:$0xff]  ;;  %v4114_v48 = vadd.f32 %v4061_v47, %v3892_v11 }
 0x567   : > { %v4463_v6 = vmax.f32 %v4431_v20, 0.0 }
 0x568   : > { %v4273_v42 = vpop.f32.mrf.mxu1 }
 0x569   : > { %4495 = vst.msk [vmem:[%s6552_s24 + $0x68] sm:$0xff] %vm226_vm1, %v4463_v6  ;;  %v4332_v53 = vadd.f32 %v4273_v42, %v4110_v43  ;;  %v4066_v4 = vpop.f32.mrf.mxu0  ;;  %v3846_v20 = vpop.f32.mrf.mxu3  ;;  %v4404_v42 = vld [vmem:[%s5139_s8 + $0x90] sm:$0xff] }
 0x56b   : > { %v4368_v10 = vadd.f32 %v6539_v59, %v4332_v53  ;;  %4881 = vmatmul.msk.bf16.gmra.mxu1 %vm226_vm1, %v4175_v52  ;;  %v3893_v53 = vadd.f32 %v3841_v33, %v3670_v34 }
 0x56d   : > { %v4432_v1 = vadd.f32 %v4400_v5, %v4368_v10  ;;  %v3626_v52 = vpop.f32.mrf.mxu2  ;;  %v4115_v2 = vadd.f32 %v4063_v37, %v3893_v53 }
 0x56f   : > { %v4464_v17 = vmax.f32 %v4432_v1, 0.0 }
 0x570   : > { %v4275_v0 = vpop.f32.mrf.mxu1 }
 0x571   : > { %4496 = vst.msk [vmem:[%s6552_s24 + $0x70] sm:$0xff] %vm226_vm1, %v4464_v17  ;;  %v4333_v8 = vadd.f32 %v4275_v0, %v4111_v9  ;;  %v4068_v19 = vpop.f32.mrf.mxu0  ;;  %v3849_v62 = vpop.f32.mrf.mxu3  ;;  %v3894_v17 = vadd.f32 %v3844_v7, %v3671_v49 }
 0x573   : > { %v4369_v24 = vadd.f32 %v6539_v59, %v4333_v8  ;;  %v4116_v39 = vadd.f32 %v4066_v4, %v3894_v17  ;;  %v4410_v17 = vld [vmem:[%s5139_s8 + $0xc0] sm:$0xff] }
 0x575   : > { %v4433_v45 = vadd.f32 %v4401_v35, %v4369_v24  ;;  %v3628_v8 = vpop.f32.mrf.mxu2  ;;  %v3672_v35 = vadd.f32 %v3623_v14, %v6473_v55 }
 0x577   : > { %v4465_v60 = vmax.f32 %v4433_v45, 0.0  ;;  %v3895_v27 = vadd.f32 %v3846_v20, %v3672_v35 }
 0x578   : > { %v4278_v31 = vpop.f32.mrf.mxu1 }
 0x579   : > { %4497 = vst.msk [vmem:[%s6552_s24 + $0x78] sm:$0xff] %vm226_vm1, %v4465_v60  ;;  %v4334_v63 = vadd.f32 %v4278_v31, %v4112_v18  ;;  %v4071_v9 = vpop.f32.mrf.mxu0  ;;  %v3851_v45 = vpop.f32.mrf.mxu3  ;;  %v4117_v55 = vadd.f32 %v4068_v19, %v3895_v27 }
 0x57b   : > { %v4370_v25 = vadd.f32 %v6539_v59, %v4334_v63 }
 0x57d   : > { %v4434_v38 = vadd.f32 %v4402_v56, %v4370_v25  ;;  %v3631_v63 = vpop.f32.mrf.mxu2  ;;  %v3673_v56 = vadd.f32 %v3626_v52, %v6479_v40 }
 0x57f   : > { %v4466_v32 = vmax.f32 %v4434_v38, 0.0  ;;  %v4407_v38 = vld [vmem:[%s5139_s8 + $0xa8] sm:$0xff]  ;;  %v3896_v50 = vadd.f32 %v3849_v62, %v3673_v56 }
 0x580   : > { %v4280_v26 = vpop.f32.mrf.mxu1 }
 0x581   : > { %4498 = vst.msk [vmem:[%s6552_s24 + $0x80] sm:$0xff] %vm226_vm1, %v4466_v32  ;;  %v4335_v58 = vadd.f32 %v4280_v26, %v4113_v51  ;;  %v4073_v18 = vpop.f32.mrf.mxu0  ;;  %v3854_v32 = vpop.f32.mrf.mxu3  ;;  %v3674_v26 = vadd.f32 %v3628_v8, %v6490_v36  ;;  %v4118_v40 = vadd.f32 %v4071_v9, %v3896_v50 }
 0x583   : > { %v4371_v46 = vadd.f32 %v6539_v59, %v4335_v58  ;;  %v3897_v20 = vadd.f32 %v3851_v45, %v3674_v26 }
 0x585   : > { %v4435_v22 = vadd.f32 %v4403_v41, %v4371_v46  ;;  %v3633_v41 = vpop.f32.mrf.mxu2  ;;  %v4119_v36 = vadd.f32 %v4073_v18, %v3897_v20 }
 0x587   : > { %v4467_v6 = vmax.f32 %v4435_v22, 0.0  ;;  %v4408_v22 = vld [vmem:[%s5139_s8 + $0xb0] sm:$0xff] }
 0x588   : > { %v4283_v12 = vpop.f32.mrf.mxu1 }
 0x589   : > { %4499 = vst.msk [vmem:[%s6552_s24 + $0x88] sm:$0xff] %vm226_vm1, %v4467_v6  ;;  %v4336_v43 = vadd.f32 %v4283_v12, %v4114_v48  ;;  %v4076_v14 = vpop.f32.mrf.mxu0  ;;  %v3856_v48 = vpop.f32.mrf.mxu3  ;;  %v3675_v12 = vadd.f32 %v3631_v63, %v6493_v3 }
 0x58b   : > { %v4372_v21 = vadd.f32 %v6539_v59, %v4336_v43 }
 0x58d   : > { %v4436_v5 = vadd.f32 %v4404_v42, %v4372_v21  ;;  %v3636_v53 = vpop.f32.mrf.mxu2  ;;  %v4409_v21 = vld [vmem:[%s5139_s8 + $0xb8] sm:$0xff] }
 0x58f   : > { %v4468_v10 = vmax.f32 %v4436_v5, 0.0  ;;  %v3898_v5 = vadd.f32 %v3854_v32, %v3675_v12 }
 0x590   : > { %v4285_v1 = vpop.f32.mrf.mxu1 }
 0x591   : > { %4500 = vst.msk [vmem:[%s6552_s24 + $0x90] sm:$0xff] %vm226_vm1, %v4468_v10  ;;  %v4337_v47 = vadd.f32 %v4285_v1, %v4115_v2  ;;  %v4078_v52 = vpop.f32.mrf.mxu0  ;;  %v3676_v2 = vadd.f32 %v3633_v41, %v6503_v16  ;;  %v4120_v3 = vadd.f32 %v4076_v14, %v3898_v5  ;;  %v3859_v1 = vpop.f32.mrf.mxu3 }
 0x593   : > { %v4373_v0 = vadd.f32 %v6539_v59, %v4337_v47 }
 0x595   : > { %v4437_v33 = vadd.f32 %v4405_v54, %v4373_v0  ;;  %v3899_v0 = vadd.f32 %v3856_v48, %v3676_v2 }
 0x597   : > { %v4469_v23 = vmax.f32 %v4437_v33, 0.0  ;;  %v3638_v33 = vpop.f32.mrf.mxu2  ;;  %v4121_v16 = vadd.f32 %v4078_v52, %v3899_v0  ;;  %v4414_v52 = vld [vmem:[%s5139_s8 + $0xe0] sm:$0xff] }
 0x598   : > { %v4288_v24 = vpop.f32.mrf.mxu1  ;;  %v3678_v56 = vadd.f32 %v3638_v33, %v6515_v44 }
 0x599   : > { %4501 = vst.msk [vmem:[%s6552_s24 + $0x98] sm:$0xff] %vm226_vm1, %v4469_v23  ;;  %v4338_v37 = vadd.f32 %v4288_v24, %v4116_v39  ;;  %v4081_v9 = vpop.f32.mrf.mxu0  ;;  %v3677_v23 = vadd.f32 %v3636_v53, %v6506_v15  ;;  %v3861_v45 = vpop.f32.mrf.mxu3 }
 0x59b   : > { %v4374_v60 = vadd.f32 %v6539_v59, %v4338_v37  ;;  %v3900_v27 = vadd.f32 %v3859_v1, %v3677_v23  ;;  %v4415_v1 = vld [vmem:[%s5139_s8 + $0xe8] sm:$0xff] }
 0x59d   : > { %v4438_v31 = vadd.f32 %v4406_v29, %v4374_v60  ;;  %v4411_v29 = vld [vmem:[%s5139_s8 + $0xc8] sm:$0xff]  ;;  %v4122_v15 = vadd.f32 %v4081_v9, %v3900_v27 }
 0x59f   : > { %v4470_v57 = vmax.f32 %v4438_v31, 0.0  ;;  %v3641_v63 = vpop.f32.mrf.mxu2 }
 0x5a0   : > { %v4290_v25 = vpop.f32.mrf.mxu1  ;;  %v3679_v14 = vadd.f32 %v3641_v63, %v6520_v28 }
 0x5a1   : > { %4502 = vst.msk [vmem:[%s6552_s24 + $0xa0] sm:$0xff] %vm226_vm1, %v4470_v57  ;;  %v4339_v7 = vadd.f32 %v4290_v25, %v4117_v55  ;;  %v4083_v18 = vpop.f32.mrf.mxu0 }
 0x5a3   : > { %v4375_v4 = vadd.f32 %v6539_v59, %v4339_v7  ;;  %v4412_v7 = vld [vmem:[%s5139_s8 + $0xd0] sm:$0xff] }
 0x5a5   : > { %v4439_v51 = vadd.f32 %v4407_v38, %v4375_v4  ;;  %v3901_v38 = vadd.f32 %v3861_v45, %v3678_v56  ;;  %v3864_v4 = vpop.f32.mrf.mxu3 }
 0x5a7   : > { %v4471_v58 = vmax.f32 %v4439_v51, 0.0  ;;  %v4123_v44 = vadd.f32 %v4083_v18, %v3901_v38  ;;  %v4417_v18 = vld [vmem:[%s5139_s8 + $0xf8] sm:$0xff] }
 0x5a8   : > { %v4293_v11 = vpop.f32.mrf.mxu1 }
 0x5a9   : > { %4503 = vst.msk [vmem:[%s6552_s24 + $0xa8] sm:$0xff] %vm226_vm1, %v4471_v58  ;;  %v4340_v46 = vadd.f32 %v4293_v11, %v4118_v40  ;;  %v4086_v51 = vpop.f32.mrf.mxu0  ;;  %v3643_v58 = vpop.f32.mrf.mxu2  ;;  %v4413_v11 = vld [vmem:[%s5139_s8 + $0xd8] sm:$0xff] }
 0x5ab   : > { %v4376_v34 = vadd.f32 %v6539_v59, %v4340_v46  ;;  %v3902_v46 = vadd.f32 %v3864_v4, %v3679_v14 }
 0x5ad   : > { %v4440_v6 = vadd.f32 %v4408_v22, %v4376_v34  ;;  %v3866_v34 = vpop.f32.mrf.mxu3  ;;  %v4124_v28 = vadd.f32 %v4086_v51, %v3902_v46 }
 0x5af   : > { %v4472_v19 = vmax.f32 %v4440_v6, 0.0  ;;  %v3680_v6 = vadd.f32 %v3643_v58, %v6527_v61 }
 0x5b0   : > { %v4295_v43 = vpop.f32.mrf.mxu1 }
 0x5b1   : > { %4504 = vst.msk [vmem:[%s6552_s24 + $0xb0] sm:$0xff] %vm226_vm1, %v4472_v19  ;;  %v4341_v42 = vadd.f32 %v4295_v43, %v4119_v36  ;;  %v4088_v36 = vpop.f32.mrf.mxu0  ;;  %v3646_v43 = vpop.f32.mrf.mxu2 }
 0x5b3   : > { %v4377_v49 = vadd.f32 %v6539_v59, %v4341_v42  ;;  %v3903_v42 = vadd.f32 %v3866_v34, %v3680_v6 }
 0x5b5   : > { %v4441_v10 = vadd.f32 %v4409_v21, %v4377_v49  ;;  %v3869_v5 = vpop.f32.mrf.mxu3  ;;  %v3681_v49 = vadd.f32 %v3646_v43, %v6530_v30  ;;  %v4125_v61 = vadd.f32 %v4088_v36, %v3903_v42 }
 0x5b7   : > { %v4473_v62 = vmax.f32 %v4441_v10, 0.0 }
 0x5b8   : > { %v4298_v47 = vpop.f32.mrf.mxu1 }
 0x5b9   : > { %4505 = vst.msk [vmem:[%s6552_s24 + $0xb8] sm:$0xff] %vm226_vm1, %v4473_v62  ;;  %v4342_v54 = vadd.f32 %v4298_v47, %v4120_v3  ;;  %v4091_v3 = vpop.f32.mrf.mxu0  ;;  %v3904_v47 = vadd.f32 %v3869_v5, %v3681_v49 }
 0x5bb   : > { %v4378_v8 = vadd.f32 %v6539_v59, %v4342_v54  ;;  %v4126_v0 = vadd.f32 %v4091_v3, %v3904_v47 }
 0x5bd   : > { %v4442_v35 = vadd.f32 %v4410_v17, %v4378_v8  ;;  %v3648_v17 = vpop.f32.mrf.mxu2  ;;  %v3871_v33 = vpop.f32.mrf.mxu3 }
 0x5be   : > { %v3682_v8 = vadd.f32 %v3648_v17, %v6534_v13 }
 0x5bf   : > { %v4474_v39 = vmax.f32 %v4442_v35, 0.0 }
 0x5c0   : > { %v4300_v24 = vpop.f32.mrf.mxu1 }
 0x5c1   : > { %4506 = vst.msk [vmem:[%s6552_s24 + $0xc0] sm:$0xff] %vm226_vm1, %v4474_v39  ;;  %v4343_v37 = vadd.f32 %v4300_v24, %v4121_v16  ;;  %v4416_v39 = vld [vmem:[%s5139_s8 + $0xf0] sm:$0xff]  ;;  %v3905_v16 = vadd.f32 %v3871_v33, %v3682_v8 }
 0x5c3   : > { %v4379_v60 = vadd.f32 %v6539_v59, %v4343_v37  ;;  %v4093_v37 = vpop.f32.mrf.mxu0 }
 0x5c5   : > { %v4443_v31 = vadd.f32 %v4411_v29, %v4379_v60  ;;  %v4127_v29 = vadd.f32 %v4093_v37, %v3905_v16 }
 0x5c7   : > { %v4475_v57 = vmax.f32 %v4443_v31, 0.0 }
 0x5c8   : > { %v4303_v55 = vpop.f32.mrf.mxu1 }
 0x5c9   : > { %4507 = vst.msk [vmem:[%s6552_s24 + $0xc8] sm:$0xff] %vm226_vm1, %v4475_v57  ;;  %v4344_v25 = vadd.f32 %v4303_v55, %v4122_v15 }
 0x5cb   : > { %v4380_v50 = vadd.f32 %v6539_v59, %v4344_v25 }
 0x5cd   : > { %v4444_v32 = vadd.f32 %v4412_v7, %v4380_v50 }
 0x5cf   : > { %v4476_v26 = vmax.f32 %v4444_v32, 0.0 }
 0x5d0   : > { %v4305_v40 = vpop.f32.mrf.mxu1 }
 0x5d1   : > { %4508 = vst.msk [vmem:[%s6552_s24 + $0xd0] sm:$0xff] %vm226_vm1, %v4476_v26  ;;  %v4345_v41 = vadd.f32 %v4305_v40, %v4123_v44 }
 0x5d3   : > { %v4381_v22 = vadd.f32 %v6539_v59, %v4345_v41 }
 0x5d5   : > { %v4445_v20 = vadd.f32 %v4413_v11, %v4381_v22 }
 0x5d7   : > { %v4477_v48 = vmax.f32 %v4445_v20, 0.0 }
 0x5d8   : > { %v4308_v12 = vpop.f32.mrf.mxu1 }
 0x5d9   : > { %4509 = vst.msk [vmem:[%s6552_s24 + $0xd8] sm:$0xff] %vm226_vm1, %v4477_v48  ;;  %v4346_v19 = vadd.f32 %v4308_v12, %v4124_v28 }
 0x5db   : > { %v4382_v53 = vadd.f32 %v6539_v59, %v4346_v19 }
 0x5dd   : > { %v4446_v21 = vadd.f32 %v4414_v52, %v4382_v53 }
 0x5df   : > { %v4478_v10 = vmax.f32 %v4446_v21, 0.0 }
 0x5e0   : > { %v4310_v2 = vpop.f32.mrf.mxu1 }
 0x5e1   : > { %4510 = vst.msk [vmem:[%s6552_s24 + $0xe0] sm:$0xff] %vm226_vm1, %v4478_v10  ;;  %v4347_v62 = vadd.f32 %v4310_v2, %v4125_v61 }
 0x5e3   : > { %v4383_v54 = vadd.f32 %v6539_v59, %v4347_v62 }
 0x5e5   : > { %v4447_v9 = vadd.f32 %v4415_v1, %v4383_v54 }
 0x5e7   : > { %v4479_v30 = vmax.f32 %v4447_v9, 0.0 }
 0x5e8   : > { %v4313_v35 = vpop.f32.mrf.mxu1 }
 0x5e9   : > { %4511 = vst.msk [vmem:[%s6552_s24 + $0xe8] sm:$0xff] %vm226_vm1, %v4479_v30  ;;  %v4348_v23 = vadd.f32 %v4313_v35, %v4126_v0 }
 0x5eb   : > { %v4384_v24 = vadd.f32 %v6539_v59, %v4348_v23 }
 0x5ed   : > { %v4448_v45 = vadd.f32 %v4416_v39, %v4384_v24 }
 0x5ef   : > { %v4480_v27 = vmax.f32 %v4448_v45, 0.0 }
 0x5f0   : > { %v4315_v60 = vpop.f32.mrf.mxu1 }
 0x5f1   : > { %4512 = vst.msk [vmem:[%s6552_s24 + $0xf0] sm:$0xff] %vm226_vm1, %v4480_v27  ;;  %v4349_v13 = vadd.f32 %v4315_v60, %v4127_v29 }
 0x5f3   : > { %v4385_v31 = vadd.f32 %v6539_v59, %v4349_v13 }
 0x5f5   : > { %v4449_v63 = vadd.f32 %v4417_v18, %v4385_v31 }
 0x5f7   : > { %v4481_v56 = vmax.f32 %v4449_v63, 0.0 }
 0x5f9   : > { %4513 = vst.msk [vmem:[%s6552_s24 + $0xf8] sm:$0xff] %vm226_vm1, %v4481_v56 }
 0x5fa PF: > { %s15_s18 = sadd.s32 1, %s4906_s18  }
 0x5fb   : > { %p12_p4 = scmp.ge.s32.totalorder %s15_s18, 4  }
 0x5fd   :  { %14 = sbr.rel (!%p12_p4) target bundleno = 1 (0x1), region = 92 }

</bundles_post_ra>
